<compile_context>
chip_gen: v6e
topology: v6e:2x2x1
jax: 0.10.0
libtpu: 0.0.40
codegen_flags: <defaults>
</compile_context>

<pallas_src>
import jax
import jax.numpy as jnp
import numpy as np
from jax import lax
from jax.experimental import pallas as pl
from jax.experimental.pallas import tpu as pltpu

NEG_SLOPE = 0.01            # nn.LeakyReLU default negative_slope
C_OUT = 32
MXU_DTYPE = jnp.bfloat16    # MXU operand dtype (f32 accumulation); jnp.float32 for tight numerics
K1 = 16                     # stage-1 contraction dim (9 taps padded to 16)


def _leaky(x):
    return jnp.where(x > 0, x, NEG_SLOPE * x)


def _round_up(x, m):
    return ((x + m - 1) // m) * m


def _pick_block(n, cap=16):
    """Largest divisor of n that is <= cap and leaves >= 2 grid steps (v7x)."""
    best = 1
    for d in range(1, min(n, cap) + 1):
        if n % d == 0 and n // d >= 2:
            best = d
    return best


def prep_kernel_params(p):
    """Fold / re-layout PyTorch-shaped parameters for the kernel."""
    C = C_OUT
    # Fold 1x3 (kh==1 row) and 3x1 (kw==1 column) weights into the 3x3 stem.
    wct = p["w33"][:, 0].reshape(C, 9)                  # (C, kh*3+kw)
    wct = wct.at[:, 3:6].add(p["w13"][:, 0, 0, :])      # taps (kh=1, kw)
    wct = wct.at[:, 1::3].add(p["w31"][:, 0, :, 0])     # taps (kh, kw=1)
    wct = jnp.pad(wct, ((0, 0), (0, K1 - 9)))           # pad K: 9 -> 16 (zero cols)
    bsum = (p["b33"] + p["b13"] + p["b31"]).reshape(C, 1)
    # (C_out, C_in, 3, 3) -> (C_out, (kh*3+kw)*C_in + c_in) for the K=288 matmuls.
    w2t = jnp.transpose(p["w2"], (0, 2, 3, 1)).reshape(C, 9 * C).astype(MXU_DTYPE)
    w3t = jnp.transpose(p["w3"], (0, 2, 3, 1)).reshape(C, 9 * C).astype(MXU_DTYPE)
    return dict(wct=wct, bsum=bsum, w2t=w2t, b2=p["b2"].reshape(C, 1),
                w3t=w3t, b3=p["b3"].reshape(C, 1))


def three_three_forward(images, params):
    N, Cin, H, W = images.shape
    assert Cin == 1
    C = C_OUT
    Hp, Wp = H + 2, W + 2
    Lp = Hp * Wp                              # flattened padded grid (18*18 = 324)
    STRIDE = _round_up(Lp + Wp + 1, 128)      # per-image lane slot (384), zero gap >= Wp+1
    MARG = _round_up(Wp + 1, 64)              # zero margin for shifted tap reads (64)

    B_blk = _pick_block(N)                    # divisor of N, <= 16, leaves >= 2 steps
    num_steps = N // B_blk
    LA = B_blk * STRIDE                       # active lanes per grid step (mult of 128)
    Wtot = MARG + LA + MARG                   # margined slab width (mult of 128)

    kp = prep_kernel_params(params)

    # Data-prep glue (pure layout, no FLOPs): reflect pad, flatten the padded
    # grid, lay images out at STRIDE-lane slots with zero gaps + zero margins.
    x = images[:, 0]                                               # (N, H, W)
    xp = jnp.pad(x, ((0, 0), (1, 1), (1, 1)), mode="reflect").reshape(N, Lp)
    xs = jnp.pad(xp, ((0, 0), (0, STRIDE - Lp)))                   # (N, STRIDE)
    xin = xs.reshape(num_steps, 1, LA)
    xin = jnp.pad(xin, ((0, 0), (0, 0), (MARG, MARG)))             # (steps, 1, Wtot)

    rows = jnp.arange(Hp)
    cols = jnp.arange(Wp)
    interior = (((rows >= 1) & (rows <= H))[:, None]
                & ((cols >= 1) & (cols <= W))[None, :]).reshape(Lp)
    mslot = jnp.pad(interior.astype(jnp.float32), (0, STRIDE - Lp))
    mask = jnp.tile(mslot, B_blk).reshape(1, LA)                   # (1, LA)

    # Flat-grid tap offsets, kh-major (matches the weight layouts above).
    offs = [(kh - 1) * Wp + (kw - 1) for kh in range(3) for kw in range(3)]

    def kernel(x_ref, mask_ref, wct_ref, bsum_ref, w2t_ref, b2_ref,
               w3t_ref, b3_ref, out_ref, buf, col):
        bdt = buf.dtype
        # Only the margins need zeroing: the LA interior (incl. inter-image
        # gaps) is fully rewritten by the masked stores below every step, so
        # "parallel" sharding across cores stays safe.
        buf[:, 0:MARG] = jnp.zeros((C, MARG), bdt)
        buf[:, MARG + LA:Wtot] = jnp.zeros((C, MARG), bdt)

        msk = jnp.broadcast_to(mask_ref[...], (C, LA))     # hoisted broadcast

        # ---- stage 1: folded 3x3 stem (C_in = 1) as one K=16 MXU matmul ----
        taps = jnp.concatenate(
            [x_ref[0, :, MARG + d:MARG + d + LA] for d in offs]
            + [jnp.zeros((K1 - 9, LA), jnp.float32)], axis=0)      # (16, LA)
        acc1 = jnp.dot(wct_ref[...], taps, preferred_element_type=jnp.float32)
        out1 = _leaky(acc1 + bsum_ref[...]) * msk          # border & gaps -> 0
        buf[:, MARG:MARG + LA] = out1.astype(bdt)

        def im2col():
            # (9*C, LA): 9 lane-shifted windows of the zero-margined slab,
            # written into a persistent sublane-aligned VMEM scratch.
            for t, d in enumerate(offs):
                col[t * C:(t + 1) * C, :] = buf[:, MARG + d:MARG + d + LA]

        # ---- stage 2: 3x3 zero-pad conv as ONE (32,288)@(288,LA) matmul ----
        im2col()
        acc2 = jnp.dot(w2t_ref[...], col[...], preferred_element_type=jnp.float32)
        out2 = _leaky(acc2 + b2_ref[...]) * msk
        buf[:, MARG:MARG + LA] = out2.astype(bdt)

        # ---- stage 3: final 3x3 zero-pad conv (no activation) ----
        im2col()
        acc3 = jnp.dot(w3t_ref[...], col[...], preferred_element_type=jnp.float32)
        res3 = acc3 + b3_ref[...]
        # Per-image, lane-aligned slices -> NCHW-flat output (no transpose).
        for b in range(B_blk):
            out_ref[b] = res3[:, b * STRIDE:(b + 1) * STRIDE].astype(out_ref.dtype)

    in_specs = [
        pl.BlockSpec((1, 1, Wtot), lambda i: (i, 0, 0)),   # strided flat images
        pl.BlockSpec((1, LA), lambda i: (0, 0)),           # interior mask
        pl.BlockSpec((C, K1), lambda i: (0, 0)),           # folded stem weights
        pl.BlockSpec((C, 1), lambda i: (0, 0)),            # summed stem bias
        pl.BlockSpec((C, 9 * C), lambda i: (0, 0)),        # conv2 weights
        pl.BlockSpec((C, 1), lambda i: (0, 0)),            # conv2 bias
        pl.BlockSpec((C, 9 * C), lambda i: (0, 0)),        # conv3 weights
        pl.BlockSpec((C, 1), lambda i: (0, 0)),            # conv3 bias
    ]
    out_specs = pl.BlockSpec((B_blk, C, STRIDE), lambda i: (i, 0, 0))

    out_flat = pl.pallas_call(
        kernel,
        out_shape=jax.ShapeDtypeStruct((N, C, STRIDE), jnp.float32),
        grid_spec=pltpu.PrefetchScalarGridSpec(
            num_scalar_prefetch=0,
            grid=(num_steps,),
            in_specs=in_specs,
            out_specs=out_specs,
            scratch_shapes=[pltpu.VMEM((C, Wtot), MXU_DTYPE),      # activation slab
                            pltpu.VMEM((9 * C, LA), MXU_DTYPE)],   # im2col slab
        ),
        compiler_params=pltpu.CompilerParams(
            dimension_semantics=("parallel",),
            vmem_limit_bytes=32 * 1024 * 1024),
    )(xin, mask, kp["wct"], kp["bsum"], kp["w2t"], kp["b2"],
      kp["w3t"], kp["b3"])

    # Lane-dense slab -> crop the per-image slot and the 1-pixel padded border.
    return out_flat[:, :, :Lp].reshape(N, C, Hp, Wp)[:, :, 1:H + 1, 1:W + 1]


def init_params(key):
    """Parameters in PyTorch Conv2d shapes (OIHW weights, 1-D biases)."""
    ks = jax.random.split(key, 10)
    s = 0.1
    return dict(
        w33=s * jax.random.normal(ks[0], (C_OUT, 1, 3, 3), jnp.float32),
        b33=s * jax.random.normal(ks[1], (C_OUT,), jnp.float32),
        w13=s * jax.random.normal(ks[2], (C_OUT, 1, 1, 3), jnp.float32),
        b13=s * jax.random.normal(ks[3], (C_OUT,), jnp.float32),
        w31=s * jax.random.normal(ks[4], (C_OUT, 1, 3, 1), jnp.float32),
        b31=s * jax.random.normal(ks[5], (C_OUT,), jnp.float32),
        w2=s * jax.random.normal(ks[6], (C_OUT, C_OUT, 3, 3), jnp.float32),
        b2=s * jax.random.normal(ks[7], (C_OUT,), jnp.float32),
        w3=s * jax.random.normal(ks[8], (C_OUT, C_OUT, 3, 3), jnp.float32),
        b3=s * jax.random.normal(ks[9], (C_OUT,), jnp.float32),
    )


def reference_forward(images, p):
    """Pure-JAX (lax.conv, NCHW) replica of the PyTorch forward."""
    dn = ("NCHW", "OIHW", "NCHW")
    prec = lax.Precision.HIGHEST

    def bias(b):
        return b[None, :, None, None]

    x_full = jnp.pad(images, ((0, 0), (0, 0), (1, 1), (1, 1)), mode="reflect")
    x_w = jnp.pad(images, ((0, 0), (0, 0), (0, 0), (1, 1)), mode="reflect")
    x_h = jnp.pad(images, ((0, 0), (0, 0), (1, 1), (0, 0)), mode="reflect")

    out2 = lax.conv_general_dilated(x_full, p["w33"], (1, 1), "VALID",
                                    dimension_numbers=dn, precision=prec) + bias(p["b33"])
    out4 = lax.conv_general_dilated(x_w, p["w13"], (1, 1), "VALID",
                                    dimension_numbers=dn, precision=prec) + bias(p["b13"])
    out6 = lax.conv_general_dilated(x_h, p["w31"], (1, 1), "VALID",
                                    dimension_numbers=dn, precision=prec) + bias(p["b31"])
    out7 = _leaky(out2 + out4 + out6)
    out8 = lax.conv_general_dilated(out7, p["w2"], (1, 1), ((1, 1), (1, 1)),
                                    dimension_numbers=dn, precision=prec) + bias(p["b2"])
    out9 = _leaky(out8)
    out10 = lax.conv_general_dilated(out9, p["w3"], (1, 1), ((1, 1), (1, 1)),
                                     dimension_numbers=dn, precision=prec) + bias(p["b3"])
    return out10


if __name__ == "__main__":
    key = jax.random.PRNGKey(0)
    kparam, kimg = jax.random.split(key)
    params = init_params(kparam)
    # NCHW input like the PyTorch module: batch=2, 1 channel, 16x16 spatial.
    images = jax.random.normal(kimg, (2, 1, 16, 16), jnp.float32)

    out = jax.block_until_ready(three_three_forward(images, params))
    ref = jax.block_until_ready(reference_forward(images, params))

    assert out.shape == (2, 32, 16, 16), out.shape
    # bf16 MXU operands (f32 accumulation) per perf review -> 1e-2 tolerance;
    # set MXU_DTYPE = jnp.float32 above to validate at 1e-3.
    tol = 1e-2 if MXU_DTYPE is jnp.bfloat16 else 1e-3
    if not np.allclose(np.asarray(out), np.asarray(ref), rtol=tol, atol=tol):
        err = float(np.max(np.abs(np.asarray(out) - np.asarray(ref))))
        raise AssertionError(f"Pallas kernel mismatch vs reference, max abs err={err}")
    print("KERNEL_OK")
</pallas_src>

<mosaic_0001>
module attributes {stable_mosaic.version = 11 : i64} {
  func.func @kernel(%arg0: i32, %arg1: memref<1x1x512xf32, #tpu.memory_space<vmem>>, %arg2: memref<1x384xf32, #tpu.memory_space<vmem>>, %arg3: memref<32x16xf32, #tpu.memory_space<vmem>>, %arg4: memref<32x1xf32, #tpu.memory_space<vmem>>, %arg5: memref<32x288xbf16, #tpu.memory_space<vmem>>, %arg6: memref<32x1xf32, #tpu.memory_space<vmem>>, %arg7: memref<32x288xbf16, #tpu.memory_space<vmem>>, %arg8: memref<32x1xf32, #tpu.memory_space<vmem>>, %arg9: memref<1x32x384xf32, #tpu.memory_space<vmem>>, %arg10: memref<32x512xbf16, #tpu.memory_space<vmem>>, %arg11: memref<288x384xbf16, #tpu.memory_space<vmem>>) attributes {dimension_semantics = [#tpu.dimension_semantics<parallel>], iteration_bounds = array<i64: 2>, scalar_prefetch = 0 : i64, scratch_operands = 2 : i64, tpu.core_type = #tpu.core_type<tc>, window_params = [{transform_indices = @transform_0, window_bounds = array<i64: 1, 1, 512>}, {pipeline_mode = #tpu.pipeline_mode<synchronous>, transform_indices = @transform_1, window_bounds = array<i64: 1, 384>}, {pipeline_mode = #tpu.pipeline_mode<synchronous>, transform_indices = @transform_2, window_bounds = array<i64: 32, 16>}, {pipeline_mode = #tpu.pipeline_mode<synchronous>, transform_indices = @transform_3, window_bounds = array<i64: 32, 1>}, {pipeline_mode = #tpu.pipeline_mode<synchronous>, transform_indices = @transform_4, window_bounds = array<i64: 32, 288>}, {pipeline_mode = #tpu.pipeline_mode<synchronous>, transform_indices = @transform_5, window_bounds = array<i64: 32, 1>}, {pipeline_mode = #tpu.pipeline_mode<synchronous>, transform_indices = @transform_6, window_bounds = array<i64: 32, 288>}, {pipeline_mode = #tpu.pipeline_mode<synchronous>, transform_indices = @transform_7, window_bounds = array<i64: 32, 1>}, {transform_indices = @transform_8, window_bounds = array<i64: 1, 32, 384>}]} {
    %cst = arith.constant 0.000000e+00 : bf16
    %0 = vector.broadcast %cst : bf16 to vector<32x64xbf16>
    %c0 = arith.constant 0 : index
    %c0_0 = arith.constant 0 : index
    %1 = vector.load %arg10[%c0, %c0_0] : memref<32x512xbf16, #tpu.memory_space<vmem>>, vector<32x64xbf16>
    tpu.vector_store %arg10[%c0, %c0_0], %0 {strides = array<i32>} : memref<32x512xbf16, #tpu.memory_space<vmem>>, vector<32x64xbf16>,
    %cst_1 = arith.constant 0.000000e+00 : bf16
    %2 = vector.broadcast %cst_1 : bf16 to vector<32x64xbf16>
    %c0_2 = arith.constant 0 : index
    %c448 = arith.constant 448 : index
    %3 = vector.load %arg10[%c0_2, %c448] : memref<32x512xbf16, #tpu.memory_space<vmem>>, vector<32x64xbf16>
    tpu.vector_store %arg10[%c0_2, %c448], %2 {strides = array<i32>} : memref<32x512xbf16, #tpu.memory_space<vmem>>, vector<32x64xbf16>,
    %c0_3 = arith.constant 0 : index
    %c0_4 = arith.constant 0 : index
    %4 = vector.load %arg2[%c0_3, %c0_4] : memref<1x384xf32, #tpu.memory_space<vmem>>, vector<1x384xf32>
    %5 = vector.shape_cast %4 : vector<1x384xf32> to vector<1x384xf32>
    %6 = vector.broadcast %5 : vector<1x384xf32> to vector<32x384xf32>
    %c0_5 = arith.constant 0 : index
    %c0_6 = arith.constant 0 : index
    %c45 = arith.constant 45 : index
    %7 = vector.load %arg1[%c0_5, %c0_6, %c45] : memref<1x1x512xf32, #tpu.memory_space<vmem>>, vector<1x1x384xf32>
    %8 = vector.shape_cast %7 : vector<1x1x384xf32> to vector<1x384xf32>
    %c0_7 = arith.constant 0 : index
    %c0_8 = arith.constant 0 : index
    %c46 = arith.constant 46 : index
    %9 = vector.load %arg1[%c0_7, %c0_8, %c46] : memref<1x1x512xf32, #tpu.memory_space<vmem>>, vector<1x1x384xf32>
    %10 = vector.shape_cast %9 : vector<1x1x384xf32> to vector<1x384xf32>
    %c0_9 = arith.constant 0 : index
    %c0_10 = arith.constant 0 : index
    %c47 = arith.constant 47 : index
    %11 = vector.load %arg1[%c0_9, %c0_10, %c47] : memref<1x1x512xf32, #tpu.memory_space<vmem>>, vector<1x1x384xf32>
    %12 = vector.shape_cast %11 : vector<1x1x384xf32> to vector<1x384xf32>
    %c0_11 = arith.constant 0 : index
    %c0_12 = arith.constant 0 : index
    %c63 = arith.constant 63 : index
    %13 = vector.load %arg1[%c0_11, %c0_12, %c63] : memref<1x1x512xf32, #tpu.memory_space<vmem>>, vector<1x1x384xf32>
    %14 = vector.shape_cast %13 : vector<1x1x384xf32> to vector<1x384xf32>
    %c0_13 = arith.constant 0 : index
    %c0_14 = arith.constant 0 : index
    %c64 = arith.constant 64 : index
    %15 = vector.load %arg1[%c0_13, %c0_14, %c64] : memref<1x1x512xf32, #tpu.memory_space<vmem>>, vector<1x1x384xf32>
    %16 = vector.shape_cast %15 : vector<1x1x384xf32> to vector<1x384xf32>
    %c0_15 = arith.constant 0 : index
    %c0_16 = arith.constant 0 : index
    %c65 = arith.constant 65 : index
    %17 = vector.load %arg1[%c0_15, %c0_16, %c65] : memref<1x1x512xf32, #tpu.memory_space<vmem>>, vector<1x1x384xf32>
    %18 = vector.shape_cast %17 : vector<1x1x384xf32> to vector<1x384xf32>
    %c0_17 = arith.constant 0 : index
    %c0_18 = arith.constant 0 : index
    %c81 = arith.constant 81 : index
    %19 = vector.load %arg1[%c0_17, %c0_18, %c81] : memref<1x1x512xf32, #tpu.memory_space<vmem>>, vector<1x1x384xf32>
    %20 = vector.shape_cast %19 : vector<1x1x384xf32> to vector<1x384xf32>
    %c0_19 = arith.constant 0 : index
    %c0_20 = arith.constant 0 : index
    %c82 = arith.constant 82 : index
    %21 = vector.load %arg1[%c0_19, %c0_20, %c82] : memref<1x1x512xf32, #tpu.memory_space<vmem>>, vector<1x1x384xf32>
    %22 = vector.shape_cast %21 : vector<1x1x384xf32> to vector<1x384xf32>
    %c0_21 = arith.constant 0 : index
    %c0_22 = arith.constant 0 : index
    %c83 = arith.constant 83 : index
    %23 = vector.load %arg1[%c0_21, %c0_22, %c83] : memref<1x1x512xf32, #tpu.memory_space<vmem>>, vector<1x1x384xf32>
    %24 = vector.shape_cast %23 : vector<1x1x384xf32> to vector<1x384xf32>
    %cst_23 = arith.constant 0.000000e+00 : f32
    %25 = vector.broadcast %cst_23 : f32 to vector<7x384xf32>
    %26 = tpu.concatenate %8, %10, %12, %14, %16, %18, %20, %22, %24, %25 in 0 : vector<1x384xf32>, vector<1x384xf32>, vector<1x384xf32>, vector<1x384xf32>, vector<1x384xf32>, vector<1x384xf32>, vector<1x384xf32>, vector<1x384xf32>, vector<1x384xf32>, vector<7x384xf32> -> vector<16x384xf32>
    %c0_24 = arith.constant 0 : index
    %c0_25 = arith.constant 0 : index
    %27 = vector.load %arg3[%c0_24, %c0_25] : memref<32x16xf32, #tpu.memory_space<vmem>>, vector<32x16xf32>
    %cst_26 = arith.constant dense<0.000000e+00> : vector<32x384xf32>
    %28 = tpu.matmul %27, %26, %cst_26 {dimension_numbers = #tpu.dot_dimension_numbers<[1], [0], [0], [1], [0, 0, 1, 1], [], []>} : vector<32x16xf32>, vector<16x384xf32>, vector<32x384xf32> -> vector<32x384xf32>
    %c0_27 = arith.constant 0 : index
    %c0_28 = arith.constant 0 : index
    %29 = vector.load %arg4[%c0_27, %c0_28] : memref<32x1xf32, #tpu.memory_space<vmem>>, vector<32x1xf32>
    %30 = vector.broadcast %29 : vector<32x1xf32> to vector<32x384xf32>
    %31 = arith.addf %28, %30 : vector<32x384xf32>
    %cst_29 = arith.constant 0.000000e+00 : f32
    %32 = vector.broadcast %cst_29 : f32 to vector<32x384xf32>
    %33 = arith.cmpf ogt, %31, %32 : vector<32x384xf32>
    %cst_30 = arith.constant 0.00999999977 : f32
    %34 = vector.broadcast %cst_30 : f32 to vector<32x384xf32>
    %35 = arith.mulf %34, %31 : vector<32x384xf32>
    %36 = arith.select %33, %31, %35 : vector<32x384xi1>, vector<32x384xf32>
    %37 = arith.mulf %36, %6 : vector<32x384xf32>
    %38 = arith.truncf %37 : vector<32x384xf32> to vector<32x384xbf16>
    %c0_31 = arith.constant 0 : index
    %c64_32 = arith.constant 64 : index
    %39 = vector.load %arg10[%c0_31, %c64_32] : memref<32x512xbf16, #tpu.memory_space<vmem>>, vector<32x384xbf16>
    tpu.vector_store %arg10[%c0_31, %c64_32], %38 {strides = array<i32>} : memref<32x512xbf16, #tpu.memory_space<vmem>>, vector<32x384xbf16>,
    %c0_33 = arith.constant 0 : index
    %c45_34 = arith.constant 45 : index
    %40 = vector.load %arg10[%c0_33, %c45_34] : memref<32x512xbf16, #tpu.memory_space<vmem>>, vector<32x384xbf16>
    %c0_35 = arith.constant 0 : index
    %c0_36 = arith.constant 0 : index
    %41 = vector.load %arg11[%c0_35, %c0_36] : memref<288x384xbf16, #tpu.memory_space<vmem>>, vector<32x384xbf16>
    tpu.vector_store %arg11[%c0_35, %c0_36], %40 {strides = array<i32>} : memref<288x384xbf16, #tpu.memory_space<vmem>>, vector<32x384xbf16>,
    %c0_37 = arith.constant 0 : index
    %c46_38 = arith.constant 46 : index
    %42 = vector.load %arg10[%c0_37, %c46_38] : memref<32x512xbf16, #tpu.memory_space<vmem>>, vector<32x384xbf16>
    %c32 = arith.constant 32 : index
    %c0_39 = arith.constant 0 : index
    %43 = vector.load %arg11[%c32, %c0_39] : memref<288x384xbf16, #tpu.memory_space<vmem>>, vector<32x384xbf16>
    tpu.vector_store %arg11[%c32, %c0_39], %42 {strides = array<i32>} : memref<288x384xbf16, #tpu.memory_space<vmem>>, vector<32x384xbf16>,
    %c0_40 = arith.constant 0 : index
    %c47_41 = arith.constant 47 : index
    %44 = vector.load %arg10[%c0_40, %c47_41] : memref<32x512xbf16, #tpu.memory_space<vmem>>, vector<32x384xbf16>
    %c64_42 = arith.constant 64 : index
    %c0_43 = arith.constant 0 : index
    %45 = vector.load %arg11[%c64_42, %c0_43] : memref<288x384xbf16, #tpu.memory_space<vmem>>, vector<32x384xbf16>
    tpu.vector_store %arg11[%c64_42, %c0_43], %44 {strides = array<i32>} : memref<288x384xbf16, #tpu.memory_space<vmem>>, vector<32x384xbf16>,
    %c0_44 = arith.constant 0 : index
    %c63_45 = arith.constant 63 : index
    %46 = vector.load %arg10[%c0_44, %c63_45] : memref<32x512xbf16, #tpu.memory_space<vmem>>, vector<32x384xbf16>
    %c96 = arith.constant 96 : index
    %c0_46 = arith.constant 0 : index
    %47 = vector.load %arg11[%c96, %c0_46] : memref<288x384xbf16, #tpu.memory_space<vmem>>, vector<32x384xbf16>
    tpu.vector_store %arg11[%c96, %c0_46], %46 {strides = array<i32>} : memref<288x384xbf16, #tpu.memory_space<vmem>>, vector<32x384xbf16>,
    %c0_47 = arith.constant 0 : index
    %c64_48 = arith.constant 64 : index
    %48 = vector.load %arg10[%c0_47, %c64_48] : memref<32x512xbf16, #tpu.memory_space<vmem>>, vector<32x384xbf16>
    %c128 = arith.constant 128 : index
    %c0_49 = arith.constant 0 : index
    %49 = vector.load %arg11[%c128, %c0_49] : memref<288x384xbf16, #tpu.memory_space<vmem>>, vector<32x384xbf16>
    tpu.vector_store %arg11[%c128, %c0_49], %48 {strides = array<i32>} : memref<288x384xbf16, #tpu.memory_space<vmem>>, vector<32x384xbf16>,
    %c0_50 = arith.constant 0 : index
    %c65_51 = arith.constant 65 : index
    %50 = vector.load %arg10[%c0_50, %c65_51] : memref<32x512xbf16, #tpu.memory_space<vmem>>, vector<32x384xbf16>
    %c160 = arith.constant 160 : index
    %c0_52 = arith.constant 0 : index
    %51 = vector.load %arg11[%c160, %c0_52] : memref<288x384xbf16, #tpu.memory_space<vmem>>, vector<32x384xbf16>
    tpu.vector_store %arg11[%c160, %c0_52], %50 {strides = array<i32>} : memref<288x384xbf16, #tpu.memory_space<vmem>>, vector<32x384xbf16>,
    %c0_53 = arith.constant 0 : index
    %c81_54 = arith.constant 81 : index
    %52 = vector.load %arg10[%c0_53, %c81_54] : memref<32x512xbf16, #tpu.memory_space<vmem>>, vector<32x384xbf16>
    %c192 = arith.constant 192 : index
    %c0_55 = arith.constant 0 : index
    %53 = vector.load %arg11[%c192, %c0_55] : memref<288x384xbf16, #tpu.memory_space<vmem>>, vector<32x384xbf16>
    tpu.vector_store %arg11[%c192, %c0_55], %52 {strides = array<i32>} : memref<288x384xbf16, #tpu.memory_space<vmem>>, vector<32x384xbf16>,
    %c0_56 = arith.constant 0 : index
    %c82_57 = arith.constant 82 : index
    %54 = vector.load %arg10[%c0_56, %c82_57] : memref<32x512xbf16, #tpu.memory_space<vmem>>, vector<32x384xbf16>
    %c224 = arith.constant 224 : index
    %c0_58 = arith.constant 0 : index
    %55 = vector.load %arg11[%c224, %c0_58] : memref<288x384xbf16, #tpu.memory_space<vmem>>, vector<32x384xbf16>
    tpu.vector_store %arg11[%c224, %c0_58], %54 {strides = array<i32>} : memref<288x384xbf16, #tpu.memory_space<vmem>>, vector<32x384xbf16>,
    %c0_59 = arith.constant 0 : index
    %c83_60 = arith.constant 83 : index
    %56 = vector.load %arg10[%c0_59, %c83_60] : memref<32x512xbf16, #tpu.memory_space<vmem>>, vector<32x384xbf16>
    %c256 = arith.constant 256 : index
    %c0_61 = arith.constant 0 : index
    %57 = vector.load %arg11[%c256, %c0_61] : memref<288x384xbf16, #tpu.memory_space<vmem>>, vector<32x384xbf16>
    tpu.vector_store %arg11[%c256, %c0_61], %56 {strides = array<i32>} : memref<288x384xbf16, #tpu.memory_space<vmem>>, vector<32x384xbf16>,
    %c0_62 = arith.constant 0 : index
    %c0_63 = arith.constant 0 : index
    %58 = vector.load %arg5[%c0_62, %c0_63] : memref<32x288xbf16, #tpu.memory_space<vmem>>, vector<32x288xbf16>
    %c0_64 = arith.constant 0 : index
    %c0_65 = arith.constant 0 : index
    %59 = vector.load %arg11[%c0_64, %c0_65] : memref<288x384xbf16, #tpu.memory_space<vmem>>, vector<288x384xbf16>
    %cst_66 = arith.constant dense<0.000000e+00> : vector<32x384xf32>
    %60 = tpu.matmul %58, %59, %cst_66 {dimension_numbers = #tpu.dot_dimension_numbers<[1], [0], [0], [1], [0, 0, 1, 1], [], []>} : vector<32x288xbf16>, vector<288x384xbf16>, vector<32x384xf32> -> vector<32x384xf32>
    %c0_67 = arith.constant 0 : index
    %c0_68 = arith.constant 0 : index
    %61 = vector.load %arg6[%c0_67, %c0_68] : memref<32x1xf32, #tpu.memory_space<vmem>>, vector<32x1xf32>
    %62 = vector.broadcast %61 : vector<32x1xf32> to vector<32x384xf32>
    %63 = arith.addf %60, %62 : vector<32x384xf32>
    %cst_69 = arith.constant 0.000000e+00 : f32
    %64 = vector.broadcast %cst_69 : f32 to vector<32x384xf32>
    %65 = arith.cmpf ogt, %63, %64 : vector<32x384xf32>
    %cst_70 = arith.constant 0.00999999977 : f32
    %66 = vector.broadcast %cst_70 : f32 to vector<32x384xf32>
    %67 = arith.mulf %66, %63 : vector<32x384xf32>
    %68 = arith.select %65, %63, %67 : vector<32x384xi1>, vector<32x384xf32>
    %69 = arith.mulf %68, %6 : vector<32x384xf32>
    %70 = arith.truncf %69 : vector<32x384xf32> to vector<32x384xbf16>
    %c0_71 = arith.constant 0 : index
    %c64_72 = arith.constant 64 : index
    %71 = vector.load %arg10[%c0_71, %c64_72] : memref<32x512xbf16, #tpu.memory_space<vmem>>, vector<32x384xbf16>
    tpu.vector_store %arg10[%c0_71, %c64_72], %70 {strides = array<i32>} : memref<32x512xbf16, #tpu.memory_space<vmem>>, vector<32x384xbf16>,
    %c0_73 = arith.constant 0 : index
    %c45_74 = arith.constant 45 : index
    %72 = vector.load %arg10[%c0_73, %c45_74] : memref<32x512xbf16, #tpu.memory_space<vmem>>, vector<32x384xbf16>
    %c0_75 = arith.constant 0 : index
    %c0_76 = arith.constant 0 : index
    %73 = vector.load %arg11[%c0_75, %c0_76] : memref<288x384xbf16, #tpu.memory_space<vmem>>, vector<32x384xbf16>
    tpu.vector_store %arg11[%c0_75, %c0_76], %72 {strides = array<i32>} : memref<288x384xbf16, #tpu.memory_space<vmem>>, vector<32x384xbf16>,
    %c0_77 = arith.constant 0 : index
    %c46_78 = arith.constant 46 : index
    %74 = vector.load %arg10[%c0_77, %c46_78] : memref<32x512xbf16, #tpu.memory_space<vmem>>, vector<32x384xbf16>
    %c32_79 = arith.constant 32 : index
    %c0_80 = arith.constant 0 : index
    %75 = vector.load %arg11[%c32_79, %c0_80] : memref<288x384xbf16, #tpu.memory_space<vmem>>, vector<32x384xbf16>
    tpu.vector_store %arg11[%c32_79, %c0_80], %74 {strides = array<i32>} : memref<288x384xbf16, #tpu.memory_space<vmem>>, vector<32x384xbf16>,
    %c0_81 = arith.constant 0 : index
    %c47_82 = arith.constant 47 : index
    %76 = vector.load %arg10[%c0_81, %c47_82] : memref<32x512xbf16, #tpu.memory_space<vmem>>, vector<32x384xbf16>
    %c64_83 = arith.constant 64 : index
    %c0_84 = arith.constant 0 : index
    %77 = vector.load %arg11[%c64_83, %c0_84] : memref<288x384xbf16, #tpu.memory_space<vmem>>, vector<32x384xbf16>
    tpu.vector_store %arg11[%c64_83, %c0_84], %76 {strides = array<i32>} : memref<288x384xbf16, #tpu.memory_space<vmem>>, vector<32x384xbf16>,
    %c0_85 = arith.constant 0 : index
    %c63_86 = arith.constant 63 : index
    %78 = vector.load %arg10[%c0_85, %c63_86] : memref<32x512xbf16, #tpu.memory_space<vmem>>, vector<32x384xbf16>
    %c96_87 = arith.constant 96 : index
    %c0_88 = arith.constant 0 : index
    %79 = vector.load %arg11[%c96_87, %c0_88] : memref<288x384xbf16, #tpu.memory_space<vmem>>, vector<32x384xbf16>
    tpu.vector_store %arg11[%c96_87, %c0_88], %78 {strides = array<i32>} : memref<288x384xbf16, #tpu.memory_space<vmem>>, vector<32x384xbf16>,
    %c0_89 = arith.constant 0 : index
    %c64_90 = arith.constant 64 : index
    %80 = vector.load %arg10[%c0_89, %c64_90] : memref<32x512xbf16, #tpu.memory_space<vmem>>, vector<32x384xbf16>
    %c128_91 = arith.constant 128 : index
    %c0_92 = arith.constant 0 : index
    %81 = vector.load %arg11[%c128_91, %c0_92] : memref<288x384xbf16, #tpu.memory_space<vmem>>, vector<32x384xbf16>
    tpu.vector_store %arg11[%c128_91, %c0_92], %80 {strides = array<i32>} : memref<288x384xbf16, #tpu.memory_space<vmem>>, vector<32x384xbf16>,
    %c0_93 = arith.constant 0 : index
    %c65_94 = arith.constant 65 : index
    %82 = vector.load %arg10[%c0_93, %c65_94] : memref<32x512xbf16, #tpu.memory_space<vmem>>, vector<32x384xbf16>
    %c160_95 = arith.constant 160 : index
    %c0_96 = arith.constant 0 : index
    %83 = vector.load %arg11[%c160_95, %c0_96] : memref<288x384xbf16, #tpu.memory_space<vmem>>, vector<32x384xbf16>
    tpu.vector_store %arg11[%c160_95, %c0_96], %82 {strides = array<i32>} : memref<288x384xbf16, #tpu.memory_space<vmem>>, vector<32x384xbf16>,
    %c0_97 = arith.constant 0 : index
    %c81_98 = arith.constant 81 : index
    %84 = vector.load %arg10[%c0_97, %c81_98] : memref<32x512xbf16, #tpu.memory_space<vmem>>, vector<32x384xbf16>
    %c192_99 = arith.constant 192 : index
    %c0_100 = arith.constant 0 : index
    %85 = vector.load %arg11[%c192_99, %c0_100] : memref<288x384xbf16, #tpu.memory_space<vmem>>, vector<32x384xbf16>
    tpu.vector_store %arg11[%c192_99, %c0_100], %84 {strides = array<i32>} : memref<288x384xbf16, #tpu.memory_space<vmem>>, vector<32x384xbf16>,
    %c0_101 = arith.constant 0 : index
    %c82_102 = arith.constant 82 : index
    %86 = vector.load %arg10[%c0_101, %c82_102] : memref<32x512xbf16, #tpu.memory_space<vmem>>, vector<32x384xbf16>
    %c224_103 = arith.constant 224 : index
    %c0_104 = arith.constant 0 : index
    %87 = vector.load %arg11[%c224_103, %c0_104] : memref<288x384xbf16, #tpu.memory_space<vmem>>, vector<32x384xbf16>
    tpu.vector_store %arg11[%c224_103, %c0_104], %86 {strides = array<i32>} : memref<288x384xbf16, #tpu.memory_space<vmem>>, vector<32x384xbf16>,
    %c0_105 = arith.constant 0 : index
    %c83_106 = arith.constant 83 : index
    %88 = vector.load %arg10[%c0_105, %c83_106] : memref<32x512xbf16, #tpu.memory_space<vmem>>, vector<32x384xbf16>
    %c256_107 = arith.constant 256 : index
    %c0_108 = arith.constant 0 : index
    %89 = vector.load %arg11[%c256_107, %c0_108] : memref<288x384xbf16, #tpu.memory_space<vmem>>, vector<32x384xbf16>
    tpu.vector_store %arg11[%c256_107, %c0_108], %88 {strides = array<i32>} : memref<288x384xbf16, #tpu.memory_space<vmem>>, vector<32x384xbf16>,
    %c0_109 = arith.constant 0 : index
    %c0_110 = arith.constant 0 : index
    %90 = vector.load %arg7[%c0_109, %c0_110] : memref<32x288xbf16, #tpu.memory_space<vmem>>, vector<32x288xbf16>
    %c0_111 = arith.constant 0 : index
    %c0_112 = arith.constant 0 : index
    %91 = vector.load %arg11[%c0_111, %c0_112] : memref<288x384xbf16, #tpu.memory_space<vmem>>, vector<288x384xbf16>
    %cst_113 = arith.constant dense<0.000000e+00> : vector<32x384xf32>
    %92 = tpu.matmul %90, %91, %cst_113 {dimension_numbers = #tpu.dot_dimension_numbers<[1], [0], [0], [1], [0, 0, 1, 1], [], []>} : vector<32x288xbf16>, vector<288x384xbf16>, vector<32x384xf32> -> vector<32x384xf32>
    %c0_114 = arith.constant 0 : index
    %c0_115 = arith.constant 0 : index
    %93 = vector.load %arg8[%c0_114, %c0_115] : memref<32x1xf32, #tpu.memory_space<vmem>>, vector<32x1xf32>
    %94 = vector.broadcast %93 : vector<32x1xf32> to vector<32x384xf32>
    %95 = arith.addf %92, %94 : vector<32x384xf32>
    %c0_116 = arith.constant 0 : index
    %c0_117 = arith.constant 0 : index
    %c0_118 = arith.constant 0 : index
    %96 = vector.load %arg9[%c0_116, %c0_117, %c0_118] : memref<1x32x384xf32, #tpu.memory_space<vmem>>, vector<1x32x384xf32>
    %97 = vector.shape_cast %96 : vector<1x32x384xf32> to vector<32x384xf32>
    %98 = vector.shape_cast %95 : vector<32x384xf32> to vector<1x32x384xf32>
    tpu.vector_store %arg9[%c0_116, %c0_117, %c0_118], %98 {strides = array<i32>} : memref<1x32x384xf32, #tpu.memory_space<vmem>>, vector<1x32x384xf32>,
    return
  }
  func.func @transform_0(%arg0: i32) -> (i32, i32, i32) {
    %c0_i32 = arith.constant 0 : i32
    %c0_i32_0 = arith.constant 0 : i32
    %c0_i32_1 = arith.constant 0 : i32
    return %arg0, %c0_i32, %c0_i32_0 : i32, i32, i32
  }
  func.func @transform_1(%arg0: i32) -> (i32, i32) {
    %c0_i32 = arith.constant 0 : i32
    %c0_i32_0 = arith.constant 0 : i32
    %c0_i32_1 = arith.constant 0 : i32
    return %c0_i32, %c0_i32_0 : i32, i32
  }
  func.func @transform_2(%arg0: i32) -> (i32, i32) {
    %c0_i32 = arith.constant 0 : i32
    %c0_i32_0 = arith.constant 0 : i32
    %c0_i32_1 = arith.constant 0 : i32
    return %c0_i32, %c0_i32_0 : i32, i32
  }
  func.func @transform_3(%arg0: i32) -> (i32, i32) {
    %c0_i32 = arith.constant 0 : i32
    %c0_i32_0 = arith.constant 0 : i32
    %c0_i32_1 = arith.constant 0 : i32
    return %c0_i32, %c0_i32_0 : i32, i32
  }
  func.func @transform_4(%arg0: i32) -> (i32, i32) {
    %c0_i32 = arith.constant 0 : i32
    %c0_i32_0 = arith.constant 0 : i32
    %c0_i32_1 = arith.constant 0 : i32
    return %c0_i32, %c0_i32_0 : i32, i32
  }
  func.func @transform_5(%arg0: i32) -> (i32, i32) {
    %c0_i32 = arith.constant 0 : i32
    %c0_i32_0 = arith.constant 0 : i32
    %c0_i32_1 = arith.constant 0 : i32
    return %c0_i32, %c0_i32_0 : i32, i32
  }
  func.func @transform_6(%arg0: i32) -> (i32, i32) {
    %c0_i32 = arith.constant 0 : i32
    %c0_i32_0 = arith.constant 0 : i32
    %c0_i32_1 = arith.constant 0 : i32
    return %c0_i32, %c0_i32_0 : i32, i32
  }
  func.func @transform_7(%arg0: i32) -> (i32, i32) {
    %c0_i32 = arith.constant 0 : i32
    %c0_i32_0 = arith.constant 0 : i32
    %c0_i32_1 = arith.constant 0 : i32
    return %c0_i32, %c0_i32_0 : i32, i32
  }
  func.func @transform_8(%arg0: i32) -> (i32, i32, i32) {
    %c0_i32 = arith.constant 0 : i32
    %c0_i32_0 = arith.constant 0 : i32
    %c0_i32_1 = arith.constant 0 : i32
    return %arg0, %c0_i32, %c0_i32_0 : i32, i32, i32
  }
}

</mosaic_0001>

<bundles_post_ra>
// kernel: tpu_custom_call.1
= control target key start
LH: loop header
LB: loop body
LE: loop exit
PB: predicated region body
PF: predicated region fallthrough
CT: control target
= control target key end

     0   :  { %13 = vsyncpa [#allocation5], 0  ;;  %s5651_s0 = inlined_call_operand.vmem [shape: f32[2,1,512], index: 0, kind: input, shape index: {}]   ;;  %s5652_s1 = inlined_call_operand.vmem [shape: f32[1,384], index: 1, kind: input, shape index: {}]   ;;  %s5653_s2 = inlined_call_operand.vmem [shape: f32[32,16], index: 2, kind: input, shape index: {}]   ;;  %s5654_s3 = inlined_call_operand.vmem [shape: f32[32,1], index: 3, kind: input, shape index: {}]   ;;  %s5655_s4 = inlined_call_operand.vmem [shape: bf16[32,288], index: 4, kind: input, shape index: {}]   ;;  %s5656_s5 = inlined_call_operand.vmem [shape: f32[32,1], index: 5, kind: input, shape index: {}]   ;;  %s5657_s6 = inlined_call_operand.vmem [shape: bf16[32,288], index: 6, kind: input, shape index: {}]   ;;  %s5658_s7 = inlined_call_operand.vmem [shape: f32[32,1], index: 7, kind: input, shape index: {}]   ;;  %s5659_s8 = inlined_call_operand.hbm [shape: f32[2,32,384], index: 8, kind: output, shape index: {}]  }
   0x1   :  { %15 = vsyncpa [#allocation5 + $0x1], 0  ;;  %s4142_s27 = smov 0   ;;  %s4144_s28 = smov 0  }
   0x2   :  { %s4146_s29 = smov 0   ;;  %s4148_s30 = smov 0  }
   0x3 LB: > { %s4163_s9 = sadd.s32 4294967295, %s4073_s30   ;;  %s3625_s10 = sadd.s32 4294967294, %s4073_s30   ;;  %s4073_s30 = sphi %s4148_s30, %s5692_s30   ;;  %s4069_s29 = sphi %s4146_s29, %s5691_s29   ;;  %s4065_s28 = sphi %s4144_s28, %s5690_s28   ;;  %s4061_s27 = sphi %s4142_s27, %s5689_s27  }
   0x4   : > { %s4167_s11 = sadd.s32 1, %s4073_s30   ;;  %s201_s12 = sadd.s32 1, %s4069_s29 }
   0x5   : > { %s198_s13 = ssub.s32 %s4073_s30, %s4167_s11  ;;  %p211_p0 = scmp.ne.s32.totalorder %s4069_s29, %s4065_s28 }
   0x6   : > { %p199_p1 = scmp.eq.s32.totalorder %s198_s13, 0  ;;  %p212_p2 = scmp.eq.s32.totalorder %s4163_s9, 1 }
   0x7   : > { %p217_p3 = scmp.ne.s32.totalorder %s4065_s28, %s4061_s27  ;;  %p218_p4 = scmp.eq.s32.totalorder %s3625_s10, 1 }
   0x8   : > { %s4178_s14 = scalar_select %p199_p1, %s4069_s29, %s201_s12  }
   0x9   : > { %p4180_p5 = por %p212_p2, %p211_p0  ;;  %p4184_p6 = por %p218_p4, %p217_p3 }
   0xa   : > { %p3628_p7 = scmp.ge.s32.totalorder %s4073_s30, 1  ;;  %p264_p8 = scmp.lt.s32.totalorder %s4073_s30, 3 }
   0xc   : > { %p265_p9 = pnand %p3628_p7, %p264_p8 }
   0xd   : > { %p297_p10 = scmp.lt.s32.totalorder (!%p265_p9), %s4163_s9, 1  ;;  %s4075_s22 = smov (!%p265_p9), 127  }
   0xe   : > { %268 = sbr.rel (%p265_p9) target bundleno = 1772 (0x6ec), region = 52  ;;  %s4076_s23 = smov (!%p265_p9), 126  }
   0xf   : > { %s4077_s24 = smov (!%p265_p9), 110   ;;  %s4078_s25 = smov (!%p265_p9), 109  }
  0x10   : > { %s4079_s26 = smov (!%p265_p9), 108   ;;  %s4080_s10 = smov (!%p265_p9), 90  }
  0x11   : > { %s4081_s12 = smov (!%p265_p9), 92   ;;  %s4082_s13 = smov (!%p265_p9), 91  }
  0x12   : > { %s5660_s19 = smov (!%p265_p9), 63   ;;  %s5684_s20 = smov (!%p265_p9), 63  }
  0x13   : > { %v314_v0 = vlaneseq  ;;  %s298_s17 = scalar_select %p297_p10, %s4163_s9, 1  ;;  %vm471_vm0 = vcmask 736256   ;;  %vm479_vm1 = vcmask 1040384   ;;  %vm359_vm2 = vcmask 1039360   ;;  %v4300_v54 = vld [vmem:[%s5653_s2] sm:$0xff] }
  0x14   : > { %vm375_vm3 = vcmask 1031168   ;;  %vm484_vm4 = vcmask 1041408   ;;  %vm391_vm5 = vcmask 900096   ;;  %vm489_vm6 = vcmask 1042432  }
  0x15   : > { %v4192_v1 = vshrl.u32 %v314_v0, 7  ;;  %s3629_s18 = sshll.u32 %s298_s17, 2  ;;  %s4083_s17 = smov 83   ;;  %vm407_vm7 = vcmask 891904   ;;  %vm494_vm8 = vcmask 1043456   ;;  %vm423_vm9 = vcmask 883712  }
  0x16   : > { %s300_s21 = scalar_lea.vmem %s5651_s0, %s3629_s18  ;;  %vm499_vm10 = vcmask 1044480   ;;  %vm439_vm11 = vcmask 752640   ;;  %vm504_vm12 = vcmask 1045504   ;;  %vm455_vm13 = vcmask 744448   ;;  %s4092_s18 = smov 47  }
  0x17   : > { %v345_v2 = vsub.s32 3, %v4192_v1  ;;  %v320_v3 = vsub.s32 1, %v4192_v1  ;;  %v324_v4 = vsub.s32 2, %v4192_v1  ;;  %v316_v5 = vsub.s32 0, %v4192_v1  ;;  %v329_v6 = vld [vmem:[%s300_s21] sm:$0xf] }
  0x18   : > { %vm509_vm14 = vcmask 1046528   ;;  %v4084_v53 = vmov 0.0   ;;  %vm583_vm15 = vcmask 130048  }
  0x19   : > { %v4201_v7 = vrot.slane %v329_v6, %v345_v2  ;;  %v4205_v8 = vrot.slane %v329_v6, %v320_v3  ;;  %v4211_v9 = vrot.slane %v329_v6, %v324_v4  ;;  %v4215_v10 = vrot.slane %v329_v6, %v316_v5  ;;  %660 = vmatprep.mubr.f32.mxu0 %v4084_v53 }
  0x1a   : > { %3875 = vmatprep.mubr.msk.f32.mxu1 %vm583_vm15, %v4300_v54 }
  0x1b   : > { %357 = vrot.lane.b32.xlu1 %v4201_v7, %s4075_s22  ;;  %353 = vrot.lane.b32.xlu0 %v4205_v8, %s4075_s22 }
  0x1f   : > { %355 = vrot.lane.b32.xlu0 %v4211_v9, %s4075_s22  ;;  %351 = vrot.lane.b32.xlu1 %v4215_v10, %s4075_s22  ;;  %s3898_s22 = smul.u32 1536, %s4163_s9 }
  0x23   : > { %369 = vrot.lane.b32.xlu0 %v4205_v8, %s4076_s23  ;;  %371 = vrot.lane.b32.xlu1 %v4211_v9, %s4076_s23 }
  0x27   : > { %373 = vrot.lane.b32.xlu0 %v4201_v7, %s4076_s23  ;;  %367 = vrot.lane.b32.xlu1 %v4215_v10, %s4076_s23 }
  0x2b   : > { %385 = vrot.lane.b32.xlu0 %v4205_v8, %s4077_s24  ;;  %387 = vrot.lane.b32.xlu1 %v4211_v9, %s4077_s24 }
  0x2f   : > { %389 = vrot.lane.b32.xlu0 %v4201_v7, %s4077_s24  ;;  %383 = vrot.lane.b32.xlu1 %v4215_v10, %s4077_s24  ;;  %s4086_s24 = smov 64  }
  0x33   : > { %401 = vrot.lane.b32.xlu0 %v4205_v8, %s4078_s25  ;;  %403 = vrot.lane.b32.xlu1 %v4211_v9, %s4078_s25 }
  0x37   : > { %405 = vrot.lane.b32.xlu0 %v4201_v7, %s4078_s25  ;;  %399 = vrot.lane.b32.xlu1 %v4215_v10, %s4078_s25  ;;  %s4087_s25 = smov 65  }
  0x3b   : > { %417 = vrot.lane.b32.xlu0 %v4205_v8, %s4079_s26  ;;  %419 = vrot.lane.b32.xlu1 %v4211_v9, %s4079_s26 }
  0x3f   : > { %421 = vrot.lane.b32.xlu0 %v4201_v7, %s4079_s26  ;;  %465 = vrot.lane.b32.xlu1 %v4205_v8, %s4080_s10 }
  0x43   : > { %467 = vrot.lane.b32.xlu0 %v4211_v9, %s4080_s10  ;;  %469 = vrot.lane.b32.xlu1 %v4201_v7, %s4080_s10 }
  0x47   : > { %415 = vrot.lane.b32.xlu0 %v4215_v10, %s4079_s26  ;;  %433 = vrot.lane.b32.xlu1 %v4205_v8, %s4081_s12  ;;  %s4088_s26 = smov 81  }
  0x4b   : > { %435 = vrot.lane.b32.xlu0 %v4211_v9, %s4081_s12  ;;  %437 = vrot.lane.b32.xlu1 %v4201_v7, %s4081_s12 }
  0x4f   : > { %463 = vrot.lane.b32.xlu0 %v4215_v10, %s4080_s10  ;;  %431 = vrot.lane.b32.xlu1 %v4215_v10, %s4081_s12  ;;  %s4089_s10 = smov 82   ;;  %s4090_s12 = smov 45  }
  0x53   : > { %449 = vrot.lane.b32.xlu0 %v4205_v8, %s4082_s13  ;;  %451 = vrot.lane.b32.xlu1 %v4211_v9, %s4082_s13 }
  0x57   : > { %453 = vrot.lane.b32.xlu0 %v4201_v7, %s4082_s13  ;;  %447 = vrot.lane.b32.xlu1 %v4215_v10, %s4082_s13  ;;  %s4091_s13 = smov 46  }
  0x8d   : > { %v4247_v11 = vpop.permute.xlu1 %357  ;;  %v354_v12 = vpop.permute.xlu0 %353 }
  0x91   : > { %v356_v13 = vpop.permute.xlu0 %355  ;;  %v352_v14 = vpop.permute.xlu1 %351 }
  0x92   : > { %v361_v39 = vsel %vm359_vm2, %v354_v12, %v356_v13  ;;  %v362_v40 = vsel %vm359_vm2, %v356_v13, %v4247_v11  ;;  %v360_v43 = vsel %vm359_vm2, %v352_v14, %v354_v12  ;;  %vm307_vm2 = vcmask 1043968  }
  0x93   : > { %v481_v45 = vsel %vm479_vm1, %v4205_v8, %v361_v39  ;;  %v482_v46 = vsel %vm479_vm1, %v4211_v9, %v362_v40  ;;  %v480_v59 = vsel %vm479_vm1, %v4215_v10, %v360_v43 }
  0x95   : > { %v370_v15 = vpop.permute.xlu0 %369  ;;  %v372_v16 = vpop.permute.xlu1 %371 }
  0x96   : > { %v377_v44 = vsel %vm375_vm3, %v370_v15, %v372_v16 }
  0x97   : > { %v486_v55 = vsel %vm484_vm4, %v481_v45, %v377_v44  ;;  %v5664_v45 = vmov 0  }
  0x98   : > { %3960 = vset.pattern.permute.xlu1 %v5664_v45  ;;  %3959 = vset.pattern.permute.xlu0 %v5664_v45  ;;  %308 = vst.msk [vmem:[#allocation2 + $0xc] sm:$0xf] %vm307_vm2, %v5664_v45  ;;  %309 = vst.msk [vmem:[#allocation2 + $0x1c] sm:$0xf] %vm307_vm2, %v5664_v45 }
  0x99   : > { %v4249_v17 = vpop.permute.xlu0 %373  ;;  %v368_v18 = vpop.permute.xlu1 %367  ;;  %310 = vst.msk [vmem:[#allocation2 + $0x2c] sm:$0xf] %vm307_vm2, %v5664_v45  ;;  %311 = vst.msk [vmem:[#allocation2 + $0x3c] sm:$0xf] %vm307_vm2, %v5664_v45 }
  0x9a   : > { %v378_v48 = vsel %vm375_vm3, %v372_v16, %v4249_v17  ;;  %v376_v49 = vsel %vm375_vm3, %v368_v18, %v370_v15 }
  0x9b   : > { %v487_v63 = vsel %vm484_vm4, %v482_v46, %v378_v48  ;;  %v485_v0 = vsel %vm484_vm4, %v480_v59, %v376_v49 }
  0x9d   : > { %v4251_v19 = vpop.permute.xlu0 %385  ;;  %v388_v20 = vpop.permute.xlu1 %387 }
  0x9e   : > { %v393_v47 = vsel %vm391_vm5, %v4251_v19, %v388_v20 }
  0x9f   : > { %v491_v60 = vsel %vm489_vm6, %v486_v55, %v393_v47 }
  0xa1   : > { %v4253_v21 = vpop.permute.xlu0 %389  ;;  %v4255_v22 = vpop.permute.xlu1 %383 }
  0xa2   : > { %v394_v56 = vsel %vm391_vm5, %v388_v20, %v4253_v21  ;;  %v392_v2 = vsel %vm391_vm5, %v4255_v22, %v4251_v19 }
  0xa3   : > { %v492_v8 = vsel %vm489_vm6, %v487_v63, %v394_v56  ;;  %v490_v20 = vsel %vm489_vm6, %v485_v0, %v392_v2  ;;  %v521_v63 = vld [vmem:[%s5653_s2 + $0x18] sm:$0xff] }
  0xa5   : > { %v4257_v23 = vpop.permute.xlu0 %401  ;;  %v4259_v24 = vpop.permute.xlu1 %403 }
  0xa6   : > { %v409_v50 = vsel %vm407_vm7, %v4257_v23, %v4259_v24 }
  0xa7   : > { %v496_v6 = vsel %vm494_vm8, %v491_v60, %v409_v50 }
  0xa9   : > { %v4261_v25 = vpop.permute.xlu0 %405  ;;  %v4263_v26 = vpop.permute.xlu1 %399 }
  0xaa   : > { %v410_v9 = vsel %vm407_vm7, %v4259_v24, %v4261_v25  ;;  %v408_v10 = vsel %vm407_vm7, %v4263_v26, %v4257_v23  ;;  %v483_v26 = vsel %vm479_vm1, %v4201_v7, %v4247_v11 }
  0xad   : > { %v4265_v27 = vpop.permute.xlu0 %417  ;;  %v4267_v28 = vpop.permute.xlu1 %419 }
  0xae   : > { %v425_v57 = vsel %vm423_vm9, %v4265_v27, %v4267_v28 }
  0xaf   : > { %v501_v12 = vsel %vm499_vm10, %v496_v6, %v425_v57 }
  0xb1   : > { %v4269_v29 = vpop.permute.xlu0 %421  ;;  %v466_v30 = vpop.permute.xlu1 %465 }
  0xb2   : > { %v426_v15 = vsel %vm423_vm9, %v4267_v28, %v4269_v29  ;;  %v497_v28 = vsel %vm494_vm8, %v492_v8, %v410_v9 }
  0xb5   : > { %v468_v31 = vpop.permute.xlu0 %467  ;;  %v4271_v32 = vpop.permute.xlu1 %469 }
  0xb6   : > { %v473_v33 = vsel %vm471_vm0, %v466_v30, %v468_v31  ;;  %v474_v34 = vsel %vm471_vm0, %v468_v31, %v4271_v32  ;;  %v502_v31 = vsel %vm499_vm10, %v497_v28, %v426_v15 }
  0xb7   : > { %v515_v35 = vsel %vm479_vm1, %v473_v33, 0.0  ;;  %v516_v36 = vsel %vm479_vm1, %v474_v34, 0.0 }
  0xb8   : > { %564 = vrot.lane.b32.xlu0 %v515_v35, %s4083_s17  ;;  %566 = vrot.lane.b32.xlu1 %v516_v36, %s4083_s17 }
  0xb9   : > { %v416_v37 = vpop.permute.xlu0 %415  ;;  %v434_v38 = vpop.permute.xlu1 %433 }
  0xba   : > { %v424_v16 = vsel %vm423_vm9, %v416_v37, %v4265_v27  ;;  %v495_v27 = vsel %vm494_vm8, %v490_v20, %v408_v10  ;;  %v312_v10 = vld [vmem:[%s5652_s1] sm:$0x7] }
  0xbb   : > { %v500_v33 = vsel %vm499_vm10, %v495_v27, %v424_v16  ;;  %v4436_v28 = vrot.slane %v312_v10, %v320_v3 }
  0xbd   : > { %v436_v41 = vpop.permute.xlu0 %435  ;;  %v4281_v42 = vpop.permute.xlu1 %437 }
  0xbe   : > { %v441_v61 = vsel %vm439_vm11, %v434_v38, %v436_v41  ;;  %v442_v22 = vsel %vm439_vm11, %v436_v41, %v4281_v42 }
  0xbf   : > { %v506_v19 = vsel %vm504_vm12, %v501_v12, %v441_v61  ;;  %v507_v7 = vsel %vm504_vm12, %v502_v31, %v442_v22  ;;  %v519_v61 = vld [vmem:[%s5653_s2 + $0x8] sm:$0xff] }
  0xc1   : > { %v464_v51 = vpop.permute.xlu0 %463  ;;  %v432_v52 = vpop.permute.xlu1 %431 }
  0xc2   : > { %v472_v58 = vsel %vm471_vm0, %v464_v51, %v466_v30  ;;  %v440_v23 = vsel %vm439_vm11, %v432_v52, %v434_v38  ;;  %v488_v30 = vsel %vm484_vm4, %v483_v26, %v4249_v17  ;;  %vm570_vm0 = vcmask 678912  }
  0xc3   : > { %v514_v62 = vsel %vm479_vm1, %v472_v58, 0.0  ;;  %v505_v11 = vsel %vm504_vm12, %v500_v33, %v440_v23  ;;  %v493_v38 = vsel %vm489_vm6, %v488_v30, %v4253_v21  ;;  %v517_v21 = vsel %vm479_vm1, %v4271_v32, 0.0  ;;  %v523_v32 = vld [vmem:[%s5654_s3 + $0x8] sm:$0xff] }
  0xc4   : > { %562 = vrot.lane.b32.xlu0 %v514_v62, %s4083_s17  ;;  %v498_v40 = vsel %vm494_vm8, %v493_v38, %v4261_v25  ;;  %v524_v25 = vld [vmem:[%s5654_s3 + $0x10] sm:$0xff]  ;;  %vm302_vm1 = vcmask 519168  }
  0xc5   : > { %v450_v13 = vpop.permute.xlu0 %449  ;;  %v452_v14 = vpop.permute.xlu1 %451  ;;  %v503_v41 = vsel %vm499_vm10, %v498_v40, %v4269_v29  ;;  %v525_v29 = vld [vmem:[%s5654_s3 + $0x18] sm:$0xff]  ;;  %303 = vst.msk [vmem:[#allocation2] sm:$0xf] %vm302_vm1, %v5664_v45  ;;  %304 = vst.msk [vmem:[#allocation2 + $0x10] sm:$0xf] %vm302_vm1, %v5664_v45 }
  0xc6   : > { %v457_v18 = vsel %vm455_vm13, %v450_v13, %v452_v14  ;;  %v508_v43 = vsel %vm504_vm12, %v503_v41, %v4281_v42  ;;  %v522_v42 = vld [vmem:[%s5654_s3] sm:$0xff]  ;;  %305 = vst.msk [vmem:[#allocation2 + $0x20] sm:$0xf] %vm302_vm1, %v5664_v45  ;;  %306 = vst.msk [vmem:[#allocation2 + $0x30] sm:$0xf] %vm302_vm1, %v5664_v45  ;;  %v4442_v41 = vrot.slane %v312_v10, %v324_v4  ;;  %vm896_vm1 = vcmask 1047556  }
  0xc7   : > { %v511_v24 = vsel %vm509_vm14, %v506_v19, %v457_v18  ;;  %v4432_v19 = vrot.slane %v312_v10, %v316_v5 }
  0xc8   : > { %556 = vrot.lane.b32.xlu1 %v511_v24, %s4083_s17 }
  0xc9   : > { %v454_v34 = vpop.permute.xlu0 %453  ;;  %v448_v35 = vpop.permute.xlu1 %447 }
  0xca   : > { %v458_v36 = vsel %vm455_vm13, %v452_v14, %v454_v34  ;;  %v456_v37 = vsel %vm455_vm13, %v448_v35, %v450_v13  ;;  %v513_v44 = vsel %vm509_vm14, %v508_v43, %v454_v34 }
  0xcb   : > { %v512_v39 = vsel %vm509_vm14, %v507_v7, %v458_v36  ;;  %v510_v17 = vsel %vm509_vm14, %v505_v11, %v456_v37 }
  0xcc   : > { %558 = vrot.lane.b32.xlu0 %v512_v39, %s4083_s17  ;;  %554 = vrot.lane.b32.xlu1 %v510_v17, %s4083_s17 }
  0xd0   : > { %568 = vrot.lane.b32.xlu0 %v517_v21, %s4083_s17  ;;  %560 = vrot.lane.b32.xlu1 %v513_v44, %s4083_s17 }
  0xd4   : > { %538 = vperm.xlu0 %3959, %v524_v25   ;;  %543 = vperm.xlu1 %3960, %v525_v29  }
  0xd8   : > { %533 = vperm.xlu0 %3959, %v523_v32   ;;  %528 = vperm.xlu1 %3960, %v522_v42  }
 0x12a   : > { %v565_v46 = vpop.permute.xlu0 %564  ;;  %v567_v47 = vpop.permute.xlu1 %566 }
 0x12b   : > { %v575_v48 = vsel %vm570_vm0, %v565_v46, %v567_v47 }
 0x12c   : > { %624 = vmatprep.subr.mxu0 %v575_v48 }
 0x136   : > { %v563_v49 = vpop.permute.xlu0 %562 }
 0x137   : > { %v574_v50 = vsel %vm570_vm0, %v563_v49, %v565_v46 }
 0x138   : > { %625 = vmatpush1.msra.mxu0 %v574_v50 }
 0x13a   : > { %v557_v51 = vpop.permute.xlu1 %556 }
 0x13e   : > { %v559_v52 = vpop.permute.xlu0 %558  ;;  %v555_v55 = vpop.permute.xlu1 %554 }
 0x13f   : > { %v572_v56 = vsel %vm570_vm0, %v557_v51, %v559_v52  ;;  %v571_v57 = vsel %vm570_vm0, %v555_v55, %v557_v51 }
 0x140   : > { %626 = vmatprep.subr.mxu0 %v572_v56 }
 0x141   : > { %627 = vmatpush1.msra.mxu0 %v571_v57 }
 0x142   : > { %v569_v58 = vpop.permute.xlu0 %568  ;;  %3630 = vmatmul.mubr.msk.f32.vlgmr.msra.gmra.mxu0 %vm583_vm15, %v4300_v54  ;;  %v561_v59 = vpop.permute.xlu1 %560  ;;  %v520_v54 = vld [vmem:[%s5653_s2 + $0x10] sm:$0xff] }
 0x143   : > { %v576_v60 = vsel %vm570_vm0, %v567_v47, %v569_v58  ;;  %666 = vmatprep.mubr.f32.mxu0 %v4084_v53  ;;  %v573_v62 = vsel %vm570_vm0, %v559_v52, %v561_v59 }
 0x144   : > { %3871 = vmatprep.subr.mxu1 %v576_v60 }
 0x145   : > { %3872 = vmatpush3.msra.mxu1 %v576_v60 }
 0x146   : > { %3631 = vmatmul.mubr.msk.f32.gmra.mxu0 %vm583_vm15, %v519_v61  ;;  %3873 = vmatprep.subr.mxu1 %v573_v62 }
 0x147   : > { %3874 = vmatpush3.msra.mxu1 %v573_v62  ;;  %672 = vmatprep.mubr.f32.mxu0 %v4084_v53 }
 0x148   : > { %3876 = vmatmul.mubr.msk.f32.vlgmr.msra.gmra.mxu1 %vm583_vm15, %v519_v61 }
 0x149   : > { %3878 = vmatprep.mubr.msk.f32.mxu1 %vm583_vm15, %v520_v54 }
 0x14a   : > { %3632 = vmatmul.mubr.msk.f32.gmra.mxu0 %vm583_vm15, %v520_v54 }
 0x14b   : > { %678 = vmatprep.mubr.f32.mxu0 %v4084_v53 }
 0x14c   : > { %3879 = vmatmul.mubr.msk.f32.gmra.mxu1 %vm583_vm15, %v521_v63 }
 0x14d   : > { %2042 = vmatprep.mubr.bf16.mxu1 %v5664_v45 }
 0x14e   : > { %3633 = vmatmul.mubr.msk.f32.gmra.mxu0 %vm583_vm15, %v521_v63 }
 0x14f   : > { %v544_v53 = vpop.permute.xlu1 %543  ;;  %v539_v0 = vpop.permute.xlu0 %538 }
 0x153   : > { %v529_v2 = vpop.permute.xlu1 %528  ;;  %v534_v14 = vpop.permute.xlu0 %533 }
 0x202   : > { %v662_v6 = vpop.f32.mrf.mxu0 }
 0x203   : > { %v663_v8 = vadd.f32 %v662_v6, %v529_v2 }
 0x204   : > { %v664_v9 = vpop.f32.mrf.mxu0 }
 0x205   : > { %v665_v12 = vadd.f32 %v664_v9, %v529_v2  ;;  %v782_v13 = vmul.f32 0.01, %v663_v8  ;;  %vm770_vm3 = vcmp.gt.f32.partialorder %v663_v8, 0.0 }
 0x206   : > { %v668_v15 = vpop.f32.mrf.mxu0 }
 0x207   : > { %v783_v16 = vmul.f32 0.01, %v665_v12  ;;  %v669_v18 = vadd.f32 %v668_v15, %v534_v14  ;;  %vm771_vm4 = vcmp.gt.f32.partialorder %v665_v12, 0.0  ;;  %v794_v23 = vsel %vm770_vm3, %v663_v8, %v782_v13 }
 0x208   : > { %v670_v20 = vpop.f32.mrf.mxu0  ;;  %v3877_v22 = vpop.f32.mrf.mxu1  ;;  %v806_v34 = vmul.f32 %v794_v23, %v4432_v19  ;;  %vm874_vm3 = vcmask 523264  }
 0x209   : > { %v671_v24 = vadd.f32 %v670_v20, %v534_v14  ;;  %v757_v26 = vadd.f32 %v3877_v22, %v534_v14  ;;  %v795_v31 = vsel %vm771_vm4, %v665_v12, %v783_v16  ;;  %vm773_vm5 = vcmp.gt.f32.partialorder %v669_v18, 0.0  ;;  %vm4466_vm4 = vmor %vm896_vm1, %vm307_vm2 }
 0x20a   : > { %v674_v27 = vpop.f32.mrf.mxu0  ;;  %v751_v30 = vpop.f32.mrf.mxu1  ;;  %v785_v33 = vmul.f32 0.01, %v669_v18  ;;  %v807_v3 = vmul.f32 %v795_v31, %v4436_v28  ;;  %vm1156_vm2 = vcmask 531456  }
 0x20b   : > { %vm774_vm6 = vcmp.gt.f32.partialorder %v671_v24, 0.0  ;;  %v786_v5 = vmul.f32 0.01, %v671_v24  ;;  %v787_v35 = vmul.f32 0.01, %v757_v26  ;;  %v675_v36 = vadd.f32 %v674_v27, %v539_v0 }
 0x20c   : > { %v752_v37 = vadd.f32 %v751_v30, %v529_v2  ;;  %v676_v7 = vpop.f32.mrf.mxu0  ;;  %v3880_v11 = vpop.f32.mrf.mxu1  ;;  %vm775_vm7 = vcmp.gt.f32.partialorder %v757_v26, 0.0  ;;  %v797_v25 = vsel %vm773_vm5, %v669_v18, %v785_v33  ;;  %v3785_v48 = vpack.c.bf16 %v807_v3, %v806_v34 }
 0x20d   : > { %v677_v38 = vadd.f32 %v676_v7, %v539_v0  ;;  %v767_v39 = vadd.f32 %v3880_v11, %v544_v53  ;;  %vm776_vm9 = vcmp.gt.f32.partialorder %v675_v36, 0.0  ;;  %v788_v17 = vmul.f32 0.01, %v675_v36 }
 0x20e   : > { %v680_v40 = vpop.f32.mrf.mxu0  ;;  %vm772_vm10 = vcmp.gt.f32.partialorder %v752_v37, 0.0  ;;  %v784_v43 = vmul.f32 0.01, %v752_v37  ;;  %v761_v44 = vpop.f32.mrf.mxu1  ;;  %v798_v29 = vsel %vm774_vm6, %v671_v24, %v786_v5  ;;  %v799_v32 = vsel %vm775_vm7, %v757_v26, %v787_v35  ;;  %850 = vrot.lane.b32.xlu1 %v3785_v48, %s4086_s24 }
 0x20f   : > { %vm777_vm11 = vcmp.gt.f32.partialorder %v677_v38, 0.0  ;;  %v789_v21 = vmul.f32 0.01, %v677_v38  ;;  %v681_v42 = vadd.f32 %v680_v40, %v544_v53  ;;  %v800_v47 = vsel %vm776_vm9, %v675_v36, %v788_v17 }
 0x210   : > { %v682_v46 = vpop.f32.mrf.mxu0  ;;  %vm781_vm12 = vcmp.gt.f32.partialorder %v767_v39, 0.0  ;;  %v796_v50 = vsel %vm772_vm10, %v752_v37, %v784_v43  ;;  %v793_v4 = vmul.f32 0.01, %v767_v39  ;;  %v762_v51 = vadd.f32 %v761_v44, %v539_v0 }
 0x211   : > { %v683_v49 = vadd.f32 %v682_v46, %v544_v53  ;;  %v801_v1 = vsel %vm777_vm11, %v677_v38, %v789_v21  ;;  %v791_v52 = vmul.f32 0.01, %v681_v42  ;;  %v811_v56 = vmul.f32 %v799_v32, %v4442_v41 }
 0x212   : > { %vm779_vm14 = vcmp.gt.f32.partialorder %v681_v42, 0.0  ;;  %v809_v57 = vmul.f32 %v797_v25, %v4432_v19  ;;  %v810_v58 = vmul.f32 %v798_v29, %v4436_v28  ;;  %v808_v61 = vmul.f32 %v796_v50, %v4442_v41 }
 0x213   : > { %vm780_vm13 = vcmp.gt.f32.partialorder %v683_v49, 0.0  ;;  %v792_v55 = vmul.f32 0.01, %v683_v49  ;;  %v3788_v60 = vpack.c.bf16 %v811_v56, %v811_v56  ;;  %v813_v62 = vmul.f32 %v801_v1, %v4436_v28 }
 0x214   : > { %v805_v54 = vsel %vm781_vm12, %v767_v39, %v793_v4  ;;  %v790_v63 = vmul.f32 0.01, %v762_v51  ;;  %v3787_v53 = vpack.c.bf16 %v810_v58, %v809_v57  ;;  %v812_v0 = vmul.f32 %v800_v47, %v4432_v19 }
 0x215   : > { %v804_v59 = vsel %vm780_vm13, %v683_v49, %v792_v55  ;;  %v803_v2 = vsel %vm779_vm14, %v681_v42, %v791_v52  ;;  %vm778_vm15 = vcmp.gt.f32.partialorder %v762_v51, 0.0  ;;  %856 = vrot.lane.b32.xlu0 %v3788_v60, %s4086_s24  ;;  %v3786_v9 = vpack.c.bf16 %v808_v61, %v808_v61 }
 0x216   : > { %854 = vrot.lane.b32.xlu1 %v3787_v53, %s4086_s24  ;;  %v3789_v6 = vpack.c.bf16 %v813_v62, %v812_v0  ;;  %v816_v8 = vmul.f32 %v804_v59, %v4436_v28  ;;  %v817_v10 = vmul.f32 %v805_v54, %v4442_v41  ;;  %v802_v12 = vsel %vm778_vm15, %v762_v51, %v790_v63 }
 0x217   : > { %v815_v13 = vmul.f32 %v803_v2, %v4432_v19  ;;  %v814_v16 = vmul.f32 %v802_v12, %v4442_v41  ;;  %vm899_vm5 = vcmask 523268   ;;  %vm1087_vm7 = vcmask 662528  }
 0x218   : > { %v3792_v15 = vpack.c.bf16 %v817_v10, %v817_v10  ;;  %vm4474_vm6 = vmor %vm899_vm5, %vm494_vm8  ;;  %vm1018_vm9 = vcmask 670720   ;;  %vm1500_vm10 = vcmask 367616   ;;  %vm1431_vm11 = vcmask 375808  }
 0x219   : > { %852 = vrot.lane.b32.xlu0 %v3786_v9, %s4086_s24  ;;  %v3791_v14 = vpack.c.bf16 %v816_v8, %v815_v13  ;;  %v3790_v18 = vpack.c.bf16 %v814_v16, %v814_v16  ;;  %vm1362_vm12 = vcmask 384000   ;;  %vm1293_vm13 = vcmask 515072  }
 0x21a   : > { %858 = vrot.lane.b32.xlu1 %v3789_v6, %s4086_s24  ;;  %vm5667_vm14 = vcmask 261120  }
 0x21d   : > { %864 = vrot.lane.b32.xlu0 %v3792_v15, %s4086_s24 }
 0x21e   : > { %862 = vrot.lane.b32.xlu1 %v3791_v14, %s4086_s24 }
 0x221   : > { %860 = vrot.lane.b32.xlu0 %v3790_v18, %s4086_s24 }
 0x280   : > { %v851_v20 = vpop.permute.xlu1 %850 }
 0x281   : > { %v866_v23 = vrot.slane %v851_v20, 4 }
 0x283   : > { %v875_v24 = vsel %vm874_vm3, %v866_v23, %v851_v20 }
 0x284   : > { %898 = vst.msk [vmem:[#allocation2] sm:$0xff] %vm4466_vm4, %v875_v24 }
 0x287   : > { %v857_v26 = vpop.permute.xlu0 %856 }
 0x288   : > { %v869_v27 = vrot.slane %v857_v26, 4  ;;  %v855_v30 = vpop.permute.xlu1 %854 }
 0x289   : > { %v868_v31 = vrot.slane %v855_v30, 4 }
 0x28b   : > { %v879_v34 = vsel %vm874_vm3, %v868_v31, %v855_v30  ;;  %v880_v5 = vsel %vm494_vm8, %v868_v31, %v869_v27  ;;  %v853_v35 = vpop.permute.xlu0 %852  ;;  %v4486_v39 = vld [vmem:[#allocation2] sm:$0xff] }
 0x28c   : > { %v881_v36 = vsel %vm874_vm3, %v880_v5, %v857_v26  ;;  %902 = vst.msk [vmem:[#allocation2 + $0x10] sm:$0xff] %vm4466_vm4, %v879_v34  ;;  %v867_v37 = vrot.slane %v853_v35, 4  ;;  %v859_v7 = vpop.permute.xlu1 %858  ;;  %1131 = vrot.lane.b32.xlu1 %v4486_v39, %s4087_s25  ;;  %v4672_v30 = vld [vmem:[%s5655_s4 + $0x4] ss:$12 sps:$4 sm:$0xff]  }
 0x28d   : > { %903 = vst.msk [vmem:[#allocation2 + $0x18] sm:$0xff] %vm4474_vm6, %v881_v36  ;;  %v870_v11 = vrot.slane %v859_v7, 4  ;;  %v1608_v31 = vld [vmem:[%s5656_s5] sm:$0xff]  ;;  %1989 = vmatprep.mubr.bf16.mxu0 %v4672_v30 }
 0x28e   : > { %v877_v38 = vsel %vm494_vm8, %v866_v23, %v867_v37  ;;  %v1610_v23 = vld [vmem:[%s5656_s5 + $0x10] sm:$0xff] }
 0x28f   : > { %v878_v3 = vsel %vm874_vm3, %v877_v38, %v853_v35  ;;  %v882_v17 = vsel %vm874_vm3, %v870_v11, %v859_v7  ;;  %v865_v40 = vpop.permute.xlu0 %864  ;;  %v1611_v7 = vld [vmem:[%s5656_s5 + $0x18] sm:$0xff] }
 0x290   : > { %901 = vst.msk [vmem:[#allocation2 + $0x8] sm:$0xff] %vm4474_vm6, %v878_v3  ;;  %v873_v43 = vrot.slane %v865_v40, 4  ;;  %v863_v21 = vpop.permute.xlu1 %862  ;;  %1062 = vrot.lane.b32.xlu1 %v4486_v39, %s4088_s26 }
 0x291   : > { %904 = vst.msk [vmem:[#allocation2 + $0x20] sm:$0xff] %vm4466_vm4, %v882_v17  ;;  %v872_v44 = vrot.slane %v863_v21, 4 }
 0x293   : > { %v885_v25 = vsel %vm874_vm3, %v872_v44, %v863_v21  ;;  %v886_v29 = vsel %vm494_vm8, %v872_v44, %v873_v43  ;;  %v861_v32 = vpop.permute.xlu0 %860  ;;  %v4531_v50 = vld [vmem:[#allocation2 + $0x10] sm:$0xff] }
 0x294   : > { %v887_v42 = vsel %vm874_vm3, %v886_v29, %v865_v40  ;;  %906 = vst.msk [vmem:[#allocation2 + $0x30] sm:$0xff] %vm4466_vm4, %v885_v25  ;;  %v871_v46 = vrot.slane %v861_v32, 4  ;;  %993 = vrot.lane.b32.xlu1 %v4486_v39, %s4089_s10  ;;  %v4539_v1 = vld [vmem:[#allocation2 + $0x18] sm:$0xff]  ;;  %v1609_v40 = vld [vmem:[%s5656_s5 + $0x8] sm:$0xff] }
 0x295   : > { %907 = vst.msk [vmem:[#allocation2 + $0x38] sm:$0xff] %vm4474_vm6, %v887_v42 }
 0x296   : > { %v883_v47 = vsel %vm494_vm8, %v870_v11, %v871_v46 }
 0x297   : > { %v884_v48 = vsel %vm874_vm3, %v883_v47, %v861_v32  ;;  %v4509_v49 = vld [vmem:[#allocation2 + $0x8] sm:$0xff] }
 0x298   : > { %905 = vst.msk [vmem:[#allocation2 + $0x28] sm:$0xff] %vm4474_vm6, %v884_v48  ;;  %1133 = vrot.lane.b32.xlu0 %v4509_v49, %s4087_s25  ;;  %1475 = vrot.lane.b32.xlu1 %v4486_v39, %s4090_s12  ;;  %v4555_v4 = vld [vmem:[#allocation2 + $0x20] sm:$0xff] }
 0x29b   : > { %v1121_v52 = vld [vmem:[#allocation2 + $0x30] sm:$0xff] }
 0x29c   : > { %1064 = vrot.lane.b32.xlu0 %v4509_v49, %s4088_s26  ;;  %924 = vrot.lane.b32.xlu1 %v4486_v39, %s4083_s17  ;;  %v1122_v55 = vld [vmem:[#allocation2 + $0x38] sm:$0xff] }
 0x29f   : > { %v1120_v51 = vld [vmem:[#allocation2 + $0x28] sm:$0xff] }
 0x2a0   : > { %995 = vrot.lane.b32.xlu0 %v4509_v49, %s4089_s10  ;;  %1406 = vrot.lane.b32.xlu1 %v4486_v39, %s4091_s13 }
 0x2a4   : > { %1477 = vrot.lane.b32.xlu0 %v4509_v49, %s4090_s12  ;;  %1408 = vrot.lane.b32.xlu1 %v4509_v49, %s4091_s13 }
 0x2a8   : > { %926 = vrot.lane.b32.xlu0 %v4509_v49, %s4083_s17  ;;  %1135 = vrot.lane.b32.xlu1 %v4531_v50, %s4087_s25 }
 0x2ac   : > { %1410 = vrot.lane.b32.xlu0 %v4531_v50, %s4091_s13  ;;  %1066 = vrot.lane.b32.xlu1 %v4531_v50, %s4088_s26 }
 0x2b0   : > { %1137 = vrot.lane.b32.xlu0 %v4539_v1, %s4087_s25  ;;  %997 = vrot.lane.b32.xlu1 %v4531_v50, %s4089_s10 }
 0x2b4   : > { %1068 = vrot.lane.b32.xlu0 %v4539_v1, %s4088_s26  ;;  %1479 = vrot.lane.b32.xlu1 %v4531_v50, %s4090_s12 }
 0x2b8   : > { %999 = vrot.lane.b32.xlu0 %v4539_v1, %s4089_s10  ;;  %928 = vrot.lane.b32.xlu1 %v4531_v50, %s4083_s17 }
 0x2bc   : > { %1481 = vrot.lane.b32.xlu0 %v4539_v1, %s4090_s12  ;;  %1139 = vrot.lane.b32.xlu1 %v4555_v4, %s4087_s25 }
 0x2c0   : > { %930 = vrot.lane.b32.xlu0 %v4539_v1, %s4083_s17  ;;  %1070 = vrot.lane.b32.xlu1 %v4555_v4, %s4088_s26 }
 0x2c4   : > { %1412 = vrot.lane.b32.xlu0 %v4539_v1, %s4091_s13  ;;  %1001 = vrot.lane.b32.xlu1 %v4555_v4, %s4089_s10 }
 0x2c8   : > { %1141 = vrot.lane.b32.xlu0 %v1120_v51, %s4087_s25  ;;  %1483 = vrot.lane.b32.xlu1 %v4555_v4, %s4090_s12 }
 0x2cc   : > { %1072 = vrot.lane.b32.xlu0 %v1120_v51, %s4088_s26  ;;  %932 = vrot.lane.b32.xlu1 %v4555_v4, %s4083_s17 }
 0x2d0   : > { %1003 = vrot.lane.b32.xlu0 %v1120_v51, %s4089_s10  ;;  %1414 = vrot.lane.b32.xlu1 %v4555_v4, %s4091_s13 }
 0x2d4   : > { %1485 = vrot.lane.b32.xlu0 %v1120_v51, %s4090_s12  ;;  %1416 = vrot.lane.b32.xlu1 %v1120_v51, %s4091_s13 }
 0x2d8   : > { %934 = vrot.lane.b32.xlu0 %v1120_v51, %s4083_s17  ;;  %1347 = vrot.lane.b32.xlu1 %v1120_v51, %s4092_s18 }
 0x2dc   : > { %1343 = vrot.lane.b32.xlu0 %v4539_v1, %s4092_s18  ;;  %1143 = vrot.lane.b32.xlu1 %v1121_v52, %s4087_s25 }
 0x2e0   : > { %1418 = vrot.lane.b32.xlu0 %v1121_v52, %s4091_s13  ;;  %1345 = vrot.lane.b32.xlu1 %v4555_v4, %s4092_s18 }
 0x2e4   : > { %1349 = vrot.lane.b32.xlu0 %v1121_v52, %s4092_s18  ;;  %1074 = vrot.lane.b32.xlu1 %v1121_v52, %s4088_s26 }
 0x2e8   : > { %1145 = vrot.lane.b32.xlu0 %v1122_v55, %s4087_s25  ;;  %1339 = vrot.lane.b32.xlu1 %v4509_v49, %s4092_s18 }
 0x2ec   : > { %1341 = vrot.lane.b32.xlu0 %v4531_v50, %s4092_s18  ;;  %1005 = vrot.lane.b32.xlu1 %v1121_v52, %s4089_s10 }
 0x2f0   : > { %1076 = vrot.lane.b32.xlu0 %v1122_v55, %s4088_s26  ;;  %1487 = vrot.lane.b32.xlu1 %v1121_v52, %s4090_s12 }
 0x2f4   : > { %1280 = vrot.lane.b32.xlu0 %v1121_v52, %s5660_s19  ;;  %936 = vrot.lane.b32.xlu1 %v1121_v52, %s4083_s17 }
 0x2f8   : > { %1007 = vrot.lane.b32.xlu0 %v1122_v55, %s4089_s10  ;;  %1337 = vrot.lane.b32.xlu1 %v4486_v39, %s4092_s18 }
 0x2fc   : > { %1489 = vrot.lane.b32.xlu0 %v1122_v55, %s4090_s12  ;;  %1278 = vrot.lane.b32.xlu1 %v1120_v51, %s5660_s19 }
 0x2fe   : > { %v4604_v56 = vpop.permute.xlu1 %1131 }
 0x300   : > { %938 = vrot.lane.b32.xlu0 %v1122_v55, %s4083_s17  ;;  %1276 = vrot.lane.b32.xlu1 %v4555_v4, %s5660_s19 }
 0x302   : > { %v4609_v57 = vpop.permute.xlu1 %1062 }
 0x304   : > { %1420 = vrot.lane.b32.xlu0 %v1122_v55, %s4091_s13  ;;  %1270 = vrot.lane.b32.xlu1 %v4509_v49, %s5660_s19 }
 0x306   : > { %v4615_v58 = vpop.permute.xlu1 %993 }
 0x308   : > { %1274 = vrot.lane.b32.xlu0 %v4539_v1, %s5660_s19  ;;  %1268 = vrot.lane.b32.xlu1 %v4486_v39, %s5660_s19 }
 0x30a   : > { %v4617_v59 = vpop.permute.xlu0 %1133  ;;  %v4627_v62 = vpop.permute.xlu1 %1475 }
 0x30b   : > { %v1148_v60 = vrot.slane %v4617_v59, 4  ;;  %v1491_v29 = vrot.slane %v4627_v62, 4 }
 0x30c   : > { %1351 = vrot.lane.b32.xlu0 %v1122_v55, %s4092_s18  ;;  %1210 = vrot.lane.b32.xlu1 %v1120_v51, %s4086_s24 }
 0x30d   : > { %v1158_v61 = vsel %vm1156_vm2, %v4617_v59, %v1148_v60 }
 0x30e   : > { %1177 = vst [vmem:[#allocation3 + $0x98] sm:$0xf] %v1158_v61  ;;  %v4629_v54 = vpop.permute.xlu0 %1064  ;;  %v4639_v0 = vpop.permute.xlu1 %924 }
 0x30f   : > { %v1079_v63 = vrot.slane %v4629_v54, 4 }
 0x310   : > { %1272 = vrot.lane.b32.xlu0 %v4531_v50, %s5660_s19  ;;  %1208 = vrot.lane.b32.xlu1 %v4555_v4, %s4086_s24 }
 0x311   : > { %v1089_v53 = vsel %vm1087_vm7, %v4629_v54, %v1079_v63 }
 0x312   : > { %1108 = vst [vmem:[#allocation3 + $0x68] sm:$0xf] %v1089_v53  ;;  %v996_v2 = vpop.permute.xlu0 %995  ;;  %v4645_v9 = vpop.permute.xlu1 %1406 }
 0x313   : > { %v1010_v6 = vrot.slane %v996_v2, 4 }
 0x314   : > { %1282 = vrot.lane.b32.xlu0 %v1122_v55, %s5660_s19  ;;  %1202 = vrot.lane.b32.xlu1 %v4509_v49, %s4086_s24  ;;  %s294_s19 = sand.u32 1, %s4065_s28  }
 0x315   : > { %v1020_v8 = vsel %vm1018_vm9, %v996_v2, %v1010_v6  ;;  %s5611_s9 = scalar_lea.sflag [#allocation5], %s294_s19 }
 0x316   : > { %1039 = vst [vmem:[#allocation3 + $0x38] sm:$0xf] %v1020_v8  ;;  %v1478_v10 = vpop.permute.xlu0 %1477  ;;  %v4651_v14 = vpop.permute.xlu1 %1408 }
 0x317   : > { %v1492_v12 = vrot.slane %v1478_v10, 4  ;;  %v1423_v15 = vrot.slane %v4651_v14, 4 }
 0x318   : > { %1212 = vrot.lane.b32.xlu0 %v1121_v52, %s4086_s24  ;;  %1200 = vrot.lane.b32.xlu1 %v4486_v39, %s4086_s24  ;;  %v1009_v39 = vrot.slane %v4615_v58, 4 }
 0x319   : > { %v1502_v13 = vsel %vm1500_vm10, %v1478_v10, %v1492_v12  ;;  %v1433_v20 = vsel %vm1431_vm11, %v4651_v14, %v1423_v15  ;;  %v1499_v48 = vsel %vm494_vm8, %v1491_v29, %v1492_v12 }
 0x31a   : > { %1521 = vst [vmem:[#allocation3 + $0x188] sm:$0xf] %v1502_v13  ;;  %v927_v16 = vpop.permute.xlu0 %926  ;;  %1452 = vst [vmem:[#allocation3 + $0x158] sm:$0xf] %v1433_v20  ;;  %v4665_v26 = vpop.permute.xlu1 %1135  ;;  %v1017_v21 = vsel %vm494_vm8, %v1009_v39, %v1010_v6  ;;  %v4728_v2 = vsel %vm1500_vm10, %v4627_v62, %v1499_v48 }
 0x31b   : > { %v941_v18 = vrot.slane %v927_v16, 4  ;;  %v4711_v47 = vsel %vm1018_vm9, %v4615_v58, %v1017_v21 }
 0x31c   : > { %1214 = vrot.lane.b32.xlu0 %v1122_v55, %s4086_s24  ;;  %1624 = vperm.xlu1 %3960, %v1610_v23   ;;  %v940_v55 = vrot.slane %v4639_v0, 4  ;;  %v1422_v23 = vrot.slane %v4645_v9, 4 }
 0x31d   : > { %v951_v24 = vsel %vm570_vm0, %v927_v16, %v941_v18 }
 0x31e   : > { %970 = vst [vmem:[#allocation3 + $0x8] sm:$0xf] %v951_v24  ;;  %v4667_v27 = vpop.permute.xlu0 %1410  ;;  %v4679_v34 = vpop.permute.xlu1 %1066  ;;  %v948_v6 = vsel %vm494_vm8, %v940_v55, %v941_v18 }
 0x31f   : > { %v1424_v39 = vrot.slane %v4667_v27, 4 }
 0x320   : > { %1206 = vrot.lane.b32.xlu0 %v4539_v1, %s4086_s24  ;;  %1614 = vperm.xlu1 %3960, %v1608_v31   ;;  %v1430_v31 = vsel %vm494_vm8, %v1422_v23, %v1423_v15 }
 0x322   : > { %v4682_v5 = vpop.permute.xlu0 %1137  ;;  %v998_v37 = vpop.permute.xlu1 %997 }
 0x323   : > { %v1150_v35 = vrot.slane %v4682_v5, 4  ;;  %v1011_v44 = vrot.slane %v998_v37, 4 }
 0x324   : > { %1204 = vrot.lane.b32.xlu0 %v4531_v50, %s4086_s24 }
 0x325   : > { %v1161_v36 = vsel %vm1156_vm2, %v4682_v5, %v1150_v35 }
 0x326   : > { %1179 = vst [vmem:[#allocation3 + $0xa4] sm:$0xf] %v1161_v36  ;;  %v4694_v11 = vpop.permute.xlu0 %1068  ;;  %v1480_v17 = vpop.permute.xlu1 %1479  ;;  %v4748_v36 = vsel %vm570_vm0, %v4639_v0, %v948_v6 }
 0x327   : > { %v1081_v38 = vrot.slane %v4694_v11, 4  ;;  %v1493_v1 = vrot.slane %v1480_v17, 4 }
 0x328   : > { %1629 = vperm.xlu0 %3959, %v1611_v7  }
 0x329   : > { %v1092_v3 = vsel %vm1087_vm7, %v4694_v11, %v1081_v38 }
 0x32a   : > { %1110 = vst [vmem:[#allocation3 + $0x74] sm:$0xf] %v1092_v3  ;;  %v1000_v43 = vpop.permute.xlu0 %999  ;;  %v929_v46 = vpop.permute.xlu1 %928 }
 0x32b   : > { %v1012_v25 = vrot.slane %v1000_v43, 4  ;;  %v942_v12 = vrot.slane %v929_v46, 4 }
 0x32c   : > { %1619 = vperm.xlu0 %3959, %v1609_v40  }
 0x32d   : > { %v1021_v32 = vsel %vm494_vm8, %v1011_v44, %v1012_v25  ;;  %v1023_v42 = vsel %vm1018_vm9, %v1000_v43, %v1012_v25  ;;  %v4764_v43 = vsel %vm1431_vm11, %v4645_v9, %v1430_v31 }
 0x32e   : > { %v4715_v49 = vsel %vm1018_vm9, %v998_v37, %v1021_v32  ;;  %1041 = vst [vmem:[#allocation3 + $0x44] sm:$0xf] %v1023_v42  ;;  %v1482_v50 = vpop.permute.xlu0 %1481  ;;  %v4724_v53 = vpop.permute.xlu1 %1139 }
 0x32f   : > { %v1494_v4 = vrot.slane %v1482_v50, 4  ;;  %v3659_v51 = vcombine.high %v4711_v47, %v4715_v49  ;;  %v3658_v52 = vcombine.low %v4711_v47, %v4715_v49  ;;  %v4946_v49 = vld [vmem:[%s5655_s4 + $0x8] ss:$12 sps:$4 sm:$0xff]  }
 0x331   : > { %v1503_v58 = vsel %vm494_vm8, %v1493_v1, %v1494_v4  ;;  %v1505_v61 = vsel %vm1500_vm10, %v1482_v50, %v1494_v4 }
 0x332   : > { %v4732_v8 = vsel %vm1500_vm10, %v1480_v17, %v1503_v58  ;;  %1523 = vst [vmem:[#allocation3 + $0x194] sm:$0xf] %v1505_v61  ;;  %v931_v10 = vpop.permute.xlu0 %930  ;;  %v4741_v18 = vpop.permute.xlu1 %1070 }
 0x333   : > { %v943_v13 = vrot.slane %v931_v10, 4 }
 0x335   : > { %v952_v62 = vsel %vm494_vm8, %v942_v12, %v943_v13  ;;  %v954_v24 = vsel %vm570_vm0, %v931_v10, %v943_v13 }
 0x336   : > { %v4751_v37 = vsel %vm570_vm0, %v929_v46, %v952_v62  ;;  %972 = vst [vmem:[#allocation3 + $0x14] sm:$0xf] %v954_v24  ;;  %v1413_v7 = vpop.permute.xlu0 %1412  ;;  %v4760_v0 = vpop.permute.xlu1 %1001 }
 0x337   : > { %v1425_v3 = vrot.slane %v1413_v7, 4 }
 0x339   : > { %v1434_v15 = vsel %vm494_vm8, %v1424_v39, %v1425_v3  ;;  %v1436_v40 = vsel %vm1431_vm11, %v1413_v7, %v1425_v3 }
 0x33a   : > { %v4768_v21 = vsel %vm1431_vm11, %v4667_v27, %v1434_v15  ;;  %1454 = vst [vmem:[#allocation3 + $0x164] sm:$0xf] %v1436_v40  ;;  %v1142_v44 = vpop.permute.xlu0 %1141  ;;  %v4775_v46 = vpop.permute.xlu1 %1483 }
 0x33b   : > { %v1152_v25 = vrot.slane %v1142_v44, 4 }
 0x33d   : > { %v1164_v42 = vsel %vm1156_vm2, %v1142_v44, %v1152_v25 }
 0x33e   : > { %1181 = vst [vmem:[#allocation3 + $0xb0] sm:$0xf] %v1164_v42  ;;  %v4777_v9 = vpop.permute.xlu0 %1072  ;;  %v4784_v50 = vpop.permute.xlu1 %932 }
 0x33f   : > { %v1083_v48 = vrot.slane %v4777_v9, 4 }
 0x341   : > { %v1095_v27 = vsel %vm1087_vm7, %v4777_v9, %v1083_v48 }
 0x342   : > { %1112 = vst [vmem:[#allocation3 + $0x80] sm:$0xf] %v1095_v27  ;;  %v4786_v1 = vpop.permute.xlu0 %1003  ;;  %v4793_v58 = vpop.permute.xlu1 %1414 }
 0x343   : > { %v1014_v4 = vrot.slane %v4786_v1, 4 }
 0x345   : > { %v1026_v55 = vsel %vm1018_vm9, %v4786_v1, %v1014_v4 }
 0x346   : > { %1043 = vst [vmem:[#allocation3 + $0x50] sm:$0xf] %v1026_v55  ;;  %v4795_v61 = vpop.permute.xlu0 %1485  ;;  %v4802_v12 = vpop.permute.xlu1 %1416 }
 0x347   : > { %v1496_v6 = vrot.slane %v4795_v61, 4  ;;  %v5666_v13 = vrot.slane %v4802_v12, 4 }
 0x349   : > { %v1508_v10 = vsel %vm1500_vm10, %v4795_v61, %v1496_v6  ;;  %v1439_v24 = vsel %vm1431_vm11, %v4802_v12, %v5666_v13 }
 0x34a   : > { %1525 = vst [vmem:[#allocation3 + $0x1a0] sm:$0xf] %v1508_v10  ;;  %v4805_v23 = vpop.permute.xlu0 %934  ;;  %1456 = vst [vmem:[#allocation3 + $0x170] sm:$0xf] %v1439_v24  ;;  %v4816_v7 = vpop.permute.xlu1 %1347  ;;  %v1149_v24 = vrot.slane %v4665_v26, 4 }
 0x34b   : > { %v945_v62 = vrot.slane %v4805_v23, 4  ;;  %v5663_v39 = vrot.slane %v4816_v7, 4 }
 0x34d   : > { %v957_v31 = vsel %vm570_vm0, %v4805_v23, %v945_v62  ;;  %v1370_v40 = vsel %vm1362_vm12, %v4816_v7, %v5663_v39 }
 0x34e   : > { %974 = vst [vmem:[#allocation3 + $0x20] sm:$0xf] %v957_v31  ;;  %v4819_v3 = vpop.permute.xlu0 %1343  ;;  %1387 = vst [vmem:[#allocation3 + $0x140] sm:$0xf] %v1370_v40  ;;  %v1144_v42 = vpop.permute.xlu1 %1143  ;;  %v1151_v31 = vrot.slane %v4724_v53, 4  ;;  %v1147_v40 = vrot.slane %v4604_v56, 4 }
 0x34f   : > { %v5662_v15 = vrot.slane %v4819_v3, 4  ;;  %v1153_v39 = vrot.slane %v1144_v42, 4 }
 0x350   : > { %v1155_v14 = vsel %vm494_vm8, %v1147_v40, %v1148_v60 }
 0x351   : > { %v1367_v44 = vsel %vm1362_vm12, %v4819_v3, %v5662_v15  ;;  %v1159_v15 = vsel %vm494_vm8, %v1149_v24, %v1150_v35 }
 0x352   : > { %1385 = vst [vmem:[#allocation3 + $0x134] sm:$0xf] %v1367_v44  ;;  %v4830_v27 = vpop.permute.xlu0 %1418  ;;  %v4832_v55 = vpop.permute.xlu1 %1345  ;;  %v1162_v44 = vsel %vm494_vm8, %v1151_v31, %v1152_v25  ;;  %v1160_v16 = vsel %vm1156_vm2, %v4665_v26, %v1159_v15 }
 0x353   : > { %v1163_v5 = vsel %vm1156_vm2, %v4724_v53, %v1162_v44  ;;  %v1082_v53 = vrot.slane %v4741_v18, 4 }
 0x356   : > { %v4834_v10 = vpop.permute.xlu0 %1349  ;;  %v1075_v32 = vpop.permute.xlu1 %1074 }
 0x35a   : > { %v1146_v29 = vpop.permute.xlu0 %1145  ;;  %v4848_v13 = vpop.permute.xlu1 %1339 }
 0x35b   : > { %v1154_v45 = vrot.slane %v1146_v29, 4  ;;  %v1354_v25 = vrot.slane %v4848_v13, 4 }
 0x35d   : > { %v1165_v17 = vsel %vm494_vm8, %v1153_v39, %v1154_v45  ;;  %v1167_v20 = vsel %vm1156_vm2, %v1146_v29, %v1154_v45  ;;  %v1157_v45 = vsel %vm1156_vm2, %v4604_v56, %v1155_v14  ;;  %v1364_v26 = vsel %vm1362_vm12, %v4848_v13, %v1354_v25 }
 0x35e   : > { %v1166_v35 = vsel %vm1156_vm2, %v1144_v42, %v1165_v17  ;;  %1183 = vst [vmem:[#allocation3 + $0xbc] sm:$0xf] %v1167_v20  ;;  %v4856_v59 = vpop.permute.xlu0 %1341  ;;  %v1080_v29 = vrot.slane %v4679_v34, 4  ;;  %1383 = vst [vmem:[#allocation3 + $0x128] sm:$0xf] %v1364_v26  ;;  %v1006_v20 = vpop.permute.xlu1 %1005  ;;  %v3671_v17 = vcombine.high %v1157_v45, %v1160_v16  ;;  %v1078_v39 = vrot.slane %v4609_v57, 4 }
 0x35f   : > { %v3674_v60 = vcombine.high %v1163_v5, %v1166_v35  ;;  %v3673_v24 = vcombine.low %v1163_v5, %v1166_v35  ;;  %v1093_v14 = vsel %vm494_vm8, %v1082_v53, %v1083_v48  ;;  %v1084_v42 = vrot.slane %v1075_v32, 4 }
 0x360   : > { %v1090_v56 = vsel %vm494_vm8, %v1080_v29, %v1081_v38  ;;  %v3670_v40 = vcombine.low %v1157_v45, %v1160_v16  ;;  %v1086_v44 = vsel %vm494_vm8, %v1078_v39, %v1079_v63  ;;  %v1094_v38 = vsel %vm1087_vm7, %v4741_v18, %v1093_v14 }
 0x361   : > { %1957 = vmatprep.subr.bf16.mxu0 %v3674_v60  ;;  %v1091_v11 = vsel %vm1087_vm7, %v4679_v34, %v1090_v56  ;;  %v1088_v63 = vsel %vm1087_vm7, %v4609_v57, %v1086_v44  ;;  %v1495_v53 = vrot.slane %v4775_v46, 4 }
 0x362   : > { %v1077_v15 = vpop.permute.xlu0 %1076  ;;  %1958 = vmatpush1.bf16.msra.mxu0 %v3673_v24  ;;  %v1488_v60 = vpop.permute.xlu1 %1487  ;;  %v1013_v24 = vrot.slane %v4760_v0, 4  ;;  %v3665_v26 = vcombine.high %v1088_v63, %v1091_v11 }
 0x363   : > { %v1085_v31 = vrot.slane %v1077_v15, 4  ;;  %1959 = vmatprep.subr.bf16.mxu0 %v3671_v17  ;;  %v3664_v17 = vcombine.low %v1088_v63, %v1091_v11  ;;  %v1506_v1 = vsel %vm494_vm8, %v1495_v53, %v1496_v6  ;;  %v5674_v53 = vcombine.high %v4728_v2, %v4732_v8 }
 0x364   : > { %v1024_v18 = vsel %vm494_vm8, %v1013_v24, %v1014_v4  ;;  %v1507_v61 = vsel %vm1500_vm10, %v4775_v46, %v1506_v1 }
 0x365   : > { %v1096_v5 = vsel %vm494_vm8, %v1084_v42, %v1085_v31  ;;  %v1098_v35 = vsel %vm1087_vm7, %v1077_v15, %v1085_v31  ;;  %v1025_v56 = vsel %vm1018_vm9, %v4760_v0, %v1024_v18  ;;  %v1497_v42 = vrot.slane %v1488_v60, 4 }
 0x366   : > { %v1097_v9 = vsel %vm1087_vm7, %v1075_v32, %v1096_v5  ;;  %1114 = vst [vmem:[#allocation3 + $0x8c] sm:$0xf] %v1098_v35  ;;  %v4883_v48 = vpop.permute.xlu0 %1280  ;;  %1960 = vmatpush1.bf16.msra.mxu0 %v3670_v40  ;;  %v937_v45 = vpop.permute.xlu1 %936  ;;  %v1015_v32 = vrot.slane %v1006_v20, 4  ;;  %v944_v5 = vrot.slane %v4784_v50, 4 }
 0x367   : > { %v3668_v54 = vcombine.high %v1094_v38, %v1097_v9  ;;  %v3667_v16 = vcombine.low %v1094_v38, %v1097_v9 }
 0x368   : > { %v955_v6 = vsel %vm494_vm8, %v944_v5, %v945_v62 }
 0x369   : > { %1961 = vmatprep.subr.bf16.mxu0 %v3668_v54  ;;  %v946_v54 = vrot.slane %v937_v45, 4 }
 0x36a   : > { %v1008_v34 = vpop.permute.xlu0 %1007  ;;  %1962 = vmatpush1.bf16.msra.mxu0 %v3667_v16  ;;  %v4894_v15 = vpop.permute.xlu1 %1337 }
 0x36b   : > { %v1016_v29 = vrot.slane %v1008_v34, 4  ;;  %1963 = vmatprep.subr.bf16.mxu0 %v3665_v26  ;;  %v1426_v26 = vrot.slane %v4793_v58, 4 }
 0x36d   : > { %v1027_v39 = vsel %vm494_vm8, %v1015_v32, %v1016_v29  ;;  %v1029_v57 = vsel %vm1018_vm9, %v1008_v34, %v1016_v29  ;;  %v1428_v32 = vrot.slane %v4830_v27, 4 }
 0x36e   : > { %v1028_v4 = vsel %vm1018_vm9, %v1006_v20, %v1027_v39  ;;  %1045 = vst [vmem:[#allocation3 + $0x5c] sm:$0xf] %v1029_v57  ;;  %v1490_v14 = vpop.permute.xlu0 %1489  ;;  %1964 = vmatpush1.bf16.msra.mxu0 %v3664_v17  ;;  %v4905_v0 = vpop.permute.xlu1 %1278 }
 0x36f   : > { %v1498_v31 = vrot.slane %v1490_v14, 4  ;;  %v3662_v40 = vcombine.high %v1025_v56, %v1028_v4  ;;  %v3661_v44 = vcombine.low %v1025_v56, %v1028_v4  ;;  %v1289_v38 = vrot.slane %v4905_v0, 4 }
 0x370   : > { %v5676_v4 = vcombine.low %v4728_v2, %v4732_v8 }
 0x371   : > { %v1509_v35 = vsel %vm494_vm8, %v1497_v42, %v1498_v31  ;;  %v1511_v11 = vsel %vm1500_vm10, %v1490_v14, %v1498_v31  ;;  %1965 = vmatprep.subr.bf16.mxu0 %v3662_v40  ;;  %v1301_v46 = vsel %vm1293_vm13, %v4905_v0, %v1289_v38  ;;  %v5677_v42 = vcombine.high %v4748_v36, %v4751_v37 }
 0x372   : > { %v1510_v20 = vsel %vm1500_vm10, %v1488_v60, %v1509_v35  ;;  %1527 = vst [vmem:[#allocation3 + $0x1ac] sm:$0xf] %v1511_v11  ;;  %v939_v9 = vpop.permute.xlu0 %938  ;;  %1966 = vmatpush1.bf16.msra.mxu0 %v3661_v44  ;;  %1318 = vst [vmem:[#allocation3 + $0x110] sm:$0xf] %v1301_v46  ;;  %v4923_v60 = vpop.permute.xlu1 %1276  ;;  %v1357_v40 = vrot.slane %v4832_v55, 4  ;;  %v5678_v35 = vcombine.low %v4748_v36, %v4751_v37  ;;  %v5679_v11 = vmov 0  }
 0x373   : > { %v947_v16 = vrot.slane %v939_v9, 4  ;;  %1967 = vmatprep.subr.bf16.mxu0 %v3659_v51  ;;  %v3704_v63 = vcombine.high %v1507_v61, %v1510_v20  ;;  %v3703_v24 = vcombine.low %v1507_v61, %v1510_v20  ;;  %v956_v51 = vsel %vm570_vm0, %v4784_v50, %v955_v6  ;;  %v4992_v37 = vld [vmem:[%s5655_s4 + $0x20] ss:$12 sps:$4 sm:$0xff]  }
 0x374   : > { %v5675_v50 = vrot.slane %v4802_v12, 4  ;;  %v1359_v61 = vrot.slane %v4834_v10, 4  ;;  %v1355_v20 = vrot.slane %v4856_v59, 4 }
 0x375   : > { %v958_v23 = vsel %vm494_vm8, %v946_v54, %v947_v16  ;;  %v960_v62 = vsel %vm570_vm0, %v939_v9, %v947_v16  ;;  %2022 = vmatprep.subr.bf16.mxu1 %v3704_v63  ;;  %v5680_v54 = vrot.slane %v4816_v7, 4 }
 0x376   : > { %v959_v34 = vsel %vm570_vm0, %v937_v45, %v958_v23  ;;  %976 = vst [vmem:[#allocation3 + $0x2c] sm:$0xf] %v960_v62  ;;  %v1421_v18 = vpop.permute.xlu0 %1420  ;;  %1968 = vmatpush1.bf16.msra.mxu0 %v3658_v52  ;;  %2023 = vmatpush1.bf16.msra.mxu1 %v3703_v24  ;;  %v1437_v45 = vsel %vm494_vm8, %v1426_v26, %v5675_v50  ;;  %v4941_v47 = vpop.permute.xlu1 %1270 }
 0x377   : > { %v1429_v29 = vrot.slane %v1421_v18, 4  ;;  %2024 = vmatprep.subr.bf16.mxu1 %v5674_v53  ;;  %v3656_v17 = vcombine.high %v956_v51, %v959_v34  ;;  %v3655_v39 = vcombine.low %v956_v51, %v959_v34  ;;  %v1285_v12 = vrot.slane %v4941_v47, 4  ;;  %v3963_v51 = vld [vmem:[#allocation3 + $0xb0] ss:$12 sps:$4 sm:$0xff]   ;;  %v3964_v34 = vld [vmem:[#allocation3 + $0x158] ss:$12 sps:$4 sm:$0xff]  }
 0x378   : > { %v1368_v16 = vsel %vm494_vm8, %v1357_v40, %v5680_v54  ;;  %v1288_v53 = vrot.slane %v4923_v60, 4  ;;  %v5683_v50 = vcombine.low %v4764_v43, %v4768_v21 }
 0x379   : > { %v1440_v57 = vsel %vm494_vm8, %v1428_v32, %v1429_v29  ;;  %v1442_v56 = vsel %vm1431_vm11, %v1421_v18, %v1429_v29  ;;  %1969 = vmatprep.subr.bf16.mxu0 %v3656_v17  ;;  %v1295_v31 = vsel %vm1293_vm13, %v4941_v47, %v1285_v12  ;;  %v5681_v18 = vcombine.high %v4764_v43, %v4768_v21 }
 0x37a   : > { %v1441_v52 = vsel %vm1431_vm11, %v4830_v27, %v1440_v57  ;;  %1458 = vst [vmem:[#allocation3 + $0x17c] sm:$0xf] %v1442_v56  ;;  %v4951_v1 = vpop.permute.xlu0 %1274  ;;  %1970 = vmatpush1.bf16.msra.mxu0 %v3655_v39  ;;  %2025 = vmatpush1.bf16.msra.mxu1 %v5676_v4  ;;  %v1438_v27 = vsel %vm1431_vm11, %v4793_v58, %v1437_v45  ;;  %1314 = vst [vmem:[#allocation3 + $0xf8] sm:$0xf] %v1295_v31  ;;  %v4971_v8 = vpop.permute.xlu1 %1268  ;;  %v1353_v58 = vrot.slane %v4894_v15, 4 }
 0x37b   : > { %v1287_v14 = vrot.slane %v4951_v1, 4  ;;  %1971 = vmatprep.subr.bf16.mxu0 %v5677_v42  ;;  %v3698_v44 = vcombine.high %v1438_v27, %v1441_v52  ;;  %v3697_v9 = vcombine.low %v1438_v27, %v1441_v52  ;;  %v1369_v13 = vsel %vm1362_vm12, %v4832_v55, %v1368_v16  ;;  %v3965_v39 = vld [vmem:[#allocation3 + $0x98] ss:$12 sps:$4 sm:$0xff]  }
 0x37c   : > { %v1361_v23 = vsel %vm494_vm8, %v1353_v58, %v1354_v25  ;;  %v5682_v25 = vrot.slane %v4819_v3, 4  ;;  %v1290_v45 = vrot.slane %v4883_v48, 4  ;;  %v1299_v42 = vsel %vm494_vm8, %v1288_v53, %v1289_v38  ;;  %v3968_v38 = vld [vmem:[#allocation3 + $0x128] ss:$12 sps:$4 sm:$0xff]  }
 0x37d   : > { %v1298_v2 = vsel %vm1293_vm13, %v4951_v1, %v1287_v14  ;;  %3706 = vmatmul.mubr.msk.bf16.vlgmr.msra.gmra.mxu1 %vm5667_vm14, %v4946_v49  ;;  %v1363_v29 = vsel %vm1362_vm12, %v4894_v15, %v1361_v23  ;;  %v1284_v43 = vrot.slane %v4971_v8, 4  ;;  %v1300_v58 = vsel %vm1293_vm13, %v4923_v60, %v1299_v42  ;;  %v3984_v42 = vld [vmem:[%s5655_s4 + $0x1c] ss:$12 sps:$4 sm:$0xff]  }
 0x37e   : > { %1316 = vst [vmem:[#allocation3 + $0x104] sm:$0xf] %v1298_v2  ;;  %v1352_v5 = vpop.permute.xlu0 %1351  ;;  %1972 = vmatpush1.bf16.msra.mxu0 %v5678_v35  ;;  %2052 = vmatprep.mubr.bf16.mxu1 %v5679_v11  ;;  %v4987_v46 = vpop.permute.xlu1 %1210  ;;  %v1365_v32 = vsel %vm494_vm8, %v1355_v20, %v5682_v25  ;;  %v3969_v20 = vld [vmem:[#allocation3 + $0x68] ss:$12 sps:$4 sm:$0xff]  }
 0x37f   : > { %v1360_v6 = vrot.slane %v1352_v5, 4  ;;  %1973 = vmatprep.subr.bf16.mxu0 %v3698_v44  ;;  %v1221_v62 = vrot.slane %v4987_v46, 4  ;;  %v1366_v15 = vsel %vm1362_vm12, %v4856_v59, %v1365_v32  ;;  %v3967_v44 = vld [vmem:[#allocation3 + $0x80] ss:$12 sps:$4 sm:$0xff]  }
 0x380   : > { %v3689_v4 = vcombine.high %v1363_v29, %v1366_v15  ;;  %v3688_v35 = vcombine.low %v1363_v29, %v1366_v15  ;;  %v3976_v15 = vld [vmem:[#allocation3 + $0x20] ss:$12 sps:$4 sm:$0xff]  }
 0x381   : > { %v1371_v63 = vsel %vm494_vm8, %v1359_v61, %v1360_v6  ;;  %v1373_v24 = vsel %vm1362_vm12, %v1352_v5, %v1360_v6  ;;  %v3961_v36 = vld [vmem:[#allocation3 + $0x170] ss:$12 sps:$4 sm:$0xff]  }
 0x382   : > { %v1372_v7 = vsel %vm1362_vm12, %v4834_v10, %v1371_v63  ;;  %1389 = vst [vmem:[#allocation3 + $0x14c] sm:$0xf] %v1373_v24  ;;  %v1273_v26 = vpop.permute.xlu0 %1272  ;;  %1974 = vmatpush2.bf16.msra.mxu0 %v3697_v9  ;;  %3807 = vmatprep.subr.bf16.mxu1 %v3961_v36  ;;  %v1232_v10 = vsel %vm874_vm3, %v4987_v46, %v1221_v62  ;;  %v5015_v17 = vpop.permute.xlu1 %1208 }
 0x383   : > { %1975 = vmatprep.subr.bf16.mxu0 %v5681_v18  ;;  %3808 = vmatpush3.bf16.msra.mxu1 %v3963_v51  ;;  %1249 = vst [vmem:[#allocation3 + $0xe0] sm:$0xf] %v1232_v10  ;;  %v3692_v55 = vcombine.high %v1369_v13, %v1372_v7  ;;  %v1286_v57 = vrot.slane %v1273_v26, 4  ;;  %v3691_v52 = vcombine.low %v1369_v13, %v1372_v7  ;;  %v1220_v61 = vrot.slane %v5015_v17, 4  ;;  %v3971_v51 = vld [vmem:[#allocation3 + $0x50] ss:$12 sps:$4 sm:$0xff]  }
 0x384   : > { %3809 = vmatprep.subr.bf16.mxu1 %v3964_v34  ;;  %v3974_v10 = vld [vmem:[#allocation3 + $0x38] ss:$12 sps:$4 sm:$0xff]  }
 0x385   : > { %3707 = vmatmul.mubr.msk.bf16.gmra.mxu1 %vm5667_vm14, %v4992_v37  ;;  %v1296_v0 = vsel %vm494_vm8, %v1286_v57, %v1287_v14  ;;  %v3973_v18 = vld [vmem:[#allocation3 + $0xf8] ss:$12 sps:$4 sm:$0xff]  }
 0x386   : > { %v1283_v3 = vpop.permute.xlu0 %1282  ;;  %1976 = vmatpush2.bf16.msra.mxu0 %v5683_v50  ;;  %2095 = vmatprep.mubr.bf16.mxu1 %v4672_v30  ;;  %v1203_v27 = vpop.permute.xlu1 %1202  ;;  %v1297_v14 = vsel %vm1293_vm13, %v1273_v26, %v1296_v0 }
 0x387   : > { %v1291_v56 = vrot.slane %v1283_v3, 4  ;;  %1977 = vmatprep.subr.bf16.mxu0 %v3692_v55  ;;  %3810 = vmatpush3.bf16.msra.mxu1 %v3965_v39  ;;  %v1217_v40 = vrot.slane %v1203_v27, 4 }
 0x389   : > { %v1302_v21 = vsel %vm494_vm8, %v1290_v45, %v1291_v56  ;;  %v1304_v30 = vsel %vm1293_vm13, %v1283_v3, %v1291_v56  ;;  %v3966_v59 = vld [vmem:[#allocation3 + $0x140] ss:$12 sps:$4 sm:$0xff]   ;;  %v1226_v5 = vsel %vm874_vm3, %v1203_v27, %v1217_v40 }
 0x38a   : > { %v1303_v31 = vsel %vm1293_vm13, %v4883_v48, %v1302_v21  ;;  %1320 = vst [vmem:[#allocation3 + $0x11c] sm:$0xf] %v1304_v30  ;;  %v1213_v2 = vpop.permute.xlu0 %1212  ;;  %1978 = vmatpush2.bf16.msra.mxu0 %v3691_v52  ;;  %3811 = vmatprep.subr.bf16.mxu1 %v3966_v59  ;;  %v1292_v48 = vsel %vm494_vm8, %v1284_v43, %v1285_v12  ;;  %1245 = vst [vmem:[#allocation3 + $0xc8] sm:$0xf] %v1226_v5  ;;  %v1201_v16 = vpop.permute.xlu1 %1200  ;;  %v3980_v52 = vld [vmem:[%s5655_s4] ss:$12 sps:$4 sm:$0xff]  }
 0x38b   : > { %1979 = vmatprep.subr.bf16.mxu0 %v3689_v4  ;;  %3812 = vmatpush3.bf16.msra.mxu1 %v3967_v44  ;;  %v3686_v1 = vcombine.high %v1300_v58, %v1303_v31  ;;  %v1222_v9 = vrot.slane %v1213_v2, 4  ;;  %v1294_v54 = vsel %vm1293_vm13, %v4971_v8, %v1292_v48  ;;  %v3685_v47 = vcombine.low %v1300_v58, %v1303_v31  ;;  %v3978_v4 = vld [vmem:[#allocation3 + $0x8] ss:$12 sps:$4 sm:$0xff]   ;;  %v3979_v43 = vld [vmem:[#allocation3 + $0x1a0] ss:$12 sps:$4 sm:$0xff]  }
 0x38c   : > { %3813 = vmatprep.subr.bf16.mxu1 %v3968_v38  ;;  %v1230_v12 = vsel %vm494_vm8, %v1220_v61, %v1221_v62  ;;  %v3683_v23 = vcombine.high %v1294_v54, %v1297_v14  ;;  %v1216_v8 = vrot.slane %v1201_v16, 4  ;;  %v3682_v62 = vcombine.low %v1294_v54, %v1297_v14  ;;  %v3983_v21 = vld [vmem:[#allocation3 + $0x188] ss:$12 sps:$4 sm:$0xff]   ;;  %v3986_v30 = vld [vmem:[%s5655_s4 + $0x18] ss:$12 sps:$4 sm:$0xff]  }
 0x38d   : > { %v1231_v46 = vsel %vm874_vm3, %v5015_v17, %v1230_v12 }
 0x38e   : > { %v1215_v6 = vpop.permute.xlu0 %1214  ;;  %1980 = vmatpush2.bf16.msra.mxu0 %v3688_v35  ;;  %v1224_v29 = vsel %vm494_vm8, %v1216_v8, %v1217_v40 }
 0x38f   : > { %v1223_v60 = vrot.slane %v1215_v6, 4  ;;  %1981 = vmatprep.subr.bf16.mxu0 %v3686_v1  ;;  %3814 = vmatpush3.bf16.msra.mxu1 %v3969_v20  ;;  %v1225_v17 = vsel %vm874_vm3, %v1201_v16, %v1224_v29 }
 0x391   : > { %v1233_v63 = vsel %vm494_vm8, %v1222_v9, %v1223_v60  ;;  %v1235_v24 = vsel %vm874_vm3, %v1215_v6, %v1223_v60  ;;  %v3970_v36 = vld [vmem:[#allocation3 + $0x110] ss:$12 sps:$4 sm:$0xff]  }
 0x392   : > { %v1234_v7 = vsel %vm874_vm3, %v1213_v2, %v1233_v63  ;;  %1251 = vst [vmem:[#allocation3 + $0xec] sm:$0xf] %v1235_v24  ;;  %v1207_v26 = vpop.permute.xlu0 %1206  ;;  %1982 = vmatpush2.bf16.msra.mxu0 %v3685_v47  ;;  %3815 = vmatprep.subr.bf16.mxu1 %v3970_v36 }
 0x393   : > { %v1219_v34 = vrot.slane %v1207_v26, 4  ;;  %1983 = vmatprep.subr.bf16.mxu0 %v3683_v23  ;;  %3816 = vmatpush3.bf16.msra.mxu1 %v3971_v51  ;;  %v3680_v25 = vcombine.high %v1231_v46, %v1234_v7  ;;  %v3679_v55 = vcombine.low %v1231_v46, %v1234_v7 }
 0x394   : > { %3817 = vmatprep.subr.bf16.mxu1 %v3973_v18 }
 0x395   : > { %v1229_v13 = vsel %vm874_vm3, %v1207_v26, %v1219_v34 }
 0x396   : > { %1247 = vst [vmem:[#allocation3 + $0xd4] sm:$0xf] %v1229_v13  ;;  %v1205_v32 = vpop.permute.xlu0 %1204  ;;  %1984 = vmatpush2.bf16.msra.mxu0 %v3682_v62 }
 0x397   : > { %v1218_v53 = vrot.slane %v1205_v32, 4  ;;  %1985 = vmatprep.subr.bf16.mxu0 %v3680_v25  ;;  %3818 = vmatpush3.bf16.msra.mxu1 %v3974_v10  ;;  %v1625_v0 = vpop.permute.xlu1 %1624 }
 0x399   : > { %v1227_v3 = vsel %vm494_vm8, %v1218_v53, %v1219_v34  ;;  %v3975_v39 = vld [vmem:[#allocation3 + $0xe0] ss:$12 sps:$4 sm:$0xff]  }
 0x39a   : > { %v1228_v50 = vsel %vm874_vm3, %v1205_v32, %v1227_v3  ;;  %1986 = vmatpush2.bf16.msra.mxu0 %v3679_v55  ;;  %3819 = vmatprep.subr.bf16.mxu1 %v3975_v39 }
 0x39b   : > { %v3677_v45 = vcombine.high %v1225_v17, %v1228_v50  ;;  %v3676_v57 = vcombine.low %v1225_v17, %v1228_v50  ;;  %3820 = vmatpush3.bf16.msra.mxu1 %v3976_v15  ;;  %v5074_v58 = vpop.permute.xlu1 %1614 }
 0x39d   : > { %v3977_v56 = vld [vmem:[#allocation3 + $0xc8] ss:$12 sps:$4 sm:$0xff]   ;;  %1987 = vmatprep.subr.bf16.mxu0 %v3677_v45 }
 0x39e   : > { %1988 = vmatpush2.bf16.msra.mxu0 %v3676_v57  ;;  %3821 = vmatprep.subr.bf16.mxu1 %v3977_v56 }
 0x39f   : > { %3822 = vmatpush3.bf16.msra.mxu1 %v3978_v4 }
 0x3a0   : > { %3881 = vmatprep.subr.bf16.mxu1 %v3979_v43 }
 0x3a1   : > { %1990 = vmatmul.mubr.bf16.vlgmr.msra.gmra.mxu0 %v3980_v52 }
 0x3a2   : > { %1999 = vmatprep.mubr.bf16.mxu0 %v3984_v42  ;;  %2096 = vmatmul.mubr.bf16.vlgmr.msra.gmra.mxu1 %v3980_v52 }
 0x3a3   : > { %3882 = vmatpush3.bf16.msra.mxu1 %v3979_v43  ;;  %2103 = vmatprep.mubr.bf16.mxu1 %v3984_v42  ;;  %v5076_v5 = vpop.permute.xlu0 %1629 }
 0x3a4   : > { %3883 = vmatprep.subr.bf16.mxu1 %v3983_v21 }
 0x3a7   : > { %3884 = vmatpush3.bf16.msra.mxu1 %v3983_v21  ;;  %v5080_v9 = vpop.permute.xlu0 %1619 }
 0x3a9   : > { %2000 = vmatmul.mubr.bf16.gmra.mxu0 %v3986_v30 }
 0x3aa   : > { %3418 = vmatprep.mubr.bf16.mxu0 %v5679_v11  ;;  %2104 = vmatmul.mubr.bf16.gmra.mxu1 %v3986_v30 }
 0x3ab   : > { %3885 = vmatprep.mubr.msk.bf16.mxu1 %vm5667_vm14, %v4946_v49 }
 0x3b2   : > { %3886 = vmatmul.mubr.msk.bf16.vlgmr.msra.gmra.mxu1 %vm5667_vm14, %v4992_v37 }
 0x43d   : > { %v2044_v27 = vpop.f32.mrf.mxu1 }
 0x43f   : > { %v2046_v59 = vpop.f32.mrf.mxu1 }
 0x441   : > { %v2048_v31 = vpop.f32.mrf.mxu1 }
 0x443   : > { %v2050_v40 = vpop.f32.mrf.mxu1 }
 0x445   : > { %v2054_v2 = vpop.f32.mrf.mxu1 }
 0x447   : > { %v2056_v44 = vpop.f32.mrf.mxu1 }
 0x449   : > { %v2058_v38 = vpop.f32.mrf.mxu1 }
 0x44b   : > { %v2060_v35 = vpop.f32.mrf.mxu1 }
 0x461   : > { %v1991_v48 = vpop.f32.mrf.mxu0 }
 0x462   : > { %v1992_v61 = vadd.f32 %v1991_v48, %v5074_v58  ;;  %v3823_v49 = vpop.f32.mrf.mxu1 }
 0x463   : > { %v1993_v1 = vpop.f32.mrf.mxu0 }
 0x464   : > { %v2045_v14 = vadd.f32 %v2044_v27, %v1992_v61  ;;  %v1994_v37 = vadd.f32 %v1993_v1, %v5074_v58  ;;  %v3824_v6 = vpop.f32.mrf.mxu1 }
 0x465   : > { %v1995_v20 = vpop.f32.mrf.mxu0  ;;  %v3825_v42 = vadd.f32 %v3824_v6, %v3823_v49 }
 0x466   : > { %vm2161_vm15 = vcmp.gt.f32.partialorder %v2045_v14, 0.0  ;;  %v2173_v60 = vmul.f32 0.01, %v2045_v14  ;;  %v2047_v54 = vadd.f32 %v2046_v59, %v1994_v37  ;;  %v3826_v16 = vpop.f32.mrf.mxu1  ;;  %v1996_v47 = vadd.f32 %v1995_v20, %v5080_v9 }
 0x467   : > { %v1997_v12 = vpop.f32.mrf.mxu0 }
 0x468   : > { %v2185_v63 = vsel %vm2161_vm15, %v2045_v14, %v2173_v60  ;;  %vm2162_vm1 = vcmp.gt.f32.partialorder %v2047_v54, 0.0  ;;  %v2174_v24 = vmul.f32 0.01, %v2047_v54  ;;  %v1998_v36 = vadd.f32 %v1997_v12, %v5080_v9  ;;  %v3827_v23 = vpop.f32.mrf.mxu1 }
 0x469   : > { %v2049_v7 = vadd.f32 %v2048_v31, %v1996_v47  ;;  %v2001_v26 = vpop.f32.mrf.mxu0  ;;  %v2197_v18 = vmul.f32 %v2185_v63, %v4432_v19  ;;  %v3828_v61 = vadd.f32 %v3827_v23, %v3826_v16  ;;  %v2098_v60 = vadd.f32 %v3825_v42, %v5074_v58 }
 0x46a   : > { %v2186_v51 = vsel %vm2162_vm1, %v2047_v54, %v2174_v24  ;;  %v2051_v8 = vadd.f32 %v2050_v40, %v1998_v36  ;;  %v2002_v34 = vadd.f32 %v2001_v26, %v1625_v0  ;;  %v3829_v13 = vpop.f32.mrf.mxu1 }
 0x46b   : > { %v2198_v46 = vmul.f32 %v2186_v51, %v4436_v28  ;;  %vm2164_vm5 = vcmp.gt.f32.partialorder %v2049_v7, 0.0  ;;  %v2176_v62 = vmul.f32 0.01, %v2049_v7  ;;  %v2003_v25 = vpop.f32.mrf.mxu0  ;;  %v2101_v51 = vadd.f32 %v3828_v61, %v5080_v9 }
 0x46c   : > { %vm2165_vm14 = vcmp.gt.f32.partialorder %v2051_v8, 0.0  ;;  %v2177_v32 = vmul.f32 0.01, %v2051_v8  ;;  %v2055_v10 = vadd.f32 %v2054_v2, %v2002_v34  ;;  %v2004_v29 = vadd.f32 %v2003_v25, %v1625_v0  ;;  %v3830_v55 = vpop.f32.mrf.mxu1 }
 0x46d   : > { %v2188_v53 = vsel %vm2164_vm5, %v2049_v7, %v2176_v62  ;;  %v2005_v3 = vpop.f32.mrf.mxu0  ;;  %v3793_v39 = vpack.c.bf16 %v2198_v46, %v2197_v18  ;;  %v3831_v50 = vadd.f32 %v3830_v55, %v3829_v13 }
 0x46e   : > { %v2189_v17 = vsel %vm2165_vm14, %v2051_v8, %v2177_v32  ;;  %vm2167_vm15 = vcmp.gt.f32.partialorder %v2055_v10, 0.0  ;;  %v2179_v45 = vmul.f32 0.01, %v2055_v10  ;;  %v3832_v57 = vpop.f32.mrf.mxu1  ;;  %v2057_v56 = vadd.f32 %v2056_v44, %v2004_v29 }
 0x46f   : > { %v2201_v15 = vmul.f32 %v2189_v17, %v4436_v28  ;;  %v2006_v52 = vadd.f32 %v2005_v3, %v5076_v5  ;;  %v2007_v4 = vpop.f32.mrf.mxu0  ;;  %2241 = vrot.lane.b32.xlu1 %v3793_v39, %s4086_s24  ;;  %v2200_v43 = vmul.f32 %v2188_v53, %v4432_v19  ;;  %v2106_v31 = vadd.f32 %v3831_v50, %v1625_v0 }
 0x470   : > { %v2008_v21 = vadd.f32 %v2007_v4, %v5076_v5  ;;  %vm2168_vm1 = vcmp.gt.f32.partialorder %v2057_v56, 0.0  ;;  %v2180_v30 = vmul.f32 0.01, %v2057_v56  ;;  %v3833_v27 = vpop.f32.mrf.mxu1  ;;  %v2191_v40 = vsel %vm2167_vm15, %v2055_v10, %v2179_v45 }
 0x471   : > { %v2059_v59 = vadd.f32 %v2058_v38, %v2006_v52  ;;  %v3834_v2 = vadd.f32 %v3833_v27, %v3832_v57  ;;  %v3795_v44 = vpack.c.bf16 %v2201_v15, %v2200_v43  ;;  %v2203_v38 = vmul.f32 %v2191_v40, %v4432_v19 }
 0x472   : > { %v2061_v48 = vadd.f32 %v2060_v35, %v2008_v21  ;;  %v2192_v1 = vsel %vm2168_vm1, %v2057_v56, %v2180_v30  ;;  %v3887_v37 = vpop.f32.mrf.mxu1 }
 0x473   : > { %vm2170_vm14 = vcmp.gt.f32.partialorder %v2059_v59, 0.0  ;;  %v2182_v14 = vmul.f32 0.01, %v2059_v59  ;;  %v2204_v49 = vmul.f32 %v2192_v1, %v4436_v28  ;;  %v2155_v6 = vadd.f32 %v3887_v37, %v2106_v31  ;;  %2245 = vrot.lane.b32.xlu1 %v3795_v44, %s4086_s24 }
 0x474   : > { %vm2171_vm5 = vcmp.gt.f32.partialorder %v2061_v48, 0.0  ;;  %v2183_v20 = vmul.f32 0.01, %v2061_v48  ;;  %v2146_v54 = vpop.f32.mrf.mxu1  ;;  %v2109_v47 = vadd.f32 %v3834_v2, %v5076_v5 }
 0x475   : > { %v2194_v0 = vsel %vm2170_vm14, %v2059_v59, %v2182_v14  ;;  %vm2169_vm15 = vcmp.gt.f32.partialorder %v2155_v6, 0.0  ;;  %v2181_v35 = vmul.f32 0.01, %v2155_v6  ;;  %v2147_v24 = vadd.f32 %v2146_v54, %v2098_v60 }
 0x476   : > { %v2195_v16 = vsel %vm2171_vm5, %v2061_v48, %v2183_v20  ;;  %v2206_v12 = vmul.f32 %v2194_v0, %v4432_v19  ;;  %v3888_v36 = vpop.f32.mrf.mxu1  ;;  %v3797_v23 = vpack.c.bf16 %v2204_v49, %v2203_v38 }
 0x477   : > { %v2207_v63 = vmul.f32 %v2195_v16, %v4436_v28  ;;  %v2193_v7 = vsel %vm2169_vm15, %v2155_v6, %v2181_v35  ;;  %v2158_v26 = vadd.f32 %v3888_v36, %v2109_v47  ;;  %vm2163_vm1 = vcmp.gt.f32.partialorder %v2147_v24, 0.0 }
 0x478   : > { %v2205_v8 = vmul.f32 %v2193_v7, %v4442_v41  ;;  %v2175_v58 = vmul.f32 0.01, %v2147_v24  ;;  %v2149_v34 = vpop.f32.mrf.mxu1  ;;  %2249 = vrot.lane.b32.xlu1 %v3797_v23, %s4086_s24 }
 0x479   : > { %v3799_v18 = vpack.c.bf16 %v2207_v63, %v2206_v12  ;;  %vm2172_vm14 = vcmp.gt.f32.partialorder %v2158_v26, 0.0  ;;  %v2184_v5 = vmul.f32 0.01, %v2158_v26  ;;  %v2150_v19 = vadd.f32 %v2149_v34, %v2101_v51 }
 0x47a   : > { %v3798_v46 = vpack.c.bf16 %v2205_v8, %v2205_v8  ;;  %v2187_v28 = vsel %vm2163_vm1, %v2147_v24, %v2175_v58 }
 0x47b   : > { %v2199_v62 = vmul.f32 %v2187_v28, %v4442_v41  ;;  %v2196_v13 = vsel %vm2172_vm14, %v2158_v26, %v2184_v5  ;;  %v2178_v25 = vmul.f32 0.01, %v2150_v19  ;;  %vm2166_vm5 = vcmp.gt.f32.partialorder %v2150_v19, 0.0 }
 0x47c   : > { %2251 = vrot.lane.b32.xlu0 %v3798_v46, %s4086_s24  ;;  %2253 = vrot.lane.b32.xlu1 %v3799_v18, %s4086_s24  ;;  %v2208_v32 = vmul.f32 %v2196_v13, %v4442_v41 }
 0x47d   : > { %v3794_v9 = vpack.c.bf16 %v2199_v62, %v2199_v62  ;;  %v2190_v10 = vsel %vm2166_vm5, %v2150_v19, %v2178_v25 }
 0x47e   : > { %v3800_v29 = vpack.c.bf16 %v2208_v32, %v2208_v32  ;;  %v2202_v53 = vmul.f32 %v2190_v10, %v4442_v41 }
 0x480   : > { %2243 = vrot.lane.b32.xlu0 %v3794_v9, %s4086_s24  ;;  %v3796_v55 = vpack.c.bf16 %v2202_v53, %v2202_v53 }
 0x484   : > { %2255 = vrot.lane.b32.xlu0 %v3800_v29, %s4086_s24  ;;  %v2985_v29 = vld [vmem:[%s5658_s7] sm:$0xff] }
 0x488   : > { %2247 = vrot.lane.b32.xlu0 %v3796_v55, %s4086_s24 }
 0x4e1   : > { %v2242_v3 = vpop.permute.xlu1 %2241 }
 0x4e2   : > { %v2257_v39 = vrot.slane %v2242_v3, 4 }
 0x4e4   : > { %v2265_v17 = vsel %vm874_vm3, %v2257_v39, %v2242_v3 }
 0x4e5   : > { %2285 = vst.msk [vmem:[#allocation2] sm:$0xff] %vm4466_vm4, %v2265_v17  ;;  %v2246_v50 = vpop.permute.xlu1 %2245 }
 0x4e6   : > { %v2259_v15 = vrot.slane %v2246_v50, 4 }
 0x4e8   : > { %v2268_v45 = vsel %vm874_vm3, %v2259_v15, %v2246_v50 }
 0x4e9   : > { %2287 = vst.msk [vmem:[#allocation2 + $0x10] sm:$0xff] %vm4466_vm4, %v2268_v45 }
 0x4ea   : > { %v2250_v41 = vpop.permute.xlu1 %2249 }
 0x4eb   : > { %v2261_v57 = vrot.slane %v2250_v41, 4 }
 0x4ec   : > { %v5116_v56 = vld [vmem:[#allocation2] sm:$0xff] }
 0x4ed   : > { %2513 = vrot.lane.b32.xlu1 %v5116_v56, %s4087_s25  ;;  %v2271_v52 = vsel %vm874_vm3, %v2261_v57, %v2250_v41  ;;  %v2987_v41 = vld [vmem:[%s5658_s7 + $0x10] sm:$0xff] }
 0x4ee   : > { %v2252_v4 = vpop.permute.xlu0 %2251  ;;  %2289 = vst.msk [vmem:[#allocation2 + $0x20] sm:$0xff] %vm4466_vm4, %v2271_v52  ;;  %v2254_v42 = vpop.permute.xlu1 %2253 }
 0x4ef   : > { %v2262_v43 = vrot.slane %v2252_v4, 4  ;;  %v2263_v21 = vrot.slane %v2254_v42, 4 }
 0x4f0   : > { %v5162_v38 = vld [vmem:[#allocation2 + $0x10] sm:$0xff] }
 0x4f1   : > { %2445 = vrot.lane.b32.xlu1 %v5116_v56, %s4088_s26  ;;  %v2272_v30 = vsel %vm494_vm8, %v2261_v57, %v2262_v43  ;;  %v2274_v27 = vsel %vm874_vm3, %v2263_v21, %v2254_v42 }
 0x4f2   : > { %v2273_v59 = vsel %vm874_vm3, %v2272_v30, %v2252_v4  ;;  %v2244_v31 = vpop.permute.xlu0 %2243  ;;  %2291 = vst.msk [vmem:[#allocation2 + $0x30] sm:$0xff] %vm4466_vm4, %v2274_v27 }
 0x4f3   : > { %2290 = vst.msk [vmem:[#allocation2 + $0x28] sm:$0xff] %vm4474_vm6, %v2273_v59  ;;  %v2258_v40 = vrot.slane %v2244_v31, 4 }
 0x4f5   : > { %2377 = vrot.lane.b32.xlu1 %v5116_v56, %s4089_s10  ;;  %v2266_v2 = vsel %vm494_vm8, %v2257_v39, %v2258_v40  ;;  %v2501_v0 = vld [vmem:[#allocation2 + $0x20] sm:$0xff] }
 0x4f6   : > { %v2267_v48 = vsel %vm874_vm3, %v2266_v2, %v2244_v31  ;;  %v2256_v44 = vpop.permute.xlu0 %2255  ;;  %v5308_v2 = vld [vmem:[%s5657_s6 + $0x4] ss:$12 sps:$4 sm:$0xff]  }
 0x4f7   : > { %2286 = vst.msk [vmem:[#allocation2 + $0x8] sm:$0xff] %vm4474_vm6, %v2267_v48  ;;  %v2264_v61 = vrot.slane %v2256_v44, 4  ;;  %3365 = vmatprep.mubr.bf16.mxu1 %v5308_v2 }
 0x4f9   : > { %2853 = vrot.lane.b32.xlu1 %v5116_v56, %s4090_s12  ;;  %v2275_v22 = vsel %vm494_vm8, %v2263_v21, %v2264_v61  ;;  %v5206_v54 = vld [vmem:[#allocation2 + $0x30] sm:$0xff] }
 0x4fa   : > { %v2276_v1 = vsel %vm874_vm3, %v2275_v22, %v2256_v44  ;;  %v2248_v14 = vpop.permute.xlu0 %2247  ;;  %v2502_v60 = vld [vmem:[#allocation2 + $0x28] sm:$0xff] }
 0x4fb   : > { %2292 = vst.msk [vmem:[#allocation2 + $0x38] sm:$0xff] %vm4474_vm6, %v2276_v1  ;;  %v2260_v37 = vrot.slane %v2248_v14, 4 }
 0x4fd   : > { %2309 = vrot.lane.b32.xlu1 %v5116_v56, %s4083_s17  ;;  %v2269_v49 = vsel %vm494_vm8, %v2259_v15, %v2260_v37 }
 0x4fe   : > { %v2270_v6 = vsel %vm874_vm3, %v2269_v49, %v2248_v14  ;;  %v5148_v20 = vld [vmem:[#allocation2 + $0x8] sm:$0xff] }
 0x4ff   : > { %2288 = vst.msk [vmem:[#allocation2 + $0x18] sm:$0xff] %vm4474_vm6, %v2270_v6  ;;  %2515 = vrot.lane.b32.xlu0 %v5148_v20, %s4087_s25 }
 0x501   : > { %2785 = vrot.lane.b32.xlu1 %v5116_v56, %s4091_s13 }
 0x502   : > { %v5225_v35 = vld [vmem:[#allocation2 + $0x38] sm:$0xff] }
 0x503   : > { %2447 = vrot.lane.b32.xlu0 %v5148_v20, %s4088_s26 }
 0x505   : > { %2787 = vrot.lane.b32.xlu1 %v5148_v20, %s4091_s13 }
 0x506   : > { %v5178_v33 = vld [vmem:[#allocation2 + $0x18] sm:$0xff] }
 0x507   : > { %2379 = vrot.lane.b32.xlu0 %v5148_v20, %s4089_s10 }
 0x509   : > { %2517 = vrot.lane.b32.xlu1 %v5162_v38, %s4087_s25 }
 0x50b   : > { %2855 = vrot.lane.b32.xlu0 %v5148_v20, %s4090_s12 }
 0x50d   : > { %2449 = vrot.lane.b32.xlu1 %v5162_v38, %s4088_s26 }
 0x50f   : > { %2311 = vrot.lane.b32.xlu0 %v5148_v20, %s4083_s17 }
 0x511   : > { %2381 = vrot.lane.b32.xlu1 %v5162_v38, %s4089_s10 }
 0x513   : > { %2789 = vrot.lane.b32.xlu0 %v5162_v38, %s4091_s13 }
 0x515   : > { %2857 = vrot.lane.b32.xlu1 %v5162_v38, %s4090_s12 }
 0x517   : > { %2519 = vrot.lane.b32.xlu0 %v5178_v33, %s4087_s25 }
 0x519   : > { %2313 = vrot.lane.b32.xlu1 %v5162_v38, %s4083_s17 }
 0x51b   : > { %2451 = vrot.lane.b32.xlu0 %v5178_v33, %s4088_s26 }
 0x51d   : > { %2521 = vrot.lane.b32.xlu1 %v2501_v0, %s4087_s25 }
 0x51f   : > { %2383 = vrot.lane.b32.xlu0 %v5178_v33, %s4089_s10 }
 0x521   : > { %2453 = vrot.lane.b32.xlu1 %v2501_v0, %s4088_s26 }
 0x523   : > { %2859 = vrot.lane.b32.xlu0 %v5178_v33, %s4090_s12 }
 0x525   : > { %2385 = vrot.lane.b32.xlu1 %v2501_v0, %s4089_s10 }
 0x527   : > { %2315 = vrot.lane.b32.xlu0 %v5178_v33, %s4083_s17 }
 0x529   : > { %2861 = vrot.lane.b32.xlu1 %v2501_v0, %s4090_s12 }
 0x52b   : > { %2791 = vrot.lane.b32.xlu0 %v5178_v33, %s4091_s13 }
 0x52d   : > { %2317 = vrot.lane.b32.xlu1 %v2501_v0, %s4083_s17 }
 0x52f   : > { %2523 = vrot.lane.b32.xlu0 %v2502_v60, %s4087_s25 }
 0x531   : > { %2793 = vrot.lane.b32.xlu1 %v2501_v0, %s4091_s13 }
 0x533   : > { %2455 = vrot.lane.b32.xlu0 %v2502_v60, %s4088_s26 }
 0x535   : > { %2795 = vrot.lane.b32.xlu1 %v2502_v60, %s4091_s13 }
 0x537   : > { %2387 = vrot.lane.b32.xlu0 %v2502_v60, %s4089_s10 }
 0x539   : > { %2727 = vrot.lane.b32.xlu1 %v2502_v60, %s4092_s18 }
 0x53b   : > { %2863 = vrot.lane.b32.xlu0 %v2502_v60, %s4090_s12 }
 0x53d   : > { %2525 = vrot.lane.b32.xlu1 %v5206_v54, %s4087_s25 }
 0x53f   : > { %2319 = vrot.lane.b32.xlu0 %v2502_v60, %s4083_s17 }
 0x541   : > { %2719 = vrot.lane.b32.xlu1 %v5148_v20, %s4092_s18 }
 0x543   : > { %2723 = vrot.lane.b32.xlu0 %v5178_v33, %s4092_s18 }
 0x545   : > { %2457 = vrot.lane.b32.xlu1 %v5206_v54, %s4088_s26 }
 0x547   : > { %2797 = vrot.lane.b32.xlu0 %v5206_v54, %s4091_s13 }
 0x549   : > { %2389 = vrot.lane.b32.xlu1 %v5206_v54, %s4089_s10 }
 0x54b   : > { %2729 = vrot.lane.b32.xlu0 %v5206_v54, %s4092_s18 }
 0x54d   : > { %2865 = vrot.lane.b32.xlu1 %v5206_v54, %s4090_s12 }
 0x54f   : > { %2527 = vrot.lane.b32.xlu0 %v5225_v35, %s4087_s25  ;;  %s5606_s25 = scalar_lea.hbm %s5659_s8, %s3898_s22 }
 0x551   : > { %2725 = vrot.lane.b32.xlu1 %v2501_v0, %s4092_s18 }
 0x553   : > { %2721 = vrot.lane.b32.xlu0 %v5162_v38, %s4092_s18 }
 0x555   : > { %2321 = vrot.lane.b32.xlu1 %v5206_v54, %s4083_s17 }
 0x557   : > { %2459 = vrot.lane.b32.xlu0 %v5225_v35, %s4088_s26 }
 0x559   : > { %2659 = vrot.lane.b32.xlu1 %v2502_v60, %s5684_s20 }
 0x55b   : > { %2391 = vrot.lane.b32.xlu0 %v5225_v35, %s4089_s10  ;;  %s4094_s10 = smov [#allocation4]  }
 0x55d   : > { %2717 = vrot.lane.b32.xlu1 %v5116_v56, %s4092_s18 }
 0x55f   : > { %v2514_v16 = vpop.permute.xlu1 %2513  ;;  %2867 = vrot.lane.b32.xlu0 %v5225_v35, %s4090_s12  ;;  %s4017_s12 = sshll.u32 %s4094_s10, 4  ;;  %s4018_s12 = int_to_ptr.vmem [resolvable:$false] %s4017_s12 }
 0x560   : > { %v2529_v23 = vrot.slane %v2514_v16, 4 }
 0x561   : > { %2651 = vrot.lane.b32.xlu1 %v5148_v20, %s5684_s20 }
 0x563   : > { %v2446_v47 = vpop.permute.xlu1 %2445  ;;  %2323 = vrot.lane.b32.xlu0 %v5225_v35, %s4083_s17 }
 0x564   : > { %v2461_v18 = vrot.slane %v2446_v47, 4 }
 0x565   : > { %2657 = vrot.lane.b32.xlu1 %v2501_v0, %s5684_s20 }
 0x567   : > { %v2378_v12 = vpop.permute.xlu1 %2377  ;;  %2799 = vrot.lane.b32.xlu0 %v5225_v35, %s4091_s13  ;;  %s4019_s13 = scalar_lea.vmem %s4018_s12, 3072 }
 0x568   : > { %v2393_v53 = vrot.slane %v2378_v12, 4 }
 0x569   : > { %2591 = vrot.lane.b32.xlu1 %v2502_v60, %s4086_s24 }
 0x56b   : > { %v2854_v63 = vpop.permute.xlu1 %2853  ;;  %2655 = vrot.lane.b32.xlu0 %v5178_v33, %s5684_s20 }
 0x56c   : > { %v2869_v57 = vrot.slane %v2854_v63, 4 }
 0x56d   : > { %2649 = vrot.lane.b32.xlu1 %v5116_v56, %s5684_s20 }
 0x56f   : > { %v2310_v24 = vpop.permute.xlu1 %2309  ;;  %2731 = vrot.lane.b32.xlu0 %v5225_v35, %s4092_s18 }
 0x570   : > { %v2325_v30 = vrot.slane %v2310_v24, 4 }
 0x571   : > { %2583 = vrot.lane.b32.xlu1 %v5148_v20, %s4086_s24  ;;  %v2516_v36 = vpop.permute.xlu0 %2515  ;;  %v2986_v20 = vld [vmem:[%s5658_s7 + $0x8] sm:$0xff] }
 0x572   : > { %v2530_v7 = vrot.slane %v2516_v36, 4 }
 0x573   : > { %v2786_v26 = vpop.permute.xlu1 %2785  ;;  %2661 = vrot.lane.b32.xlu0 %v5206_v54, %s5684_s20 }
 0x574   : > { %v2537_v51 = vsel %vm494_vm8, %v2529_v23, %v2530_v7  ;;  %v2539_v8 = vsel %vm1156_vm2, %v2516_v36, %v2530_v7  ;;  %v2801_v46 = vrot.slane %v2786_v26, 4 }
 0x575   : > { %2589 = vrot.lane.b32.xlu1 %v2501_v0, %s4086_s24  ;;  %v5265_v58 = vsel %vm1156_vm2, %v2514_v16, %v2537_v51  ;;  %2558 = vst [vmem:[#allocation3 + $0x98] sm:$0xf] %v2539_v8  ;;  %v2448_v34 = vpop.permute.xlu0 %2447 }
 0x576   : > { %v2462_v5 = vrot.slane %v2448_v34, 4 }
 0x577   : > { %v2788_v19 = vpop.permute.xlu1 %2787  ;;  %2663 = vrot.lane.b32.xlu0 %v5225_v35, %s5684_s20 }
 0x578   : > { %v2802_v28 = vrot.slane %v2788_v19, 4  ;;  %v2469_v62 = vsel %vm494_vm8, %v2461_v18, %v2462_v5  ;;  %v2471_v13 = vsel %vm1087_vm7, %v2448_v34, %v2462_v5 }
 0x579   : > { %2581 = vrot.lane.b32.xlu1 %v5116_v56, %s4086_s24  ;;  %v5274_v25 = vsel %vm1087_vm7, %v2446_v47, %v2469_v62  ;;  %2490 = vst [vmem:[#allocation3 + $0x68] sm:$0xf] %v2471_v13  ;;  %v2380_v9 = vpop.permute.xlu0 %2379  ;;  %v2988_v47 = vld [vmem:[%s5658_s7 + $0x18] sm:$0xff] }
 0x57a   : > { %v2809_v32 = vsel %vm494_vm8, %v2801_v46, %v2802_v28  ;;  %v2811_v10 = vsel %vm1431_vm11, %v2788_v19, %v2802_v28  ;;  %v2394_v55 = vrot.slane %v2380_v9, 4 }
 0x57b   : > { %v5282_v3 = vsel %vm1431_vm11, %v2786_v26, %v2809_v32  ;;  %2830 = vst [vmem:[#allocation3 + $0x158] sm:$0xf] %v2811_v10  ;;  %v2518_v39 = vpop.permute.xlu1 %2517  ;;  %2653 = vrot.lane.b32.xlu0 %v5162_v38, %s5684_s20 }
 0x57c   : > { %v2401_v17 = vsel %vm494_vm8, %v2393_v53, %v2394_v55  ;;  %v2403_v50 = vsel %vm1018_vm9, %v2380_v9, %v2394_v55  ;;  %v2531_v1 = vrot.slane %v2518_v39, 4 }
 0x57d   : > { %2991 = vperm.xlu1 %3960, %v2985_v29   ;;  %v5289_v15 = vsel %vm1018_vm9, %v2378_v12, %v2401_v17  ;;  %2422 = vst [vmem:[#allocation3 + $0x38] sm:$0xf] %v2403_v50  ;;  %v2856_v45 = vpop.permute.xlu0 %2855 }
 0x57e   : > { %v2870_v56 = vrot.slane %v2856_v45, 4 }
 0x57f   : > { %v2450_v52 = vpop.permute.xlu1 %2449  ;;  %2595 = vrot.lane.b32.xlu0 %v5225_v35, %s4086_s24 }
 0x580   : > { %v2877_v4 = vsel %vm494_vm8, %v2869_v57, %v2870_v56  ;;  %v2879_v42 = vsel %vm1500_vm10, %v2856_v45, %v2870_v56  ;;  %v2463_v60 = vrot.slane %v2450_v52, 4 }
 0x581   : > { %3001 = vperm.xlu1 %3960, %v2987_v41   ;;  %v5299_v43 = vsel %vm1500_vm10, %v2854_v63, %v2877_v4  ;;  %2898 = vst [vmem:[#allocation3 + $0x188] sm:$0xf] %v2879_v42  ;;  %v2312_v21 = vpop.permute.xlu0 %2311 }
 0x582   : > { %v2326_v27 = vrot.slane %v2312_v21, 4 }
 0x583   : > { %v2382_v59 = vpop.permute.xlu1 %2381  ;;  %2587 = vrot.lane.b32.xlu0 %v5178_v33, %s4086_s24 }
 0x584   : > { %v2333_v31 = vsel %vm494_vm8, %v2325_v30, %v2326_v27  ;;  %v2335_v40 = vsel %vm570_vm0, %v2312_v21, %v2326_v27 }
 0x585   : > { %v5311_v48 = vsel %vm570_vm0, %v2310_v24, %v2333_v31  ;;  %2354 = vst [vmem:[#allocation3 + $0x8] sm:$0xf] %v2335_v40  ;;  %v2790_v44 = vpop.permute.xlu0 %2789  ;;  %v2395_v24 = vrot.slane %v2382_v59, 4 }
 0x586   : > { %v2803_v41 = vrot.slane %v2790_v44, 4 }
 0x587   : > { %v2858_v61 = vpop.permute.xlu1 %2857  ;;  %2593 = vrot.lane.b32.xlu0 %v5206_v54, %s4086_s24 }
 0x588   : > { %v2871_v18 = vrot.slane %v2858_v61, 4 }
 0x589   : > { %v2520_v22 = vpop.permute.xlu0 %2519 }
 0x58a   : > { %v2532_v14 = vrot.slane %v2520_v22, 4 }
 0x58b   : > { %v2314_v37 = vpop.permute.xlu1 %2313  ;;  %2585 = vrot.lane.b32.xlu0 %v5162_v38, %s4086_s24  ;;  %s3897_s24 = smul.u32 96, %s294_s19 }
 0x58c   : > { %v2540_v49 = vsel %vm494_vm8, %v2531_v1, %v2532_v14  ;;  %v2542_v6 = vsel %vm1156_vm2, %v2520_v22, %v2532_v14  ;;  %v2327_v10 = vrot.slane %v2314_v37, 4 }
 0x58d   : > { %v5324_v33 = vsel %vm1156_vm2, %v2518_v39, %v2540_v49  ;;  %2560 = vst [vmem:[#allocation3 + $0xa4] sm:$0xf] %v2542_v6  ;;  %v2452_v0 = vpop.permute.xlu0 %2451  ;;  %s5586_s21 = scalar_lea.vmem [#allocation4], %s3897_s24 }
 0x58e   : > { %v2464_v54 = vrot.slane %v2452_v0, 4  ;;  %s3563_s23 = sshll.u32 %s5586_s21, 4  ;;  %s5600_s23 = int_to_ptr.vmem [resolvable:$true] %s3563_s23 }
 0x58f   : > { %v2522_v35 = vpop.permute.xlu1 %2521  ;;  %2996 = vperm.xlu0 %3959, %v2986_v20   ;;  %s4013_s26 = scalar_lea.vmem %s5600_s23, 1536  ;;  %p4020_p0 = scmp.lt.s32.totalorder %s5600_s23, %s4018_s12 }
 0x590   : > { %v2472_v16 = vsel %vm494_vm8, %v2463_v60, %v2464_v54  ;;  %v2474_v38 = vsel %vm1087_vm7, %v2452_v0, %v2464_v54  ;;  %p4014_p11 = scmp.ne.s32.totalorder %s5600_s23, %s4013_s26  ;;  %p4021_p1 = scmp.lt.s32.totalorder %s4019_s13, %s4013_s26 }
 0x591   : > { %v5332_v12 = vsel %vm1087_vm7, %v2450_v52, %v2472_v16  ;;  %2492 = vst [vmem:[#allocation3 + $0x74] sm:$0xf] %v2474_v38  ;;  %v2384_v63 = vpop.permute.xlu0 %2383 }
 0x592   : > { %v2396_v36 = vrot.slane %v2384_v63, 4  ;;  %v3736_v7 = vcombine.low %v5274_v25, %v5332_v12  ;;  %p4015_p12 = pnand %p4014_p11, %p4180_p5  ;;  %p4022_p2 = por %p4021_p1, %p4020_p0 }
 0x593   : > { %v2454_v23 = vpop.permute.xlu1 %2453  ;;  %3006 = vperm.xlu0 %3959, %v2988_v47  }
 0x594   : > { %v2404_v26 = vsel %vm494_vm8, %v2395_v24, %v2396_v36  ;;  %v2406_v51 = vsel %vm1018_vm9, %v2384_v63, %v2396_v36  ;;  %v2465_v49 = vrot.slane %v2454_v23, 4  ;;  %p4016_p13 = pneg %p4015_p12 }
 0x595   : > { %v5339_v8 = vsel %vm1018_vm9, %v2382_v59, %v2404_v26  ;;  %2424 = vst [vmem:[#allocation3 + $0x44] sm:$0xf] %v2406_v51  ;;  %v2860_v34 = vpop.permute.xlu0 %2859  ;;  %v2533_v59 = vrot.slane %v2522_v35, 4 }
 0x596   : > { %v2872_v5 = vrot.slane %v2860_v34, 4  ;;  %v3730_v46 = vcombine.low %v5289_v15, %v5339_v8  ;;  %v3731_v28 = vcombine.high %v5289_v15, %v5339_v8  ;;  %p4023_p3 = pnand %p4022_p2, %p4016_p13 }
 0x597   : > { %v2386_v19 = vpop.permute.xlu1 %2385 }
 0x598   : > { %v2880_v62 = vsel %vm494_vm8, %v2871_v18, %v2872_v5  ;;  %v2882_v13 = vsel %vm1500_vm10, %v2860_v34, %v2872_v5  ;;  %v2397_v24 = vrot.slane %v2386_v19, 4 }
 0x599   : > { %v5348_v9 = vsel %vm1500_vm10, %v2858_v61, %v2880_v62  ;;  %2900 = vst [vmem:[#allocation3 + $0x194] sm:$0xf] %v2882_v13  ;;  %v2316_v32 = vpop.permute.xlu0 %2315 }
 0x59a   : > { %v2328_v29 = vrot.slane %v2316_v32, 4  ;;  %v3772_v55 = vcombine.low %v5299_v43, %v5348_v9 }
 0x59b   : > { %v2862_v53 = vpop.permute.xlu1 %2861 }
 0x59c   : > { %v2336_v39 = vsel %vm494_vm8, %v2327_v10, %v2328_v29  ;;  %v2338_v17 = vsel %vm570_vm0, %v2316_v32, %v2328_v29  ;;  %v2873_v32 = vrot.slane %v2862_v53, 4 }
 0x59d   : > { %v5355_v50 = vsel %vm570_vm0, %v2314_v37, %v2336_v39  ;;  %2356 = vst [vmem:[#allocation3 + $0x14] sm:$0xf] %v2338_v17  ;;  %v2792_v45 = vpop.permute.xlu0 %2791 }
 0x59e   : > { %v2804_v57 = vrot.slane %v2792_v45, 4  ;;  %v3724_v52 = vcombine.low %v5311_v48, %v5355_v50  ;;  %v3725_v4 = vcombine.high %v5311_v48, %v5355_v50 }
 0x59f   : > { %v2318_v56 = vpop.permute.xlu1 %2317 }
 0x5a0   : > { %v2812_v42 = vsel %vm494_vm8, %v2803_v41, %v2804_v57  ;;  %v2814_v21 = vsel %vm1431_vm11, %v2792_v45, %v2804_v57  ;;  %v2329_v57 = vrot.slane %v2318_v56, 4 }
 0x5a1   : > { %v5364_v30 = vsel %vm1431_vm11, %v2790_v44, %v2812_v42  ;;  %2832 = vst [vmem:[#allocation3 + $0x164] sm:$0xf] %v2814_v21  ;;  %v2524_v27 = vpop.permute.xlu0 %2523 }
 0x5a2   : > { %v2534_v31 = vrot.slane %v2524_v27, 4  ;;  %v3766_v61 = vcombine.low %v5282_v3, %v5364_v30  ;;  %v3767_v22 = vcombine.high %v5282_v3, %v5364_v30 }
 0x5a3   : > { %v2794_v40 = vpop.permute.xlu1 %2793 }
 0x5a4   : > { %v2543_v1 = vsel %vm494_vm8, %v2533_v59, %v2534_v31  ;;  %v2545_v14 = vsel %vm1156_vm2, %v2524_v27, %v2534_v31  ;;  %v2805_v0 = vrot.slane %v2794_v40, 4 }
 0x5a5   : > { %v5373_v37 = vsel %vm1156_vm2, %v2522_v35, %v2543_v1  ;;  %2562 = vst [vmem:[#allocation3 + $0xb0] sm:$0xf] %v2545_v14  ;;  %v2456_v44 = vpop.permute.xlu0 %2455 }
 0x5a6   : > { %v2466_v6 = vrot.slane %v2456_v44, 4 }
 0x5a7   : > { %v2796_v20 = vpop.permute.xlu1 %2795 }
 0x5a8   : > { %v2806_v60 = vrot.slane %v2796_v20, 4  ;;  %v2475_v54 = vsel %vm494_vm8, %v2465_v49, %v2466_v6  ;;  %v2477_v16 = vsel %vm1087_vm7, %v2456_v44, %v2466_v6 }
 0x5a9   : > { %v5378_v38 = vsel %vm1087_vm7, %v2454_v23, %v2475_v54  ;;  %2494 = vst [vmem:[#allocation3 + $0x80] sm:$0xf] %v2477_v16  ;;  %v2388_v47 = vpop.permute.xlu0 %2387 }
 0x5aa   : > { %v2815_v63 = vsel %vm494_vm8, %v2805_v0, %v2806_v60  ;;  %v2817_v35 = vsel %vm1431_vm11, %v2796_v20, %v2806_v60  ;;  %v2398_v36 = vrot.slane %v2388_v47, 4 }
 0x5ab   : > { %v5383_v26 = vsel %vm1431_vm11, %v2794_v40, %v2815_v63  ;;  %2834 = vst [vmem:[#allocation3 + $0x170] sm:$0xf] %v2817_v35  ;;  %v2728_v51 = vpop.permute.xlu1 %2727 }
 0x5ac   : > { %v2738_v34 = vrot.slane %v2728_v51, 4  ;;  %v2407_v18 = vsel %vm494_vm8, %v2397_v24, %v2398_v36  ;;  %v2409_v5 = vsel %vm1018_vm9, %v2388_v47, %v2398_v36 }
 0x5ad   : > { %v5388_v23 = vsel %vm1018_vm9, %v2386_v19, %v2407_v18  ;;  %2426 = vst [vmem:[#allocation3 + $0x50] sm:$0xf] %v2409_v5  ;;  %v2864_v62 = vpop.permute.xlu0 %2863 }
 0x5ae   : > { %v2749_v13 = vsel %vm1362_vm12, %v2728_v51, %v2738_v34  ;;  %v2874_v10 = vrot.slane %v2864_v62, 4 }
 0x5af   : > { %2766 = vst [vmem:[#allocation3 + $0x140] sm:$0xf] %v2749_v13  ;;  %v2526_v29 = vpop.permute.xlu1 %2525 }
 0x5b0   : > { %v2883_v39 = vsel %vm494_vm8, %v2873_v32, %v2874_v10  ;;  %v2885_v17 = vsel %vm1500_vm10, %v2864_v62, %v2874_v10  ;;  %v2535_v60 = vrot.slane %v2526_v29, 4 }
 0x5b1   : > { %v5394_v45 = vsel %vm1500_vm10, %v2862_v53, %v2883_v39  ;;  %2902 = vst [vmem:[#allocation3 + $0x1a0] sm:$0xf] %v2885_v17  ;;  %v2320_v41 = vpop.permute.xlu0 %2319 }
 0x5b2   : > { %v2330_v19 = vrot.slane %v2320_v41, 4 }
 0x5b3   : > { %v5396_v42 = vpop.permute.xlu1 %2719 }
 0x5b4   : > { %v2734_v21 = vrot.slane %v5396_v42, 4  ;;  %v2339_v27 = vsel %vm494_vm8, %v2329_v57, %v2330_v19  ;;  %v2341_v59 = vsel %vm570_vm0, %v2320_v41, %v2330_v19 }
 0x5b5   : > { %v5402_v31 = vsel %vm570_vm0, %v2318_v56, %v2339_v27  ;;  %2358 = vst [vmem:[#allocation3 + $0x20] sm:$0xf] %v2341_v59  ;;  %v2724_v40 = vpop.permute.xlu0 %2723  ;;  %v3742_v27 = vcombine.low %v5265_v58, %v5324_v33 }
 0x5b6   : > { %v2743_v53 = vsel %vm1362_vm12, %v5396_v42, %v2734_v21  ;;  %v2736_v1 = vrot.slane %v2724_v40, 4 }
 0x5b7   : > { %2762 = vst [vmem:[#allocation3 + $0x128] sm:$0xf] %v2743_v53  ;;  %v2458_v14 = vpop.permute.xlu1 %2457 }
 0x5b8   : > { %v2746_v44 = vsel %vm1362_vm12, %v2724_v40, %v2736_v1  ;;  %v2467_v17 = vrot.slane %v2458_v14, 4 }
 0x5b9   : > { %2764 = vst [vmem:[#allocation3 + $0x134] sm:$0xf] %v2746_v44  ;;  %v5409_v49 = vpop.permute.xlu0 %2797 }
 0x5bb   : > { %v2390_v6 = vpop.permute.xlu1 %2389 }
 0x5bc   : > { %v2399_v44 = vrot.slane %v2390_v6, 4 }
 0x5bd   : > { %v5411_v20 = vpop.permute.xlu0 %2729 }
 0x5be   : > { %v2739_v8 = vrot.slane %v5411_v20, 4 }
 0x5bf   : > { %v2866_v56 = vpop.permute.xlu1 %2865 }
 0x5c1   : > { %v2528_v0 = vpop.permute.xlu0 %2527 }
 0x5c2   : > { %v2536_v54 = vrot.slane %v2528_v0, 4 }
 0x5c3   : > { %v2726_v16 = vpop.permute.xlu1 %2725 }
 0x5c4   : > { %v2737_v47 = vrot.slane %v2726_v16, 4  ;;  %v2546_v63 = vsel %vm494_vm8, %v2535_v60, %v2536_v54  ;;  %v2548_v35 = vsel %vm1156_vm2, %v2528_v0, %v2536_v54 }
 0x5c5   : > { %v2547_v24 = vsel %vm1156_vm2, %v2526_v29, %v2546_v63  ;;  %2564 = vst [vmem:[#allocation3 + $0xbc] sm:$0xf] %v2548_v35  ;;  %v2722_v36 = vpop.permute.xlu0 %2721  ;;  %v3743_v29 = vcombine.high %v5265_v58, %v5324_v33 }
 0x5c6   : > { %v2747_v51 = vsel %vm494_vm8, %v2737_v47, %v2738_v34  ;;  %v2735_v18 = vrot.slane %v2722_v36, 4  ;;  %v3745_v13 = vcombine.low %v5373_v37, %v2547_v24  ;;  %v3746_v32 = vcombine.high %v5373_v37, %v2547_v24 }
 0x5c7   : > { %v5418_v5 = vsel %vm1362_vm12, %v2726_v16, %v2747_v51  ;;  %v5420_v62 = vpop.permute.xlu1 %2321 }
 0x5c8   : > { %v2744_v10 = vsel %vm494_vm8, %v2735_v18, %v2736_v1  ;;  %3333 = vmatprep.subr.bf16.mxu1 %v3746_v32 }
 0x5c9   : > { %v5428_v39 = vsel %vm1362_vm12, %v2722_v36, %v2744_v10  ;;  %v2460_v34 = vpop.permute.xlu0 %2459  ;;  %3334 = vmatpush1.bf16.msra.mxu1 %v3745_v13  ;;  %v2875_v36 = vrot.slane %v2866_v56, 4 }
 0x5ca   : > { %v2468_v41 = vrot.slane %v2460_v34, 4  ;;  %3335 = vmatprep.subr.bf16.mxu1 %v3743_v29 }
 0x5cb   : > { %v2660_v57 = vpop.permute.xlu1 %2659 }
 0x5cc   : > { %v2670_v19 = vrot.slane %v2660_v57, 4  ;;  %v2478_v37 = vsel %vm494_vm8, %v2467_v17, %v2468_v41  ;;  %v2480_v59 = vsel %vm1087_vm7, %v2460_v34, %v2468_v41  ;;  %v2331_v34 = vrot.slane %v5420_v62, 4 }
 0x5cd   : > { %v2479_v40 = vsel %vm1087_vm7, %v2458_v14, %v2478_v37  ;;  %2496 = vst [vmem:[#allocation3 + $0x8c] sm:$0xf] %v2480_v59  ;;  %v2392_v53 = vpop.permute.xlu0 %2391  ;;  %3336 = vmatpush1.bf16.msra.mxu1 %v3742_v27  ;;  %v3737_v14 = vcombine.high %v5274_v25, %v5332_v12  ;;  %v3773_v25 = vcombine.high %v5299_v43, %v5348_v9 }
 0x5ce   : > { %v2681_v1 = vsel %vm1293_vm13, %v2660_v57, %v2670_v19  ;;  %v2400_v0 = vrot.slane %v2392_v53, 4  ;;  %v3739_v54 = vcombine.low %v5378_v38, %v2479_v40  ;;  %v3740_v16 = vcombine.high %v5378_v38, %v2479_v40 }
 0x5cf   : > { %2698 = vst [vmem:[#allocation3 + $0x110] sm:$0xf] %v2681_v1  ;;  %v2718_v60 = vpop.permute.xlu1 %2717 }
 0x5d0   : > { %v2733_v58 = vrot.slane %v2718_v60, 4  ;;  %v2410_v33 = vsel %vm494_vm8, %v2399_v44, %v2400_v0  ;;  %v2412_v47 = vsel %vm1018_vm9, %v2392_v53, %v2400_v0  ;;  %3337 = vmatprep.subr.bf16.mxu1 %v3740_v16 }
 0x5d1   : > { %v2411_v63 = vsel %vm1018_vm9, %v2390_v6, %v2410_v33  ;;  %2428 = vst [vmem:[#allocation3 + $0x5c] sm:$0xf] %v2412_v47  ;;  %v2868_v35 = vpop.permute.xlu0 %2867  ;;  %3338 = vmatpush1.bf16.msra.mxu1 %v3739_v54  ;;  %v5481_v54 = vld [vmem:[%s5657_s6 + $0x8] ss:$12 sps:$4 sm:$0xff]  }
 0x5d2   : > { %v2741_v24 = vsel %vm494_vm8, %v2733_v58, %v2734_v21  ;;  %v2876_v38 = vrot.slane %v2868_v35, 4  ;;  %3339 = vmatprep.subr.bf16.mxu1 %v3737_v14  ;;  %v3734_v6 = vcombine.high %v5388_v23, %v2411_v63 }
 0x5d3   : > { %v5447_v51 = vsel %vm1362_vm12, %v2718_v60, %v2741_v24  ;;  %v2652_v18 = vpop.permute.xlu1 %2651 }
 0x5d4   : > { %v2666_v13 = vrot.slane %v2652_v18, 4  ;;  %v2886_v32 = vsel %vm494_vm8, %v2875_v36, %v2876_v38  ;;  %v2888_v10 = vsel %vm1500_vm10, %v2868_v35, %v2876_v38 }
 0x5d5   : > { %v2887_v29 = vsel %vm1500_vm10, %v2866_v56, %v2886_v32  ;;  %2904 = vst [vmem:[#allocation3 + $0x1ac] sm:$0xf] %v2888_v10  ;;  %v2324_v42 = vpop.permute.xlu0 %2323  ;;  %3340 = vmatpush1.bf16.msra.mxu1 %v3736_v7  ;;  %v3733_v56 = vcombine.low %v5388_v23, %v2411_v63  ;;  %v3989_v32 = vld [vmem:[#allocation3 + $0xb0] ss:$12 sps:$4 sm:$0xff]   ;;  %v3990_v10 = vld [vmem:[#allocation3 + $0x158] ss:$12 sps:$4 sm:$0xff]  }
 0x5d6   : > { %v2675_v21 = vsel %vm1293_vm13, %v2652_v18, %v2666_v13  ;;  %v2332_v17 = vrot.slane %v2324_v42, 4  ;;  %3341 = vmatprep.subr.bf16.mxu1 %v3734_v6  ;;  %v3775_v57 = vcombine.low %v5394_v45, %v2887_v29  ;;  %v3776_v27 = vcombine.high %v5394_v45, %v2887_v29 }
 0x5d7   : > { %2694 = vst [vmem:[#allocation3 + $0xf8] sm:$0xf] %v2675_v21  ;;  %v2658_v41 = vpop.permute.xlu1 %2657  ;;  %v2807_v45 = vrot.slane %v5409_v49, 4 }
 0x5d8   : > { %v2669_v37 = vrot.slane %v2658_v41, 4  ;;  %v2342_v59 = vsel %vm494_vm8, %v2331_v34, %v2332_v17  ;;  %v2344_v40 = vsel %vm570_vm0, %v2324_v42, %v2332_v17  ;;  %3398 = vmatprep.subr.bf16.mxu0 %v3776_v27  ;;  %v3991_v34 = vld [vmem:[#allocation3 + $0x98] ss:$12 sps:$4 sm:$0xff]  }
 0x5d9   : > { %v2343_v12 = vsel %vm570_vm0, %v5420_v62, %v2342_v59  ;;  %2360 = vst [vmem:[#allocation3 + $0x2c] sm:$0xf] %v2344_v40  ;;  %v2800_v7 = vpop.permute.xlu0 %2799  ;;  %3342 = vmatpush1.bf16.msra.mxu1 %v3733_v56  ;;  %3399 = vmatpush1.bf16.msra.mxu0 %v3775_v57  ;;  %vm5685_vm0 = vcmask 261120   ;;  %v3993_v40 = vld [vmem:[#allocation3 + $0x80] ss:$12 sps:$4 sm:$0xff]  }
 0x5da   : > { %v2679_v53 = vsel %vm494_vm8, %v2669_v37, %v2670_v19  ;;  %v2808_v23 = vrot.slane %v2800_v7, 4  ;;  %3343 = vmatprep.subr.bf16.mxu1 %v3731_v28  ;;  %3400 = vmatprep.subr.bf16.mxu0 %v3773_v25  ;;  %v3728_v19 = vcombine.high %v5402_v31, %v2343_v12  ;;  %vm5686_vm4 = vmmov %vm5685_vm0 }
 0x5db   : > { %v5470_v1 = vsel %vm1293_vm13, %v2658_v41, %v2679_v53  ;;  %v2592_v44 = vpop.permute.xlu1 %2591 }
 0x5dc   : > { %v2602_v0 = vrot.slane %v2592_v44, 4  ;;  %v2818_v62 = vsel %vm494_vm8, %v2807_v45, %v2808_v23  ;;  %v2820_v60 = vsel %vm1431_vm11, %v2800_v7, %v2808_v23  ;;  %v3761_v45 = vcombine.high %v5447_v51, %v5428_v39 }
 0x5dd   : > { %v2819_v16 = vsel %vm1431_vm11, %v5409_v49, %v2818_v62  ;;  %2836 = vst [vmem:[#allocation3 + $0x17c] sm:$0xf] %v2820_v60  ;;  %v5485_v58 = vpop.permute.xlu0 %2655  ;;  %3344 = vmatpush1.bf16.msra.mxu1 %v3730_v46  ;;  %3401 = vmatpush1.bf16.msra.mxu0 %v3772_v55  ;;  %v3727_v49 = vcombine.low %v5402_v31, %v2343_v12  ;;  %v3994_v12 = vld [vmem:[#allocation3 + $0x128] ss:$12 sps:$4 sm:$0xff]  }
 0x5de   : > { %v2613_v28 = vsel %vm874_vm3, %v2592_v44, %v2602_v0  ;;  %v2668_v33 = vrot.slane %v5485_v58, 4  ;;  %3345 = vmatprep.subr.bf16.mxu1 %v3728_v19  ;;  %v3770_v38 = vcombine.high %v5383_v26, %v2819_v16  ;;  %v3769_v42 = vcombine.low %v5383_v26, %v2819_v16  ;;  %v3997_v19 = vld [vmem:[#allocation3 + $0x50] ss:$12 sps:$4 sm:$0xff]  }
 0x5df   : > { %2630 = vst [vmem:[#allocation3 + $0xe0] sm:$0xf] %v2613_v28  ;;  %v2650_v47 = vpop.permute.xlu1 %2649  ;;  %v3760_v44 = vcombine.low %v5447_v51, %v5428_v39 }
 0x5e0   : > { %v2665_v14 = vrot.slane %v2650_v47, 4  ;;  %v2678_v63 = vsel %vm1293_vm13, %v5485_v58, %v2668_v33  ;;  %3778 = vmatmul.mubr.msk.bf16.vlgmr.msra.gmra.mxu0 %vm5685_vm0, %v5481_v54 }
 0x5e1   : > { %2696 = vst [vmem:[#allocation3 + $0x104] sm:$0xf] %v2678_v63  ;;  %v2732_v15 = vpop.permute.xlu0 %2731  ;;  %3346 = vmatpush1.bf16.msra.mxu1 %v3727_v49  ;;  %3428 = vmatprep.mubr.bf16.mxu0 %v5679_v11  ;;  %v5517_v11 = vld [vmem:[%s5657_s6 + $0x20] ss:$12 sps:$4 sm:$0xff]  }
 0x5e2   : > { %v2673_v43 = vsel %vm494_vm8, %v2665_v14, %v2666_v13  ;;  %v2740_v46 = vrot.slane %v2732_v15, 4  ;;  %3347 = vmatprep.subr.bf16.mxu1 %v3725_v4 }
 0x5e3   : > { %v5506_v9 = vsel %vm1293_vm13, %v2650_v47, %v2673_v43  ;;  %v2584_v55 = vpop.permute.xlu1 %2583  ;;  %v3999_v47 = vld [vmem:[#allocation3 + $0x38] ss:$12 sps:$4 sm:$0xff]  }
 0x5e4   : > { %v2598_v31 = vrot.slane %v2584_v55, 4  ;;  %v2750_v35 = vsel %vm494_vm8, %v2739_v8, %v2740_v46  ;;  %v2752_v24 = vsel %vm1362_vm12, %v2732_v15, %v2740_v46  ;;  %v3987_v36 = vld [vmem:[#allocation3 + $0x170] ss:$12 sps:$4 sm:$0xff]   ;;  %v4002_v8 = vld [vmem:[#allocation3 + $0x20] ss:$12 sps:$4 sm:$0xff]  }
 0x5e5   : > { %v2751_v18 = vsel %vm1362_vm12, %v5411_v20, %v2750_v35  ;;  %2768 = vst [vmem:[#allocation3 + $0x14c] sm:$0xf] %v2752_v24  ;;  %v2662_v13 = vpop.permute.xlu0 %2661  ;;  %3348 = vmatpush1.bf16.msra.mxu1 %v3724_v52  ;;  %3839 = vmatprep.subr.bf16.mxu0 %v3987_v36  ;;  %v4004_v36 = vld [vmem:[#allocation3 + $0x8] ss:$12 sps:$4 sm:$0xff]  }
 0x5e6   : > { %v2607_v4 = vsel %vm874_vm3, %v2584_v55, %v2598_v31  ;;  %3349 = vmatprep.subr.bf16.mxu1 %v3770_v38  ;;  %3840 = vmatpush3.bf16.msra.mxu0 %v3989_v32  ;;  %v2671_v48 = vrot.slane %v2662_v13, 4  ;;  %v3764_v37 = vcombine.high %v5418_v5, %v2751_v18  ;;  %v3763_v7 = vcombine.low %v5418_v5, %v2751_v18  ;;  %v4005_v38 = vld [vmem:[#allocation3 + $0x1a0] ss:$12 sps:$4 sm:$0xff]   ;;  %v4010_v32 = vld [vmem:[%s5657_s6 + $0x1c] ss:$12 sps:$4 sm:$0xff]  }
 0x5e7   : > { %2626 = vst [vmem:[#allocation3 + $0xc8] sm:$0xf] %v2607_v4  ;;  %v2590_v6 = vpop.permute.xlu1 %2589  ;;  %3841 = vmatprep.subr.bf16.mxu0 %v3990_v10  ;;  %v4006_v18 = vld [vmem:[%s5657_s6] ss:$12 sps:$4 sm:$0xff]   ;;  %v4009_v10 = vld [vmem:[#allocation3 + $0x188] ss:$12 sps:$4 sm:$0xff]  }
 0x5e8   : > { %v2601_v29 = vrot.slane %v2590_v6, 4  ;;  %3779 = vmatmul.mubr.msk.bf16.gmra.mxu0 %vm5686_vm4, %v5517_v11  ;;  %v3998_v58 = vld [vmem:[#allocation3 + $0xf8] ss:$12 sps:$4 sm:$0xff]  }
 0x5e9   : > { %v2664_v20 = vpop.permute.xlu0 %2663  ;;  %3350 = vmatpush2.bf16.msra.mxu1 %v3769_v42  ;;  %3471 = vmatprep.mubr.bf16.mxu0 %v5308_v2 }
 0x5ea   : > { %v2611_v21 = vsel %vm494_vm8, %v2601_v29, %v2602_v0  ;;  %v2672_v50 = vrot.slane %v2664_v20, 4  ;;  %3351 = vmatprep.subr.bf16.mxu1 %v3767_v22  ;;  %3842 = vmatpush3.bf16.msra.mxu0 %v3991_v34 }
 0x5eb   : > { %v5531_v52 = vsel %vm874_vm3, %v2590_v6, %v2611_v21  ;;  %v2582_v17 = vpop.permute.xlu1 %2581  ;;  %v4012_v6 = vld [vmem:[%s5657_s6 + $0x18] ss:$12 sps:$4 sm:$0xff]  }
 0x5ec   : > { %v2597_v26 = vrot.slane %v2582_v17, 4  ;;  %v2682_v41 = vsel %vm494_vm8, %v2671_v48, %v2672_v50  ;;  %v2684_v57 = vsel %vm1293_vm13, %v2664_v20, %v2672_v50  ;;  %v3992_v27 = vld [vmem:[#allocation3 + $0x140] ss:$12 sps:$4 sm:$0xff]  }
 0x5ed   : > { %v2683_v2 = vsel %vm1293_vm13, %v2662_v13, %v2682_v41  ;;  %2700 = vst [vmem:[#allocation3 + $0x11c] sm:$0xf] %v2684_v57  ;;  %v2654_v56 = vpop.permute.xlu0 %2653  ;;  %3352 = vmatpush2.bf16.msra.mxu1 %v3766_v61  ;;  %3843 = vmatprep.subr.bf16.mxu0 %v3992_v27  ;;  %v3995_v61 = vld [vmem:[#allocation3 + $0x68] ss:$12 sps:$4 sm:$0xff]  }
 0x5ee   : > { %v2605_v59 = vsel %vm494_vm8, %v2597_v26, %v2598_v31  ;;  %v2667_v22 = vrot.slane %v2654_v56, 4  ;;  %3353 = vmatprep.subr.bf16.mxu1 %v3764_v37  ;;  %3844 = vmatpush3.bf16.msra.mxu0 %v3993_v40  ;;  %v3758_v62 = vcombine.high %v5470_v1, %v2683_v2  ;;  %v3757_v28 = vcombine.low %v5470_v1, %v2683_v2 }
 0x5ef   : > { %v5545_v25 = vsel %vm874_vm3, %v2582_v17, %v2605_v59  ;;  %3845 = vmatprep.subr.bf16.mxu0 %v3994_v12 }
 0x5f0   : > { %v2676_v53 = vsel %vm494_vm8, %v2667_v22, %v2668_v33 }
 0x5f1   : > { %v2677_v3 = vsel %vm1293_vm13, %v2654_v56, %v2676_v53  ;;  %v2596_v30 = vpop.permute.xlu0 %2595  ;;  %3354 = vmatpush2.bf16.msra.mxu1 %v3763_v7 }
 0x5f2   : > { %v2604_v23 = vrot.slane %v2596_v30, 4  ;;  %3355 = vmatprep.subr.bf16.mxu1 %v3761_v45  ;;  %3846 = vmatpush3.bf16.msra.mxu0 %v3995_v61  ;;  %v3755_v39 = vcombine.high %v5506_v9, %v2677_v3  ;;  %v3754_v49 = vcombine.low %v5506_v9, %v2677_v3 }
 0x5f4   : > { %v2616_v5 = vsel %vm874_vm3, %v2596_v30, %v2604_v23  ;;  %v3996_v0 = vld [vmem:[#allocation3 + $0x110] ss:$12 sps:$4 sm:$0xff]  }
 0x5f5   : > { %2632 = vst [vmem:[#allocation3 + $0xec] sm:$0xf] %v2616_v5  ;;  %v2588_v60 = vpop.permute.xlu0 %2587  ;;  %3356 = vmatpush2.bf16.msra.mxu1 %v3760_v44  ;;  %3847 = vmatprep.subr.bf16.mxu0 %v3996_v0 }
 0x5f6   : > { %v2600_v16 = vrot.slane %v2588_v60, 4  ;;  %3357 = vmatprep.subr.bf16.mxu1 %v3758_v62  ;;  %3848 = vmatpush3.bf16.msra.mxu0 %v3997_v19 }
 0x5f7   : > { %3849 = vmatprep.subr.bf16.mxu0 %v3998_v58 }
 0x5f8   : > { %v2610_v33 = vsel %vm874_vm3, %v2588_v60, %v2600_v16  ;;  %v2992_v26 = vpop.permute.xlu1 %2991 }
 0x5f9   : > { %2628 = vst [vmem:[#allocation3 + $0xd4] sm:$0xf] %v2610_v33  ;;  %v2594_v51 = vpop.permute.xlu0 %2593  ;;  %3358 = vmatpush2.bf16.msra.mxu1 %v3757_v28 }
 0x5fa   : > { %v2603_v14 = vrot.slane %v2594_v51, 4  ;;  %3359 = vmatprep.subr.bf16.mxu1 %v3755_v39  ;;  %3850 = vmatpush3.bf16.msra.mxu0 %v3999_v47 }
 0x5fc   : > { %v2614_v63 = vsel %vm494_vm8, %v2603_v14, %v2604_v23  ;;  %v4000_v15 = vld [vmem:[#allocation3 + $0xe0] ss:$12 sps:$4 sm:$0xff]   ;;  %v3002_v53 = vpop.permute.xlu1 %3001 }
 0x5fd   : > { %v2615_v43 = vsel %vm874_vm3, %v2594_v51, %v2614_v63  ;;  %v2586_v1 = vpop.permute.xlu0 %2585  ;;  %3360 = vmatpush2.bf16.msra.mxu1 %v3754_v49  ;;  %3851 = vmatprep.subr.bf16.mxu0 %v4000_v15 }
 0x5fe   : > { %v2599_v46 = vrot.slane %v2586_v1, 4  ;;  %v3751_v55 = vcombine.low %v5531_v52, %v2615_v43  ;;  %v3752_v31 = vcombine.high %v5531_v52, %v2615_v43  ;;  %3852 = vmatpush3.bf16.msra.mxu0 %v4002_v8 }
 0x600   : > { %v2608_v35 = vsel %vm494_vm8, %v2599_v46, %v2600_v16  ;;  %v4003_v24 = vld [vmem:[#allocation3 + $0xc8] ss:$12 sps:$4 sm:$0xff]   ;;  %3361 = vmatprep.subr.bf16.mxu1 %v3752_v31  ;;  %vm5687_vm8 = vmmov %vm5685_vm0 }
 0x601   : > { %v2609_v9 = vsel %vm874_vm3, %v2586_v1, %v2608_v35  ;;  %3362 = vmatpush2.bf16.msra.mxu1 %v3751_v55  ;;  %3853 = vmatprep.subr.bf16.mxu0 %v4003_v24  ;;  %vm5688_vm3 = vmmov %vm5685_vm0 }
 0x602   : > { %v3748_v13 = vcombine.low %v5545_v25, %v2609_v9  ;;  %v3749_v4 = vcombine.high %v5545_v25, %v2609_v9  ;;  %3854 = vmatpush3.bf16.msra.mxu0 %v4004_v36 }
 0x603   : > { %3889 = vmatprep.subr.bf16.mxu0 %v4005_v38 }
 0x604   : > { %3363 = vmatprep.subr.bf16.mxu1 %v3749_v4 }
 0x605   : > { %3364 = vmatpush2.bf16.msra.mxu1 %v3748_v13  ;;  %3472 = vmatmul.mubr.bf16.vlgmr.msra.gmra.mxu0 %v4006_v18 }
 0x606   : > { %3890 = vmatpush3.bf16.msra.mxu0 %v4005_v38  ;;  %3479 = vmatprep.mubr.bf16.mxu0 %v4010_v32 }
 0x607   : > { %3891 = vmatprep.subr.bf16.mxu0 %v4009_v10 }
 0x608   : > { %3366 = vmatmul.mubr.bf16.vlgmr.msra.gmra.mxu1 %v4006_v18 }
 0x609   : > { %3375 = vmatprep.mubr.bf16.mxu1 %v4010_v32 }
 0x60a   : > { %3892 = vmatpush3.bf16.msra.mxu0 %v4009_v10  ;;  %v2997_v2 = vpop.permute.xlu0 %2996 }
 0x60d   : > { %3480 = vmatmul.mubr.bf16.gmra.mxu0 %v4012_v6 }
 0x60e   : > { %3893 = vmatprep.mubr.msk.bf16.mxu0 %vm5687_vm8, %v5481_v54  ;;  %v3007_v19 = vpop.permute.xlu0 %3006 }
 0x610   : > { %3376 = vmatmul.mubr.bf16.gmra.mxu1 %v4012_v6 }
 0x615   : > { %3894 = vmatmul.mubr.msk.bf16.vlgmr.msra.gmra.mxu0 %vm5688_vm3, %v5517_v11 }
 0x6a0   : > { %v3420_v29 = vpop.f32.mrf.mxu0 }
 0x6a2   : > { %v3422_v42 = vpop.f32.mrf.mxu0 }
 0x6a4   : > { %v3424_v20 = vpop.f32.mrf.mxu0 }
 0x6a6   : > { %v3426_v21 = vpop.f32.mrf.mxu0 }
 0x6a8   : > { %v3430_v34 = vpop.f32.mrf.mxu0 }
 0x6aa   : > { %v3432_v48 = vpop.f32.mrf.mxu0 }
 0x6ac   : > { %v3434_v50 = vpop.f32.mrf.mxu0 }
 0x6ae   : > { %v3436_v52 = vpop.f32.mrf.mxu0 }
 0x6c5   : > { %v3855_v17 = vpop.f32.mrf.mxu0 }
 0x6c7   : > { %v3856_v41 = vpop.f32.mrf.mxu0 }
 0x6c8   : > { %v3367_v57 = vpop.f32.mrf.mxu1  ;;  %v3857_v0 = vadd.f32 %v3856_v41, %v3855_v17 }
 0x6c9   : > { %v3368_v54 = vadd.f32 %v3367_v57, %v2992_v26  ;;  %v3858_v27 = vpop.f32.mrf.mxu0 }
 0x6ca   : > { %v3369_v37 = vpop.f32.mrf.mxu1  ;;  %v3474_v63 = vadd.f32 %v3857_v0, %v2992_v26 }
 0x6cb   : > { %v3421_v11 = vadd.f32 %v3420_v29, %v3368_v54  ;;  %v3370_v56 = vadd.f32 %v3369_v37, %v2992_v26  ;;  %v3859_v59 = vpop.f32.mrf.mxu0 }
 0x6cc   : > { %v3371_v40 = vpop.f32.mrf.mxu1  ;;  %v3860_v43 = vadd.f32 %v3859_v59, %v3858_v27 }
 0x6cd   : > { %3537 = vst [vmem:[%s5586_s21] sm:$0xff] %v3421_v11  ;;  %v3423_v22 = vadd.f32 %v3422_v42, %v3370_v56  ;;  %v3372_v25 = vadd.f32 %v3371_v40, %v2997_v2  ;;  %v3861_v12 = vpop.f32.mrf.mxu0 }
 0x6ce   : > { %v3373_v7 = vpop.f32.mrf.mxu1  ;;  %v3477_v38 = vadd.f32 %v3860_v43, %v2997_v2 }
 0x6cf   : > { %3538 = vst [vmem:[%s5586_s21 + $0x8] sm:$0xff] %v3423_v22  ;;  %v3425_v45 = vadd.f32 %v3424_v20, %v3372_v25  ;;  %v3374_v3 = vadd.f32 %v3373_v7, %v2997_v2  ;;  %v3862_v30 = vpop.f32.mrf.mxu0 }
 0x6d0   : > { %v3377_v61 = vpop.f32.mrf.mxu1  ;;  %v3863_v23 = vadd.f32 %v3862_v30, %v3861_v12 }
 0x6d1   : > { %3540 = vst [vmem:[%s5586_s21 + $0x18] sm:$0xff] %v3425_v45  ;;  %v3427_v44 = vadd.f32 %v3426_v21, %v3374_v3  ;;  %v3378_v5 = vadd.f32 %v3377_v61, %v3002_v53  ;;  %v3864_v62 = vpop.f32.mrf.mxu0 }
 0x6d2   : > { %v3379_v60 = vpop.f32.mrf.mxu1  ;;  %v3482_v51 = vadd.f32 %v3863_v23, %v3002_v53 }
 0x6d3   : > { %3541 = vst [vmem:[%s5586_s21 + $0x20] sm:$0xff] %v3427_v44  ;;  %v3431_v16 = vadd.f32 %v3430_v34, %v3378_v5  ;;  %v3380_v58 = vadd.f32 %v3379_v60, %v3002_v53  ;;  %v3865_v28 = vpop.f32.mrf.mxu0 }
 0x6d4   : > { %v3381_v33 = vpop.f32.mrf.mxu1  ;;  %v3866_v39 = vadd.f32 %v3865_v28, %v3864_v62 }
 0x6d5   : > { %3543 = vst [vmem:[%s5586_s21 + $0x30] sm:$0xff] %v3431_v16  ;;  %v3433_v47 = vadd.f32 %v3432_v48, %v3380_v58  ;;  %v3382_v14 = vadd.f32 %v3381_v33, %v3007_v19  ;;  %v3895_v49 = vpop.f32.mrf.mxu0 }
 0x6d6   : > { %v3383_v15 = vpop.f32.mrf.mxu1  ;;  %v3531_v1 = vadd.f32 %v3895_v49, %v3482_v51  ;;  %v3485_v35 = vadd.f32 %v3866_v39, %v3007_v19 }
 0x6d7   : > { %3544 = vst [vmem:[%s5586_s21 + $0x38] sm:$0xff] %v3433_v47  ;;  %v3435_v8 = vadd.f32 %v3434_v50, %v3382_v14  ;;  %v3384_v46 = vadd.f32 %v3383_v15, %v3007_v19  ;;  %v3522_v55 = vpop.f32.mrf.mxu0 }
 0x6d8   : > { %3545 = vst [vmem:[%s5586_s21 + $0x40] sm:$0xff] %v3531_v1  ;;  %v3523_v31 = vadd.f32 %v3522_v55, %v3474_v63 }
 0x6d9   : > { %3546 = vst [vmem:[%s5586_s21 + $0x48] sm:$0xff] %v3435_v8  ;;  %v3437_v24 = vadd.f32 %v3436_v52, %v3384_v46  ;;  %v3896_v9 = vpop.f32.mrf.mxu0 }
 0x6da   : > { %3539 = vst [vmem:[%s5586_s21 + $0x10] sm:$0xff] %v3523_v31  ;;  %v3534_v36 = vadd.f32 %v3896_v9, %v3485_v35 }
 0x6db   : > { %3547 = vst [vmem:[%s5586_s21 + $0x50] sm:$0xff] %v3437_v24  ;;  %v3525_v18 = vpop.f32.mrf.mxu0 }
 0x6dc   : > { %3548 = vst [vmem:[%s5586_s21 + $0x58] sm:$0xff] %v3534_v36  ;;  %v3526_v13 = vadd.f32 %v3525_v18, %v3477_v38 }
 0x6de   : > { %3542 = vst [vmem:[%s5586_s21 + $0x28] sm:$0xff] %v3526_v13 }
 0x6df   : > { %4026 = shalt.err (!%p4023_p3)
}
 0x6e0   : > { %s4027_s18 = scalar_lea.hbm %s5606_s25, 1536  ;;  %s4031_s21 = scalar_lea.hbm %s5659_s8, 3072 }
 0x6e1   : > { %p4028_p4 = scmp.ne.s32.totalorder %s5606_s25, %s4027_s18  ;;  %p4032_p9 = scmp.lt.s32.totalorder %s5606_s25, %s5659_s8 }
 0x6e2   : > { %p4033_p10 = scmp.lt.s32.totalorder %s4031_s21, %s4027_s18 }
 0x6e3   : > { %p4029_p7 = pnand %p4028_p4, %p4180_p5 }
 0x6e4   : > { %p4034_p11 = por %p4033_p10, %p4032_p9 }
 0x6e5   : > { %p4030_p8 = pneg %p4029_p7 }
 0x6e7   : > { %p4035_p12 = pnand %p4034_p11, %p4030_p8 }
 0x6e9   : > { %4038 = shalt.err (!%p4035_p12)
}
 0x6ea   : > { %s4095_s17 = smov 384   ;;  %s4096_s26 = smov 24  }
 0x6eb   : > { %3899 = dma.vmem_to_hbm [thread:$0]  (%p4180_p5), %s5600_s23, 1536, %s5606_s25, %s5611_s9, %s4095_s17, %s4095_s17, %s4096_s26  }
 0x6ec PF: > { %p3905_p13 = scmp.ge.s32.totalorder %s4073_s30, 2  ;;  %s3578_s10 = sand.u32 1, %s4061_s27  }
 0x6ed   : > { %s3579_s12 = scalar_lea.sflag [#allocation5], %s3578_s10 }
 0x6ee   : > { %p3902_p0 = pnand %p3905_p13, %p4184_p6 }
 0x6f0   : > { %p3903_p1 = pneg %p3902_p0 }
 0x6f2   : > { %4056 = dma.done.wait (%p3903_p1), %s3579_s12, 1536  }
 0x6f3   : > { %4058 = vsyncadd (%p3903_p1), %s3579_s12, 4294965760  ;;  %p18_p2 = scmp.ge.s32.totalorder %s4167_s11, 4   ;;  %s5689_s27 = smov %s4065_s28 }
 0x6f4   : > { %s5690_s28 = smov %s4069_s29  ;;  %s5691_s29 = smov %s4178_s14 }
 0x6f5   : > { %s5692_s30 = smov %s4167_s11  ;;  %20 = sbr.rel (!%p18_p2) target bundleno = 3 (0x3), region = 87 }
 0x6fa   :  { %3584 = vsyncpa [#allocation5], 1 }
 0x6fb   :  { %3586 = vsyncpa [#allocation5 + $0x1], 1 }

</bundles_post_ra>
